<compile_context>
chip_gen: v5e
topology: v5e:2x2
jax: 0.10.0
libtpu: 0.0.40
codegen_flags: <defaults>
</compile_context>

<pallas_src>
import jax
import jax.numpy as jnp
from jax import lax
from jax.experimental import pallas as pl
from jax.experimental.pallas import tpu as pltpu


def _down_kernel(x_ref, w1_ref, b1_ref, w2_ref, b2_ref, out_ref,
                 pad1_ref, pad2_ref):
    # x_ref block:   (1, Hp, 2, Wp, 2*Cin)  bf16  (pool windows pre-split for free)
    # out_ref block: (1, Hp, Wp, Cout)      f32
    _, Hp, _, Wp, two_cin = x_ref.shape
    cin = two_cin // 2
    cmid = w1_ref.shape[3]
    cout = w2_ref.shape[3]

    # ---- 2x2 max pool, stride 2 (no strided loads, no in-kernel reshapes) ----
    r0 = x_ref[0, :, 0, :, :]                      # even input rows  (Hp, Wp, 2*Cin)
    r1 = x_ref[0, :, 1, :, :]                      # odd  input rows
    hmax = jnp.maximum(r0, r1)                     # vertical pool
    pooled = jnp.maximum(hmax[:, :, :cin], hmax[:, :, cin:])   # horizontal pool -> (Hp, Wp, Cin)

    # ---- conv1: 3x3 pad 1 (BN1 scale pre-folded into w1), bias + ReLU ----
    pad1_ref[...] = jnp.zeros(pad1_ref.shape, pad1_ref.dtype)
    pad1_ref[1:Hp + 1, 1:Wp + 1, :] = pooled.astype(pad1_ref.dtype)
    acc1 = jnp.zeros((Hp * Wp, cmid), jnp.float32)
    for dy in range(3):
        for dx in range(3):
            patch = pad1_ref[dy:dy + Hp, dx:dx + Wp, :].reshape(Hp * Wp, cin)
            acc1 += jnp.dot(patch, w1_ref[dy, dx],
                            preferred_element_type=jnp.float32)
    h1 = jnp.maximum(acc1 + b1_ref[...], 0.0)      # f32

    # ---- conv2: 3x3 pad 1 (BN2 scale pre-folded into w2), bias + ReLU ----
    pad2_ref[...] = jnp.zeros(pad2_ref.shape, pad2_ref.dtype)
    pad2_ref[1:Hp + 1, 1:Wp + 1, :] = h1.reshape(Hp, Wp, cmid).astype(pad2_ref.dtype)
    acc2 = jnp.zeros((Hp * Wp, cout), jnp.float32)
    for dy in range(3):
        for dx in range(3):
            patch = pad2_ref[dy:dy + Hp, dx:dx + Wp, :].reshape(Hp * Wp, cmid)
            acc2 += jnp.dot(patch, w2_ref[dy, dx],
                            preferred_element_type=jnp.float32)
    h2 = jnp.maximum(acc2 + b2_ref[...], 0.0)      # f32

    out_ref[0] = h2.reshape(Hp, Wp, cout).astype(out_ref.dtype)


def down_forward(x_nchw, w1, g1, b1, m1, v1, w2, g2, b2, m2, v2, eps=1e-5):
    """Down.forward. x_nchw: (N, Cin, H, W) f32. Returns (N, Cout, H//2, W//2) f32."""
    N, Cin, H, W = x_nchw.shape
    Cmid, Cout = w1.shape[0], w2.shape[0]
    assert H % 2 == 0 and W % 2 == 0, "odd spatial dims (MaxPool2d floor) not supported"
    Hp, Wp = H // 2, W // 2

    # NCHW -> NHWC; bf16 feed halves DMA bytes and hits the MXU native bf16 rate.
    x_nhwc = jnp.transpose(x_nchw, (0, 2, 3, 1)).astype(jnp.bfloat16)
    # Free (row-major) reshape exposing the 2x2 pool windows:
    # last dim = [even-column channels | odd-column channels].
    x_pool = x_nhwc.reshape(N, Hp, 2, Wp, 2 * Cin)

    # Fold eval-mode BN: scale into the (bf16) conv weights, bias kept in f32.
    s1 = g1 / jnp.sqrt(v1 + eps)
    s2 = g2 / jnp.sqrt(v2 + eps)
    bb1 = (b1 - m1 * s1).reshape(1, Cmid).astype(jnp.float32)
    bb2 = (b2 - m2 * s2).reshape(1, Cout).astype(jnp.float32)
    w1_k = (jnp.transpose(w1, (2, 3, 1, 0)) * s1[None, None, None, :]).astype(jnp.bfloat16)
    w2_k = (jnp.transpose(w2, (2, 3, 1, 0)) * s2[None, None, None, :]).astype(jnp.bfloat16)

    out_nhwc = pl.pallas_call(
        _down_kernel,
        out_shape=jax.ShapeDtypeStruct((N, Hp, Wp, Cout), jnp.float32),
        grid_spec=pltpu.PrefetchScalarGridSpec(
            num_scalar_prefetch=0,
            grid=(N,),
            in_specs=[
                pl.BlockSpec((1, Hp, 2, Wp, 2 * Cin), lambda n: (n, 0, 0, 0, 0)),
                pl.BlockSpec((3, 3, Cin, Cmid), lambda n: (0, 0, 0, 0)),
                pl.BlockSpec((1, Cmid), lambda n: (0, 0)),
                pl.BlockSpec((3, 3, Cmid, Cout), lambda n: (0, 0, 0, 0)),
                pl.BlockSpec((1, Cout), lambda n: (0, 0)),
            ],
            out_specs=pl.BlockSpec((1, Hp, Wp, Cout), lambda n: (n, 0, 0, 0)),
            scratch_shapes=[
                pltpu.VMEM((Hp + 2, Wp + 2, Cin), jnp.bfloat16),   # padded pooled input
                pltpu.VMEM((Hp + 2, Wp + 2, Cmid), jnp.bfloat16),  # padded conv1 output
            ],
        ),
        compiler_params=pltpu.CompilerParams(
            dimension_semantics=("parallel",),     # batch images are independent
            vmem_limit_bytes=32 * 1024 * 1024,
        ),
    )(x_pool, w1_k, bb1, w2_k, bb2)

    return jnp.transpose(out_nhwc, (0, 3, 1, 2))   # NHWC -> NCHW


def down_reference(x, w1, g1, b1, m1, v1, w2, g2, b2, m2, v2,
                   eps=1e-5, quantized_ops=False):
    """Pure-JAX NCHW reference (eval-mode BN). With quantized_ops=True the
    operands are rounded to bf16 exactly like the kernel's MXU feed."""
    q = ((lambda a: a.astype(jnp.bfloat16).astype(jnp.float32))
         if quantized_ops else (lambda a: a))
    conv = lambda a, w: lax.conv_general_dilated(
        a, w, (1, 1), "SAME", dimension_numbers=("NCHW", "OIHW", "NCHW"),
        precision=lax.Precision.HIGHEST)
    s1 = g1 / jnp.sqrt(v1 + eps)
    s2 = g2 / jnp.sqrt(v2 + eps)
    w1f = q(w1 * s1[:, None, None, None])
    w2f = q(w2 * s2[:, None, None, None])
    p = lax.reduce_window(q(x), -jnp.inf, lax.max, (1, 1, 2, 2), (1, 1, 2, 2), "VALID")
    h = jnp.maximum(conv(p, w1f) + (b1 - m1 * s1)[None, :, None, None], 0.0)
    h = q(h)                                        # kernel keeps h1 in bf16
    return jnp.maximum(conv(h, w2f) + (b2 - m2 * s2)[None, :, None, None], 0.0)


if __name__ == "__main__":
    N, Cin, H, W = 2, 4, 16, 16
    Cout = 8                      # Down(4, 8): mid == out == 8
    Cmid = Cout

    key = jax.random.PRNGKey(0)
    ks = jax.random.split(key, 11)
    x = jax.random.normal(ks[0], (N, Cin, H, W), jnp.float32)

    w1 = jax.random.normal(ks[1], (Cmid, Cin, 3, 3), jnp.float32) * 0.2
    g1 = jax.random.uniform(ks[2], (Cmid,), jnp.float32, 0.5, 1.5)
    b1 = jax.random.normal(ks[3], (Cmid,), jnp.float32) * 0.1
    m1 = jax.random.normal(ks[4], (Cmid,), jnp.float32) * 0.1
    v1 = jax.random.uniform(ks[5], (Cmid,), jnp.float32, 0.5, 1.5)

    w2 = jax.random.normal(ks[6], (Cout, Cmid, 3, 3), jnp.float32) * 0.2
    g2 = jax.random.uniform(ks[7], (Cout,), jnp.float32, 0.5, 1.5)
    b2 = jax.random.normal(ks[8], (Cout,), jnp.float32) * 0.1
    m2 = jax.random.normal(ks[9], (Cout,), jnp.float32) * 0.1
    v2 = jax.random.uniform(ks[10], (Cout,), jnp.float32, 0.5, 1.5)

    out = down_forward(x, w1, g1, b1, m1, v1, w2, g2, b2, m2, v2)
    out = jax.block_until_ready(out)
    assert out.shape == (N, Cout, H // 2, W // 2), out.shape

    # Tight structural check: reference fed the same bf16-rounded operands.
    ref_q = down_reference(x, w1, g1, b1, m1, v1, w2, g2, b2, m2, v2,
                           quantized_ops=True)
    assert jnp.allclose(out, ref_q, atol=1e-2, rtol=1e-2), \
        float(jnp.max(jnp.abs(out - ref_q)))

    # Semantic check vs. exact f32 eval-mode math (loose: the kernel feeds the
    # MXU in bf16, ~2^-9 relative precision through two convs + BN scales).
    ref = down_reference(x, w1, g1, b1, m1, v1, w2, g2, b2, m2, v2)
    assert jnp.allclose(out, ref, atol=1.5e-1, rtol=5e-2), \
        float(jnp.max(jnp.abs(out - ref)))

    print("KERNEL_OK")
</pallas_src>

<mosaic_0001>
module attributes {stable_mosaic.version = 11 : i64} {
  func.func @_down_kernel(%arg0: i32, %arg1: memref<1x8x2x8x8xbf16, #tpu.memory_space<vmem>>, %arg2: memref<3x3x4x8xbf16, #tpu.memory_space<vmem>>, %arg3: memref<1x8xf32, #tpu.memory_space<vmem>>, %arg4: memref<3x3x8x8xbf16, #tpu.memory_space<vmem>>, %arg5: memref<1x8xf32, #tpu.memory_space<vmem>>, %arg6: memref<1x8x8x8xf32, #tpu.memory_space<vmem>>, %arg7: memref<10x10x4xbf16, #tpu.memory_space<vmem>>, %arg8: memref<10x10x8xbf16, #tpu.memory_space<vmem>>) attributes {dimension_semantics = [#tpu.dimension_semantics<parallel>], iteration_bounds = array<i64: 2>, scalar_prefetch = 0 : i64, scratch_operands = 2 : i64, tpu.core_type = #tpu.core_type<tc>, window_params = [{transform_indices = @transform_0, window_bounds = array<i64: 1, 8, 2, 8, 8>}, {pipeline_mode = #tpu.pipeline_mode<synchronous>, transform_indices = @transform_1, window_bounds = array<i64: 3, 3, 4, 8>}, {pipeline_mode = #tpu.pipeline_mode<synchronous>, transform_indices = @transform_2, window_bounds = array<i64: 1, 8>}, {pipeline_mode = #tpu.pipeline_mode<synchronous>, transform_indices = @transform_3, window_bounds = array<i64: 3, 3, 8, 8>}, {pipeline_mode = #tpu.pipeline_mode<synchronous>, transform_indices = @transform_4, window_bounds = array<i64: 1, 8>}, {transform_indices = @transform_5, window_bounds = array<i64: 1, 8, 8, 8>}]} {
    %c0 = arith.constant 0 : index
    %c0_0 = arith.constant 0 : index
    %c0_1 = arith.constant 0 : index
    %c0_2 = arith.constant 0 : index
    %c0_3 = arith.constant 0 : index
    %0 = vector.load %arg1[%c0, %c0_0, %c0_1, %c0_2, %c0_3] : memref<1x8x2x8x8xbf16, #tpu.memory_space<vmem>>, vector<1x8x1x8x8xbf16>
    %1 = vector.shape_cast %0 : vector<1x8x1x8x8xbf16> to vector<8x8x8xbf16>
    %c0_4 = arith.constant 0 : index
    %c0_5 = arith.constant 0 : index
    %c1 = arith.constant 1 : index
    %c0_6 = arith.constant 0 : index
    %c0_7 = arith.constant 0 : index
    %2 = vector.load %arg1[%c0_4, %c0_5, %c1, %c0_6, %c0_7] : memref<1x8x2x8x8xbf16, #tpu.memory_space<vmem>>, vector<1x8x1x8x8xbf16>
    %3 = vector.shape_cast %2 : vector<1x8x1x8x8xbf16> to vector<8x8x8xbf16>
    %4 = arith.maximumf %1, %3 : vector<8x8x8xbf16>
    %5 = vector.extract_strided_slice %4 {offsets = [0, 0, 0], sizes = [8, 8, 4], strides = [1, 1, 1]} : vector<8x8x8xbf16> to vector<8x8x4xbf16>
    %6 = vector.extract_strided_slice %4 {offsets = [0, 0, 4], sizes = [8, 8, 4], strides = [1, 1, 1]} : vector<8x8x8xbf16> to vector<8x8x4xbf16>
    %7 = arith.maximumf %5, %6 : vector<8x8x4xbf16>
    %cst = arith.constant 0.000000e+00 : bf16
    %8 = vector.broadcast %cst : bf16 to vector<10x10x4xbf16>
    %c0_8 = arith.constant 0 : index
    %c0_9 = arith.constant 0 : index
    %c0_10 = arith.constant 0 : index
    %9 = vector.load %arg7[%c0_8, %c0_9, %c0_10] : memref<10x10x4xbf16, #tpu.memory_space<vmem>>, vector<10x10x4xbf16>
    tpu.vector_store %arg7[%c0_8, %c0_9, %c0_10], %8 {strides = array<i32>} : memref<10x10x4xbf16, #tpu.memory_space<vmem>>, vector<10x10x4xbf16>,
    %c1_11 = arith.constant 1 : index
    %c1_12 = arith.constant 1 : index
    %c0_13 = arith.constant 0 : index
    %10 = vector.load %arg7[%c1_11, %c1_12, %c0_13] : memref<10x10x4xbf16, #tpu.memory_space<vmem>>, vector<8x8x4xbf16>
    tpu.vector_store %arg7[%c1_11, %c1_12, %c0_13], %7 {strides = array<i32>} : memref<10x10x4xbf16, #tpu.memory_space<vmem>>, vector<8x8x4xbf16>,
    %cst_14 = arith.constant 0.000000e+00 : f32
    %11 = vector.broadcast %cst_14 : f32 to vector<64x8xf32>
    %c0_15 = arith.constant 0 : index
    %c0_16 = arith.constant 0 : index
    %c0_17 = arith.constant 0 : index
    %12 = vector.load %arg7[%c0_15, %c0_16, %c0_17] : memref<10x10x4xbf16, #tpu.memory_space<vmem>>, vector<8x8x4xbf16>
    %13 = vector.shape_cast %12 : vector<8x8x4xbf16> to vector<64x4xbf16>
    %c0_18 = arith.constant 0 : index
    %c0_19 = arith.constant 0 : index
    %c0_20 = arith.constant 0 : index
    %c0_21 = arith.constant 0 : index
    %14 = vector.load %arg2[%c0_18, %c0_19, %c0_20, %c0_21] : memref<3x3x4x8xbf16, #tpu.memory_space<vmem>>, vector<1x1x4x8xbf16>
    %15 = vector.shape_cast %14 : vector<1x1x4x8xbf16> to vector<4x8xbf16>
    %cst_22 = arith.constant dense<0.000000e+00> : vector<64x8xf32>
    %16 = tpu.matmul %13, %15, %cst_22 {dimension_numbers = #tpu.dot_dimension_numbers<[1], [0], [0], [1], [0, 0, 1, 1], [], []>} : vector<64x4xbf16>, vector<4x8xbf16>, vector<64x8xf32> -> vector<64x8xf32>
    %17 = arith.addf %11, %16 : vector<64x8xf32>
    %c0_23 = arith.constant 0 : index
    %c1_24 = arith.constant 1 : index
    %c0_25 = arith.constant 0 : index
    %18 = vector.load %arg7[%c0_23, %c1_24, %c0_25] : memref<10x10x4xbf16, #tpu.memory_space<vmem>>, vector<8x8x4xbf16>
    %19 = vector.shape_cast %18 : vector<8x8x4xbf16> to vector<64x4xbf16>
    %c0_26 = arith.constant 0 : index
    %c1_27 = arith.constant 1 : index
    %c0_28 = arith.constant 0 : index
    %c0_29 = arith.constant 0 : index
    %20 = vector.load %arg2[%c0_26, %c1_27, %c0_28, %c0_29] : memref<3x3x4x8xbf16, #tpu.memory_space<vmem>>, vector<1x1x4x8xbf16>
    %21 = vector.shape_cast %20 : vector<1x1x4x8xbf16> to vector<4x8xbf16>
    %cst_30 = arith.constant dense<0.000000e+00> : vector<64x8xf32>
    %22 = tpu.matmul %19, %21, %cst_30 {dimension_numbers = #tpu.dot_dimension_numbers<[1], [0], [0], [1], [0, 0, 1, 1], [], []>} : vector<64x4xbf16>, vector<4x8xbf16>, vector<64x8xf32> -> vector<64x8xf32>
    %23 = arith.addf %17, %22 : vector<64x8xf32>
    %c0_31 = arith.constant 0 : index
    %c2 = arith.constant 2 : index
    %c0_32 = arith.constant 0 : index
    %24 = vector.load %arg7[%c0_31, %c2, %c0_32] : memref<10x10x4xbf16, #tpu.memory_space<vmem>>, vector<8x8x4xbf16>
    %25 = vector.shape_cast %24 : vector<8x8x4xbf16> to vector<64x4xbf16>
    %c0_33 = arith.constant 0 : index
    %c2_34 = arith.constant 2 : index
    %c0_35 = arith.constant 0 : index
    %c0_36 = arith.constant 0 : index
    %26 = vector.load %arg2[%c0_33, %c2_34, %c0_35, %c0_36] : memref<3x3x4x8xbf16, #tpu.memory_space<vmem>>, vector<1x1x4x8xbf16>
    %27 = vector.shape_cast %26 : vector<1x1x4x8xbf16> to vector<4x8xbf16>
    %cst_37 = arith.constant dense<0.000000e+00> : vector<64x8xf32>
    %28 = tpu.matmul %25, %27, %cst_37 {dimension_numbers = #tpu.dot_dimension_numbers<[1], [0], [0], [1], [0, 0, 1, 1], [], []>} : vector<64x4xbf16>, vector<4x8xbf16>, vector<64x8xf32> -> vector<64x8xf32>
    %29 = arith.addf %23, %28 : vector<64x8xf32>
    %c1_38 = arith.constant 1 : index
    %c0_39 = arith.constant 0 : index
    %c0_40 = arith.constant 0 : index
    %30 = vector.load %arg7[%c1_38, %c0_39, %c0_40] : memref<10x10x4xbf16, #tpu.memory_space<vmem>>, vector<8x8x4xbf16>
    %31 = vector.shape_cast %30 : vector<8x8x4xbf16> to vector<64x4xbf16>
    %c1_41 = arith.constant 1 : index
    %c0_42 = arith.constant 0 : index
    %c0_43 = arith.constant 0 : index
    %c0_44 = arith.constant 0 : index
    %32 = vector.load %arg2[%c1_41, %c0_42, %c0_43, %c0_44] : memref<3x3x4x8xbf16, #tpu.memory_space<vmem>>, vector<1x1x4x8xbf16>
    %33 = vector.shape_cast %32 : vector<1x1x4x8xbf16> to vector<4x8xbf16>
    %cst_45 = arith.constant dense<0.000000e+00> : vector<64x8xf32>
    %34 = tpu.matmul %31, %33, %cst_45 {dimension_numbers = #tpu.dot_dimension_numbers<[1], [0], [0], [1], [0, 0, 1, 1], [], []>} : vector<64x4xbf16>, vector<4x8xbf16>, vector<64x8xf32> -> vector<64x8xf32>
    %35 = arith.addf %29, %34 : vector<64x8xf32>
    %c1_46 = arith.constant 1 : index
    %c1_47 = arith.constant 1 : index
    %c0_48 = arith.constant 0 : index
    %36 = vector.load %arg7[%c1_46, %c1_47, %c0_48] : memref<10x10x4xbf16, #tpu.memory_space<vmem>>, vector<8x8x4xbf16>
    %37 = vector.shape_cast %36 : vector<8x8x4xbf16> to vector<64x4xbf16>
    %c1_49 = arith.constant 1 : index
    %c1_50 = arith.constant 1 : index
    %c0_51 = arith.constant 0 : index
    %c0_52 = arith.constant 0 : index
    %38 = vector.load %arg2[%c1_49, %c1_50, %c0_51, %c0_52] : memref<3x3x4x8xbf16, #tpu.memory_space<vmem>>, vector<1x1x4x8xbf16>
    %39 = vector.shape_cast %38 : vector<1x1x4x8xbf16> to vector<4x8xbf16>
    %cst_53 = arith.constant dense<0.000000e+00> : vector<64x8xf32>
    %40 = tpu.matmul %37, %39, %cst_53 {dimension_numbers = #tpu.dot_dimension_numbers<[1], [0], [0], [1], [0, 0, 1, 1], [], []>} : vector<64x4xbf16>, vector<4x8xbf16>, vector<64x8xf32> -> vector<64x8xf32>
    %41 = arith.addf %35, %40 : vector<64x8xf32>
    %c1_54 = arith.constant 1 : index
    %c2_55 = arith.constant 2 : index
    %c0_56 = arith.constant 0 : index
    %42 = vector.load %arg7[%c1_54, %c2_55, %c0_56] : memref<10x10x4xbf16, #tpu.memory_space<vmem>>, vector<8x8x4xbf16>
    %43 = vector.shape_cast %42 : vector<8x8x4xbf16> to vector<64x4xbf16>
    %c1_57 = arith.constant 1 : index
    %c2_58 = arith.constant 2 : index
    %c0_59 = arith.constant 0 : index
    %c0_60 = arith.constant 0 : index
    %44 = vector.load %arg2[%c1_57, %c2_58, %c0_59, %c0_60] : memref<3x3x4x8xbf16, #tpu.memory_space<vmem>>, vector<1x1x4x8xbf16>
    %45 = vector.shape_cast %44 : vector<1x1x4x8xbf16> to vector<4x8xbf16>
    %cst_61 = arith.constant dense<0.000000e+00> : vector<64x8xf32>
    %46 = tpu.matmul %43, %45, %cst_61 {dimension_numbers = #tpu.dot_dimension_numbers<[1], [0], [0], [1], [0, 0, 1, 1], [], []>} : vector<64x4xbf16>, vector<4x8xbf16>, vector<64x8xf32> -> vector<64x8xf32>
    %47 = arith.addf %41, %46 : vector<64x8xf32>
    %c2_62 = arith.constant 2 : index
    %c0_63 = arith.constant 0 : index
    %c0_64 = arith.constant 0 : index
    %48 = vector.load %arg7[%c2_62, %c0_63, %c0_64] : memref<10x10x4xbf16, #tpu.memory_space<vmem>>, vector<8x8x4xbf16>
    %49 = vector.shape_cast %48 : vector<8x8x4xbf16> to vector<64x4xbf16>
    %c2_65 = arith.constant 2 : index
    %c0_66 = arith.constant 0 : index
    %c0_67 = arith.constant 0 : index
    %c0_68 = arith.constant 0 : index
    %50 = vector.load %arg2[%c2_65, %c0_66, %c0_67, %c0_68] : memref<3x3x4x8xbf16, #tpu.memory_space<vmem>>, vector<1x1x4x8xbf16>
    %51 = vector.shape_cast %50 : vector<1x1x4x8xbf16> to vector<4x8xbf16>
    %cst_69 = arith.constant dense<0.000000e+00> : vector<64x8xf32>
    %52 = tpu.matmul %49, %51, %cst_69 {dimension_numbers = #tpu.dot_dimension_numbers<[1], [0], [0], [1], [0, 0, 1, 1], [], []>} : vector<64x4xbf16>, vector<4x8xbf16>, vector<64x8xf32> -> vector<64x8xf32>
    %53 = arith.addf %47, %52 : vector<64x8xf32>
    %c2_70 = arith.constant 2 : index
    %c1_71 = arith.constant 1 : index
    %c0_72 = arith.constant 0 : index
    %54 = vector.load %arg7[%c2_70, %c1_71, %c0_72] : memref<10x10x4xbf16, #tpu.memory_space<vmem>>, vector<8x8x4xbf16>
    %55 = vector.shape_cast %54 : vector<8x8x4xbf16> to vector<64x4xbf16>
    %c2_73 = arith.constant 2 : index
    %c1_74 = arith.constant 1 : index
    %c0_75 = arith.constant 0 : index
    %c0_76 = arith.constant 0 : index
    %56 = vector.load %arg2[%c2_73, %c1_74, %c0_75, %c0_76] : memref<3x3x4x8xbf16, #tpu.memory_space<vmem>>, vector<1x1x4x8xbf16>
    %57 = vector.shape_cast %56 : vector<1x1x4x8xbf16> to vector<4x8xbf16>
    %cst_77 = arith.constant dense<0.000000e+00> : vector<64x8xf32>
    %58 = tpu.matmul %55, %57, %cst_77 {dimension_numbers = #tpu.dot_dimension_numbers<[1], [0], [0], [1], [0, 0, 1, 1], [], []>} : vector<64x4xbf16>, vector<4x8xbf16>, vector<64x8xf32> -> vector<64x8xf32>
    %59 = arith.addf %53, %58 : vector<64x8xf32>
    %c2_78 = arith.constant 2 : index
    %c2_79 = arith.constant 2 : index
    %c0_80 = arith.constant 0 : index
    %60 = vector.load %arg7[%c2_78, %c2_79, %c0_80] : memref<10x10x4xbf16, #tpu.memory_space<vmem>>, vector<8x8x4xbf16>
    %61 = vector.shape_cast %60 : vector<8x8x4xbf16> to vector<64x4xbf16>
    %c2_81 = arith.constant 2 : index
    %c2_82 = arith.constant 2 : index
    %c0_83 = arith.constant 0 : index
    %c0_84 = arith.constant 0 : index
    %62 = vector.load %arg2[%c2_81, %c2_82, %c0_83, %c0_84] : memref<3x3x4x8xbf16, #tpu.memory_space<vmem>>, vector<1x1x4x8xbf16>
    %63 = vector.shape_cast %62 : vector<1x1x4x8xbf16> to vector<4x8xbf16>
    %cst_85 = arith.constant dense<0.000000e+00> : vector<64x8xf32>
    %64 = tpu.matmul %61, %63, %cst_85 {dimension_numbers = #tpu.dot_dimension_numbers<[1], [0], [0], [1], [0, 0, 1, 1], [], []>} : vector<64x4xbf16>, vector<4x8xbf16>, vector<64x8xf32> -> vector<64x8xf32>
    %65 = arith.addf %59, %64 : vector<64x8xf32>
    %c0_86 = arith.constant 0 : index
    %c0_87 = arith.constant 0 : index
    %66 = vector.load %arg3[%c0_86, %c0_87] : memref<1x8xf32, #tpu.memory_space<vmem>>, vector<1x8xf32>
    %67 = vector.broadcast %66 : vector<1x8xf32> to vector<64x8xf32>
    %68 = arith.addf %65, %67 : vector<64x8xf32>
    %cst_88 = arith.constant 0.000000e+00 : f32
    %69 = vector.broadcast %cst_88 : f32 to vector<64x8xf32>
    %70 = arith.maximumf %68, %69 : vector<64x8xf32>
    %cst_89 = arith.constant 0.000000e+00 : bf16
    %71 = vector.broadcast %cst_89 : bf16 to vector<10x10x8xbf16>
    %c0_90 = arith.constant 0 : index
    %c0_91 = arith.constant 0 : index
    %c0_92 = arith.constant 0 : index
    %72 = vector.load %arg8[%c0_90, %c0_91, %c0_92] : memref<10x10x8xbf16, #tpu.memory_space<vmem>>, vector<10x10x8xbf16>
    tpu.vector_store %arg8[%c0_90, %c0_91, %c0_92], %71 {strides = array<i32>} : memref<10x10x8xbf16, #tpu.memory_space<vmem>>, vector<10x10x8xbf16>,
    %73 = vector.shape_cast %70 : vector<64x8xf32> to vector<8x8x8xf32>
    %74 = arith.truncf %73 : vector<8x8x8xf32> to vector<8x8x8xbf16>
    %c1_93 = arith.constant 1 : index
    %c1_94 = arith.constant 1 : index
    %c0_95 = arith.constant 0 : index
    %75 = vector.load %arg8[%c1_93, %c1_94, %c0_95] : memref<10x10x8xbf16, #tpu.memory_space<vmem>>, vector<8x8x8xbf16>
    tpu.vector_store %arg8[%c1_93, %c1_94, %c0_95], %74 {strides = array<i32>} : memref<10x10x8xbf16, #tpu.memory_space<vmem>>, vector<8x8x8xbf16>,
    %cst_96 = arith.constant 0.000000e+00 : f32
    %76 = vector.broadcast %cst_96 : f32 to vector<64x8xf32>
    %c0_97 = arith.constant 0 : index
    %c0_98 = arith.constant 0 : index
    %c0_99 = arith.constant 0 : index
    %77 = vector.load %arg8[%c0_97, %c0_98, %c0_99] : memref<10x10x8xbf16, #tpu.memory_space<vmem>>, vector<8x8x8xbf16>
    %78 = vector.shape_cast %77 : vector<8x8x8xbf16> to vector<64x8xbf16>
    %c0_100 = arith.constant 0 : index
    %c0_101 = arith.constant 0 : index
    %c0_102 = arith.constant 0 : index
    %c0_103 = arith.constant 0 : index
    %79 = vector.load %arg4[%c0_100, %c0_101, %c0_102, %c0_103] : memref<3x3x8x8xbf16, #tpu.memory_space<vmem>>, vector<1x1x8x8xbf16>
    %80 = vector.shape_cast %79 : vector<1x1x8x8xbf16> to vector<8x8xbf16>
    %cst_104 = arith.constant dense<0.000000e+00> : vector<64x8xf32>
    %81 = tpu.matmul %78, %80, %cst_104 {dimension_numbers = #tpu.dot_dimension_numbers<[1], [0], [0], [1], [0, 0, 1, 1], [], []>} : vector<64x8xbf16>, vector<8x8xbf16>, vector<64x8xf32> -> vector<64x8xf32>
    %82 = arith.addf %76, %81 : vector<64x8xf32>
    %c0_105 = arith.constant 0 : index
    %c1_106 = arith.constant 1 : index
    %c0_107 = arith.constant 0 : index
    %83 = vector.load %arg8[%c0_105, %c1_106, %c0_107] : memref<10x10x8xbf16, #tpu.memory_space<vmem>>, vector<8x8x8xbf16>
    %84 = vector.shape_cast %83 : vector<8x8x8xbf16> to vector<64x8xbf16>
    %c0_108 = arith.constant 0 : index
    %c1_109 = arith.constant 1 : index
    %c0_110 = arith.constant 0 : index
    %c0_111 = arith.constant 0 : index
    %85 = vector.load %arg4[%c0_108, %c1_109, %c0_110, %c0_111] : memref<3x3x8x8xbf16, #tpu.memory_space<vmem>>, vector<1x1x8x8xbf16>
    %86 = vector.shape_cast %85 : vector<1x1x8x8xbf16> to vector<8x8xbf16>
    %cst_112 = arith.constant dense<0.000000e+00> : vector<64x8xf32>
    %87 = tpu.matmul %84, %86, %cst_112 {dimension_numbers = #tpu.dot_dimension_numbers<[1], [0], [0], [1], [0, 0, 1, 1], [], []>} : vector<64x8xbf16>, vector<8x8xbf16>, vector<64x8xf32> -> vector<64x8xf32>
    %88 = arith.addf %82, %87 : vector<64x8xf32>
    %c0_113 = arith.constant 0 : index
    %c2_114 = arith.constant 2 : index
    %c0_115 = arith.constant 0 : index
    %89 = vector.load %arg8[%c0_113, %c2_114, %c0_115] : memref<10x10x8xbf16, #tpu.memory_space<vmem>>, vector<8x8x8xbf16>
    %90 = vector.shape_cast %89 : vector<8x8x8xbf16> to vector<64x8xbf16>
    %c0_116 = arith.constant 0 : index
    %c2_117 = arith.constant 2 : index
    %c0_118 = arith.constant 0 : index
    %c0_119 = arith.constant 0 : index
    %91 = vector.load %arg4[%c0_116, %c2_117, %c0_118, %c0_119] : memref<3x3x8x8xbf16, #tpu.memory_space<vmem>>, vector<1x1x8x8xbf16>
    %92 = vector.shape_cast %91 : vector<1x1x8x8xbf16> to vector<8x8xbf16>
    %cst_120 = arith.constant dense<0.000000e+00> : vector<64x8xf32>
    %93 = tpu.matmul %90, %92, %cst_120 {dimension_numbers = #tpu.dot_dimension_numbers<[1], [0], [0], [1], [0, 0, 1, 1], [], []>} : vector<64x8xbf16>, vector<8x8xbf16>, vector<64x8xf32> -> vector<64x8xf32>
    %94 = arith.addf %88, %93 : vector<64x8xf32>
    %c1_121 = arith.constant 1 : index
    %c0_122 = arith.constant 0 : index
    %c0_123 = arith.constant 0 : index
    %95 = vector.load %arg8[%c1_121, %c0_122, %c0_123] : memref<10x10x8xbf16, #tpu.memory_space<vmem>>, vector<8x8x8xbf16>
    %96 = vector.shape_cast %95 : vector<8x8x8xbf16> to vector<64x8xbf16>
    %c1_124 = arith.constant 1 : index
    %c0_125 = arith.constant 0 : index
    %c0_126 = arith.constant 0 : index
    %c0_127 = arith.constant 0 : index
    %97 = vector.load %arg4[%c1_124, %c0_125, %c0_126, %c0_127] : memref<3x3x8x8xbf16, #tpu.memory_space<vmem>>, vector<1x1x8x8xbf16>
    %98 = vector.shape_cast %97 : vector<1x1x8x8xbf16> to vector<8x8xbf16>
    %cst_128 = arith.constant dense<0.000000e+00> : vector<64x8xf32>
    %99 = tpu.matmul %96, %98, %cst_128 {dimension_numbers = #tpu.dot_dimension_numbers<[1], [0], [0], [1], [0, 0, 1, 1], [], []>} : vector<64x8xbf16>, vector<8x8xbf16>, vector<64x8xf32> -> vector<64x8xf32>
    %100 = arith.addf %94, %99 : vector<64x8xf32>
    %c1_129 = arith.constant 1 : index
    %c1_130 = arith.constant 1 : index
    %c0_131 = arith.constant 0 : index
    %101 = vector.load %arg8[%c1_129, %c1_130, %c0_131] : memref<10x10x8xbf16, #tpu.memory_space<vmem>>, vector<8x8x8xbf16>
    %102 = vector.shape_cast %101 : vector<8x8x8xbf16> to vector<64x8xbf16>
    %c1_132 = arith.constant 1 : index
    %c1_133 = arith.constant 1 : index
    %c0_134 = arith.constant 0 : index
    %c0_135 = arith.constant 0 : index
    %103 = vector.load %arg4[%c1_132, %c1_133, %c0_134, %c0_135] : memref<3x3x8x8xbf16, #tpu.memory_space<vmem>>, vector<1x1x8x8xbf16>
    %104 = vector.shape_cast %103 : vector<1x1x8x8xbf16> to vector<8x8xbf16>
    %cst_136 = arith.constant dense<0.000000e+00> : vector<64x8xf32>
    %105 = tpu.matmul %102, %104, %cst_136 {dimension_numbers = #tpu.dot_dimension_numbers<[1], [0], [0], [1], [0, 0, 1, 1], [], []>} : vector<64x8xbf16>, vector<8x8xbf16>, vector<64x8xf32> -> vector<64x8xf32>
    %106 = arith.addf %100, %105 : vector<64x8xf32>
    %c1_137 = arith.constant 1 : index
    %c2_138 = arith.constant 2 : index
    %c0_139 = arith.constant 0 : index
    %107 = vector.load %arg8[%c1_137, %c2_138, %c0_139] : memref<10x10x8xbf16, #tpu.memory_space<vmem>>, vector<8x8x8xbf16>
    %108 = vector.shape_cast %107 : vector<8x8x8xbf16> to vector<64x8xbf16>
    %c1_140 = arith.constant 1 : index
    %c2_141 = arith.constant 2 : index
    %c0_142 = arith.constant 0 : index
    %c0_143 = arith.constant 0 : index
    %109 = vector.load %arg4[%c1_140, %c2_141, %c0_142, %c0_143] : memref<3x3x8x8xbf16, #tpu.memory_space<vmem>>, vector<1x1x8x8xbf16>
    %110 = vector.shape_cast %109 : vector<1x1x8x8xbf16> to vector<8x8xbf16>
    %cst_144 = arith.constant dense<0.000000e+00> : vector<64x8xf32>
    %111 = tpu.matmul %108, %110, %cst_144 {dimension_numbers = #tpu.dot_dimension_numbers<[1], [0], [0], [1], [0, 0, 1, 1], [], []>} : vector<64x8xbf16>, vector<8x8xbf16>, vector<64x8xf32> -> vector<64x8xf32>
    %112 = arith.addf %106, %111 : vector<64x8xf32>
    %c2_145 = arith.constant 2 : index
    %c0_146 = arith.constant 0 : index
    %c0_147 = arith.constant 0 : index
    %113 = vector.load %arg8[%c2_145, %c0_146, %c0_147] : memref<10x10x8xbf16, #tpu.memory_space<vmem>>, vector<8x8x8xbf16>
    %114 = vector.shape_cast %113 : vector<8x8x8xbf16> to vector<64x8xbf16>
    %c2_148 = arith.constant 2 : index
    %c0_149 = arith.constant 0 : index
    %c0_150 = arith.constant 0 : index
    %c0_151 = arith.constant 0 : index
    %115 = vector.load %arg4[%c2_148, %c0_149, %c0_150, %c0_151] : memref<3x3x8x8xbf16, #tpu.memory_space<vmem>>, vector<1x1x8x8xbf16>
    %116 = vector.shape_cast %115 : vector<1x1x8x8xbf16> to vector<8x8xbf16>
    %cst_152 = arith.constant dense<0.000000e+00> : vector<64x8xf32>
    %117 = tpu.matmul %114, %116, %cst_152 {dimension_numbers = #tpu.dot_dimension_numbers<[1], [0], [0], [1], [0, 0, 1, 1], [], []>} : vector<64x8xbf16>, vector<8x8xbf16>, vector<64x8xf32> -> vector<64x8xf32>
    %118 = arith.addf %112, %117 : vector<64x8xf32>
    %c2_153 = arith.constant 2 : index
    %c1_154 = arith.constant 1 : index
    %c0_155 = arith.constant 0 : index
    %119 = vector.load %arg8[%c2_153, %c1_154, %c0_155] : memref<10x10x8xbf16, #tpu.memory_space<vmem>>, vector<8x8x8xbf16>
    %120 = vector.shape_cast %119 : vector<8x8x8xbf16> to vector<64x8xbf16>
    %c2_156 = arith.constant 2 : index
    %c1_157 = arith.constant 1 : index
    %c0_158 = arith.constant 0 : index
    %c0_159 = arith.constant 0 : index
    %121 = vector.load %arg4[%c2_156, %c1_157, %c0_158, %c0_159] : memref<3x3x8x8xbf16, #tpu.memory_space<vmem>>, vector<1x1x8x8xbf16>
    %122 = vector.shape_cast %121 : vector<1x1x8x8xbf16> to vector<8x8xbf16>
    %cst_160 = arith.constant dense<0.000000e+00> : vector<64x8xf32>
    %123 = tpu.matmul %120, %122, %cst_160 {dimension_numbers = #tpu.dot_dimension_numbers<[1], [0], [0], [1], [0, 0, 1, 1], [], []>} : vector<64x8xbf16>, vector<8x8xbf16>, vector<64x8xf32> -> vector<64x8xf32>
    %124 = arith.addf %118, %123 : vector<64x8xf32>
    %c2_161 = arith.constant 2 : index
    %c2_162 = arith.constant 2 : index
    %c0_163 = arith.constant 0 : index
    %125 = vector.load %arg8[%c2_161, %c2_162, %c0_163] : memref<10x10x8xbf16, #tpu.memory_space<vmem>>, vector<8x8x8xbf16>
    %126 = vector.shape_cast %125 : vector<8x8x8xbf16> to vector<64x8xbf16>
    %c2_164 = arith.constant 2 : index
    %c2_165 = arith.constant 2 : index
    %c0_166 = arith.constant 0 : index
    %c0_167 = arith.constant 0 : index
    %127 = vector.load %arg4[%c2_164, %c2_165, %c0_166, %c0_167] : memref<3x3x8x8xbf16, #tpu.memory_space<vmem>>, vector<1x1x8x8xbf16>
    %128 = vector.shape_cast %127 : vector<1x1x8x8xbf16> to vector<8x8xbf16>
    %cst_168 = arith.constant dense<0.000000e+00> : vector<64x8xf32>
    %129 = tpu.matmul %126, %128, %cst_168 {dimension_numbers = #tpu.dot_dimension_numbers<[1], [0], [0], [1], [0, 0, 1, 1], [], []>} : vector<64x8xbf16>, vector<8x8xbf16>, vector<64x8xf32> -> vector<64x8xf32>
    %130 = arith.addf %124, %129 : vector<64x8xf32>
    %c0_169 = arith.constant 0 : index
    %c0_170 = arith.constant 0 : index
    %131 = vector.load %arg5[%c0_169, %c0_170] : memref<1x8xf32, #tpu.memory_space<vmem>>, vector<1x8xf32>
    %132 = vector.broadcast %131 : vector<1x8xf32> to vector<64x8xf32>
    %133 = arith.addf %130, %132 : vector<64x8xf32>
    %cst_171 = arith.constant 0.000000e+00 : f32
    %134 = vector.broadcast %cst_171 : f32 to vector<64x8xf32>
    %135 = arith.maximumf %133, %134 : vector<64x8xf32>
    %136 = vector.shape_cast %135 : vector<64x8xf32> to vector<8x8x8xf32>
    %c0_172 = arith.constant 0 : index
    %c0_173 = arith.constant 0 : index
    %c0_174 = arith.constant 0 : index
    %c0_175 = arith.constant 0 : index
    %137 = vector.load %arg6[%c0_172, %c0_173, %c0_174, %c0_175] : memref<1x8x8x8xf32, #tpu.memory_space<vmem>>, vector<1x8x8x8xf32>
    %138 = vector.shape_cast %137 : vector<1x8x8x8xf32> to vector<8x8x8xf32>
    %139 = vector.shape_cast %136 : vector<8x8x8xf32> to vector<1x8x8x8xf32>
    tpu.vector_store %arg6[%c0_172, %c0_173, %c0_174, %c0_175], %139 {strides = array<i32>} : memref<1x8x8x8xf32, #tpu.memory_space<vmem>>, vector<1x8x8x8xf32>,
    return
  }
  func.func @transform_0(%arg0: i32) -> (i32, i32, i32, i32, i32) {
    %c0_i32 = arith.constant 0 : i32
    %c0_i32_0 = arith.constant 0 : i32
    %c0_i32_1 = arith.constant 0 : i32
    %c0_i32_2 = arith.constant 0 : i32
    %c0_i32_3 = arith.constant 0 : i32
    return %arg0, %c0_i32, %c0_i32_0, %c0_i32_1, %c0_i32_2 : i32, i32, i32, i32, i32
  }
  func.func @transform_1(%arg0: i32) -> (i32, i32, i32, i32) {
    %c0_i32 = arith.constant 0 : i32
    %c0_i32_0 = arith.constant 0 : i32
    %c0_i32_1 = arith.constant 0 : i32
    %c0_i32_2 = arith.constant 0 : i32
    %c0_i32_3 = arith.constant 0 : i32
    return %c0_i32, %c0_i32_0, %c0_i32_1, %c0_i32_2 : i32, i32, i32, i32
  }
  func.func @transform_2(%arg0: i32) -> (i32, i32) {
    %c0_i32 = arith.constant 0 : i32
    %c0_i32_0 = arith.constant 0 : i32
    %c0_i32_1 = arith.constant 0 : i32
    return %c0_i32, %c0_i32_0 : i32, i32
  }
  func.func @transform_3(%arg0: i32) -> (i32, i32, i32, i32) {
    %c0_i32 = arith.constant 0 : i32
    %c0_i32_0 = arith.constant 0 : i32
    %c0_i32_1 = arith.constant 0 : i32
    %c0_i32_2 = arith.constant 0 : i32
    %c0_i32_3 = arith.constant 0 : i32
    return %c0_i32, %c0_i32_0, %c0_i32_1, %c0_i32_2 : i32, i32, i32, i32
  }
  func.func @transform_4(%arg0: i32) -> (i32, i32) {
    %c0_i32 = arith.constant 0 : i32
    %c0_i32_0 = arith.constant 0 : i32
    %c0_i32_1 = arith.constant 0 : i32
    return %c0_i32, %c0_i32_0 : i32, i32
  }
  func.func @transform_5(%arg0: i32) -> (i32, i32, i32, i32) {
    %c0_i32 = arith.constant 0 : i32
    %c0_i32_0 = arith.constant 0 : i32
    %c0_i32_1 = arith.constant 0 : i32
    %c0_i32_2 = arith.constant 0 : i32
    return %arg0, %c0_i32, %c0_i32_0, %c0_i32_1 : i32, i32, i32, i32
  }
}

</mosaic_0001>

<bundles_post_ra>
// kernel: tpu_custom_call.1
= control target key start
LH: loop header
LB: loop body
LE: loop exit
PB: predicated region body
PF: predicated region fallthrough
CT: control target
= control target key end

     0   :  { %10 = vsyncpa [#allocation5], 0  ;;  %s4789_s0 = inlined_call_operand.hbm [shape: bf16[2,8,2,8,8], index: 0, kind: input, shape index: {}]   ;;  %s4790_s1 = inlined_call_operand.hbm [shape: bf16[3,3,4,8], index: 1, kind: input, shape index: {}]   ;;  %s4791_s2 = inlined_call_operand.vmem [shape: f32[1,8], index: 2, kind: input, shape index: {}]   ;;  %s4792_s3 = inlined_call_operand.hbm [shape: bf16[3,3,8,8], index: 3, kind: input, shape index: {}]   ;;  %s4793_s4 = inlined_call_operand.vmem [shape: f32[1,8], index: 4, kind: input, shape index: {}]   ;;  %s4794_s5 = inlined_call_operand.hbm [shape: f32[2,8,8,8], index: 5, kind: output, shape index: {}]  }
   0x1   :  { %12 = vsyncpa [#allocation5 + $0x1], 0 }
   0x2   :  { %13 = vsyncpa [#allocation8], 0 }
   0x3   :  { %14 = vsyncpa [#allocation6], 0 }
   0x4   :  { %16 = vsyncpa [#allocation6 + $0x1], 0  ;;  %s3774_s18 = smov 0   ;;  %s3776_s19 = smov 0  }
   0x5   :  { %s3778_s20 = smov 0   ;;  %s3780_s21 = smov 0  }
   0x6 LB: > { %s3795_s22 = sadd.s32 4294967295, %s3732_s21   ;;  %s3210_s23 = sadd.s32 4294967294, %s3732_s21   ;;  %s3732_s21 = sphi %s3780_s21, %s4818_s21   ;;  %s3728_s20 = sphi %s3778_s20, %s4817_s20   ;;  %s3724_s19 = sphi %s3776_s19, %s4816_s19   ;;  %s3720_s18 = sphi %s3774_s18, %s4815_s18  }
   0x7   : > { %p42_p0 = scmp.ne.s32.totalorder %s3724_s19, %s3720_s18  ;;  %p43_p1 = scmp.eq.s32.totalorder %s3795_s22, 0 }
   0x8   : > { %p150_p2 = scmp.eq.s32.totalorder %s3795_s22, 1  ;;  %p156_p3 = scmp.eq.s32.totalorder %s3210_s23, 1 }
   0x9   : > { %p3804_p4 = por %p43_p1, %p42_p0  ;;  %p3211_p5 = scmp.ge.s32.totalorder %s3732_s21, 1 }
   0xa   : > { %p3809_p6 = por %p156_p3, %p42_p0  ;;  %p163_p7 = scmp.lt.s32.totalorder %s3732_s21, 3 }
   0xb   : > { %s174_s28 = sshll.u32 %s4790_s1, 4  ;;  %s3734_s30 = smov [#allocation7]   ;;  %s175_s28 = int_to_ptr.hbm [resolvable:$true] %s174_s28 }
   0xc   : > { %p3817_p8 = pnand %p3211_p5, %p163_p7  ;;  %s176_s6 = sshll.u32 %s3734_s30, 4  ;;  %s177_s6 = int_to_ptr.vmem [resolvable:$true] %s176_s6 }
   0xd   : > { %s191_s9 = sshll.u32 %s4792_s3, 4  ;;  %s3735_s10 = smov 32   ;;  %s192_s9 = int_to_ptr.hbm [resolvable:$true] %s191_s9 }
   0xe   : > { %p3492_p9 = pneg %p3817_p8  ;;  %s3736_s11 = smov 2  }
   0xf   : > { %s3737_s12 = smov [#allocation9]   ;;  %s4795_s14 = smov 64  }
  0x10   : > { %p3493_p10 = pnand %p3492_p9, %p43_p1  ;;  %s193_s13 = sshll.u32 %s3737_s12, 4  ;;  %s194_s13 = int_to_ptr.vmem [resolvable:$true] %s193_s13 }
  0x11   : > { %s3739_s15 = smov 4   ;;  %s3833_s16 = sadd.s32 1, %s3732_s21  }
  0x12   : > { %3495 = dma.hbm_to_vmem [thread:$0]  (!%p3493_p10), %s175_s28, 288, %s177_s6, [#allocation8], %s3735_s10, %s3735_s10, %s3736_s11  }
  0x13   : > { %3498 = dma.hbm_to_vmem [thread:$0]  (!%p3493_p10), %s192_s9, 576, %s194_s13, [#allocation8], %s4795_s14, %s4795_s14, %s3739_s15  }
  0x14   : > { %s26_s17 = ssub.s32 %s3732_s21, %s3833_s16  ;;  %s29_s23 = sadd.s32 1, %s3728_s20 }
  0x15   : > { %p27_p12 = scmp.eq.s32.totalorder %s26_s17, 0  ;;  %p36_p13 = scmp.ne.s32.totalorder %s3728_s20, %s3724_s19 }
  0x16   : > { %p37_p0 = scmp.eq.s32.totalorder %s3732_s21, 0  ;;  %p3509_p7 = scmp.lt.s32.totalorder %s3732_s21, 2 }
  0x17   : > { %s3842_s26 = scalar_select %p27_p12, %s3728_s20, %s29_s23  }
  0x18   : > { %p38_p3 = por %p37_p0, %p36_p13  ;;  %p3846_p5 = por %p150_p2, %p36_p13 }
  0x19   : > { %s210_s28 = sand.u32 1, %s3728_s20   ;;  %s3452_s6 = sshll.u32 %s3732_s21, 6 }
  0x1a   : > { %s3215_s30 = sshll.u32 %s210_s28, 6  ;;  %s219_s9 = scalar_lea.hbm %s4789_s0, %s3452_s6 }
  0x1b   : > { %s214_s10 = scalar_lea.vmem [#allocation4], %s3215_s30  ;;  %s220_s12 = sshll.u32 %s219_s9, 4  ;;  %s221_s12 = int_to_ptr.hbm [resolvable:$true] %s220_s12 }
  0x1c   : > { %s222_s11 = sshll.u32 %s214_s10, 4  ;;  %p3856_p9 = pnand %p3509_p7, %p38_p3  ;;  %s223_s11 = int_to_ptr.vmem [resolvable:$true] %s222_s11 }
  0x1d   : > { %s211_s17 = scalar_lea.sflag [#allocation5], %s210_s28  ;;  %s3632_s23 = sshra.s32 %s221_s12, 4  ;;  %s3633_s23 = int_to_ptr.hbm [resolvable:$true] %s3632_s23 }
  0x1e   : > { %s3634_s14 = scalar_lea.hbm %s3633_s23, 64  ;;  %p3636_p10 = pneg %p3856_p9 }
  0x1f   : > { %p3635_p2 = scmp.ne.s32.totalorder %s3633_s23, %s3634_s14  ;;  %s3639_s7 = scalar_lea.hbm %s4789_s0, 128 }
  0x20   : > { %p3640_p0 = scmp.lt.s32.totalorder %s3633_s23, %s4789_s0  ;;  %p3641_p3 = scmp.lt.s32.totalorder %s3639_s7, %s3634_s14 }
  0x21   : > { %p3637_p12 = pnand %p3636_p10, %p3635_p2 }
  0x22   : > { %p3642_p7 = por %p3641_p3, %p3640_p0 }
  0x23   : > { %p3638_p13 = pneg %p3637_p12 }
  0x25   : > { %p3643_p11 = pnand %p3642_p7, %p3638_p13 }
  0x27   : > { %3646 = shalt.err (!%p3643_p11)
}
  0x28   : > { %s4801_s28 = smov 64   ;;  %234 = sbr.rel (%p3817_p8) target bundleno = 807 (0x327), region = 40 }
  0x29   : > { %3502 = dma.hbm_to_vmem [thread:$0]  (!%p3856_p9), %s221_s12, 1024, %s223_s11, %s211_s17, %s4801_s28, %s4801_s28, %s3739_s15  }
  0x2a   : > { %s3876_s10 = sand.u32 (!%p3817_p8), 1, %s3724_s19  }
  0x2b   : > { %s3219_s14 = sshll.u32 (!%p3817_p8), %s3876_s10, 6  ;;  %s237_s23 = scalar_lea.sflag (!%p3817_p8), [#allocation5], %s3876_s10 }
  0x2c   : > { %s3882_s6 = scalar_lea.vmem (!%p3817_p8), [#allocation4], %s3219_s14 }
  0x2d   : > { %3707 = dma.done.wait (%p3804_p4), %s237_s23, 1024  }
  0x2e   : > { %3709 = vsyncadd (%p3804_p4), %s237_s23, 4294966272 }
  0x2f   : > { %3711 = dma.done.wait (%p43_p1), [#allocation8], 864  }
  0x30   : > { %3713 = vsyncadd (%p43_p1), [#allocation8], 4294966432  ;;  %vm384_vm0 = vcmask 27648   ;;  %vm386_vm1 = vcmask 24576   ;;  %v3740_v0 = vmov 0   ;;  %v284_v1 = vld [vmem:[%s3882_s6 + $0x28] sm:$0xff]  }
  0x31   : > { %398 = vst.msk [vmem:[#allocation2 + $0x30] sm:$0xf] %vm384_vm0, %v3740_v0  ;;  %v285_v2 = vld [vmem:[%s3882_s6 + $0x30] sm:$0xff]   ;;  %v282_v3 = vld [vmem:[%s3882_s6 + $0x18] sm:$0xff]   ;;  %v301_v4 = vunpack.c.l.bf16 %v284_v1  ;;  %v309_v6 = vunpack.c.h.bf16 %v284_v1  ;;  %v283_v8 = vld [vmem:[%s3882_s6 + $0x20] sm:$0xff]   ;;  %s3741_s24 = smov 124  }
  0x32   : > { %399 = vst.msk [vmem:[#allocation2 + $0x34] sm:$0x1] %vm386_vm1, %v3740_v0  ;;  %v302_v5 = vunpack.c.l.bf16 %v285_v2  ;;  %v310_v7 = vunpack.c.h.bf16 %v285_v2  ;;  %v280_v9 = vld [vmem:[%s3882_s6 + $0x8] sm:$0xff]   ;;  %v281_v10 = vld [vmem:[%s3882_s6 + $0x10] sm:$0xff]   ;;  %v299_v11 = vunpack.c.l.bf16 %v282_v3  ;;  %v300_v12 = vunpack.c.l.bf16 %v283_v8  ;;  %v279_v15 = vld [vmem:[%s3882_s6] sm:$0xff]   ;;  %s4711_s13 = scalar_lea.vmem [#allocation10], %s3219_s14 }
  0x33   : > { %400 = vst.msk [vmem:[#allocation2 + $0x38] sm:$0xf] %vm384_vm0, %v3740_v0  ;;  %v307_v13 = vunpack.c.h.bf16 %v282_v3  ;;  %v308_v14 = vunpack.c.h.bf16 %v283_v8  ;;  %v3917_v16 = vmax.f32 %v301_v4, %v309_v6  ;;  %v297_v18 = vunpack.c.l.bf16 %v280_v9  ;;  %v286_v24 = vld [vmem:[%s3882_s6 + $0x38] sm:$0xff]   ;;  %v549_v44 = vld [vmem:[#allocation7] sm:$0x3]  ;;  %s3477_s17 = sshll.u32 %s3795_s22, 6 }
  0x34   : > { %401 = vst.msk [vmem:[#allocation2 + $0x3c] sm:$0x1] %vm386_vm1, %v3740_v0  ;;  %v3919_v17 = vmax.f32 %v302_v5, %v310_v7  ;;  %v298_v19 = vunpack.c.l.bf16 %v281_v10  ;;  %v305_v22 = vunpack.c.h.bf16 %v280_v9  ;;  %v306_v23 = vunpack.c.h.bf16 %v281_v10  ;;  %v674_v1 = vld [vmem:[#allocation7 + $0x2] sm:$0x3]  ;;  %s3114_s8 = scalar_lea.hbm %s4794_s5, %s3477_s17  ;;  %s3115_s9 = sshll.u32 %s4711_s13, 4  ;;  %s3116_s9 = int_to_ptr.vmem [resolvable:$true] %s3115_s9 }
  0x35   : > { %385 = vst.msk [vmem:[#allocation2] sm:$0xf] %vm384_vm0, %v3740_v0  ;;  %v3923_v20 = vmax.f32 %v299_v11, %v307_v13  ;;  %v3925_v21 = vmax.f32 %v300_v12, %v308_v14  ;;  %v296_v25 = vunpack.c.l.bf16 %v279_v15  ;;  %v304_v26 = vunpack.c.h.bf16 %v279_v15  ;;  %s3117_s28 = sshll.u32 %s3114_s8, 4  ;;  %s3103_s22 = scalar_lea.sflag [#allocation6], %s3876_s10  ;;  %s3118_s28 = int_to_ptr.hbm [resolvable:$true] %s3117_s28 }
  0x36   : > { %387 = vst.msk [vmem:[#allocation2 + $0x4] sm:$0x1] %vm386_vm1, %v3740_v0  ;;  %v3932_v27 = vmax.f32 %v297_v18, %v305_v22  ;;  %v3934_v28 = vmax.f32 %v298_v19, %v306_v23  ;;  %v303_v30 = vunpack.c.l.bf16 %v286_v24  ;;  %v3560_v31 = vpack.i.bf16 %v3919_v17, %v3917_v16  ;;  %s3676_s14 = sshra.s32 %s3118_s28, 4  ;;  %s3682_s29 = scalar_lea.hbm %s4794_s5, 128  ;;  %s3677_s14 = int_to_ptr.hbm [resolvable:$true] %s3676_s14 }
  0x37   : > { %388 = vst.msk [vmem:[#allocation2 + $0x8] sm:$0xf] %vm384_vm0, %v3740_v0  ;;  %v312_v29 = vmax.f32 %v296_v25, %v304_v26  ;;  %v311_v32 = vunpack.c.h.bf16 %v286_v24  ;;  %v3555_v33 = vpack.i.bf16 %v3925_v21, %v3923_v20  ;;  %vm700_vm2 = vcmask 1041408   ;;  %v857_v25 = vld [vmem:[#allocation7 + $0x4] sm:$0x3]  ;;  %s3678_s23 = scalar_lea.hbm %s3677_s14, 64  ;;  %p3683_p11 = scmp.lt.s32.totalorder %s3677_s14, %s4794_s5 }
  0x38   : > { %389 = vst.msk [vmem:[#allocation2 + $0xc] sm:$0x1] %vm386_vm1, %v3740_v0  ;;  %3561 = vrot.lane.b32.xlu1 %v3560_v31, %s3741_s24  ;;  %v3565_v37 = vpack.i.bf16 %v3934_v28, %v3932_v27  ;;  %vm488_vm3 = vsmask.f32 7938  ;;  %v766_v45 = vsel %vm700_vm2, %v549_v44, 0  ;;  %v702_v4 = vsel %vm700_vm2, %v674_v1, 0  ;;  %p3679_p1 = scmp.ne.s32.totalorder %s3677_s14, %s3678_s23  ;;  %p3684_p9 = scmp.lt.s32.totalorder %s3682_s29, %s3678_s23 }
  0x39   : > { %390 = vst.msk [vmem:[#allocation2 + $0x10] sm:$0xf] %vm384_vm0, %v3740_v0  ;;  %v319_v34 = vmax.f32 %v303_v30, %v311_v32  ;;  %3556 = vrot.lane.b32.xlu0 %v3555_v33, %s3741_s24  ;;  %v320_v35 = vpack.c.bf16 %v312_v29, %v312_v29  ;;  %vm494_vm4 = vsmask.f32 256  ;;  %3479 = vmatpush.bf16.msra.mxu3 %v766_v45  ;;  %vm3964_vm5 = vmand %vm384_vm0, %vm488_vm3  ;;  %v523_v13 = vld [vmem:[#allocation2 + $0x30] sm:$0xf] }
  0x3a   : > { %391 = vst.msk [vmem:[#allocation2 + $0x14] sm:$0x1] %vm386_vm1, %v3740_v0  ;;  %775 = vmatpush.bf16.msra.mxu1 %v766_v45  ;;  %vm3970_vm6 = vmand %vm386_vm1, %vm494_vm4  ;;  %3478 = vmatpush.bf16.msra.mxu2 %v702_v4  ;;  %v529_v14 = vld [vmem:[#allocation2 + $0x38] sm:$0xf]  ;;  %v883_v33 = vsel %vm700_vm2, %v857_v25, 0  ;;  %vm687_vm7 = vcmask 31744   ;;  %p3680_p4 = pnand %p3679_p1, %p3846_p5  ;;  %p3685_p2 = por %p3684_p9, %p3683_p11 }
  0x3b   : > { %392 = vst.msk [vmem:[#allocation2 + $0x18] sm:$0xf] %vm384_vm0, %v3740_v0  ;;  %v327_v36 = vpack.c.bf16 %v319_v34, %v319_v34  ;;  %v3958_v39 = vunpack.c.l.bf16 %v320_v35  ;;  %711 = vmatpush.bf16.msra.mxu0 %v702_v4  ;;  %v532_v29 = vld [vmem:[#allocation2 + $0x3c] sm:$0x1]  ;;  %v526_v34 = vld [vmem:[#allocation2 + $0x34] sm:$0x1] }
  0x3c   : > { %393 = vst.msk [vmem:[#allocation2 + $0x1c] sm:$0x1] %vm386_vm1, %v3740_v0  ;;  %v541_v26 = vld [vmem:[#allocation2] sm:$0xf]  ;;  %vm558_vm8 = vsmask.f32 3328  ;;  %p3681_p8 = pneg %p3680_p4 }
  0x3d   : > { %394 = vst.msk [vmem:[#allocation2 + $0x20] sm:$0xf] %vm384_vm0, %v3740_v0  ;;  %v335_v38 = vunpack.c.l.bf16 %v327_v36  ;;  %v562_v44 = vshrl.u32 %v541_v26, 16  ;;  %v565_v45 = vshll.u32 %v541_v26, 16  ;;  %vm559_vm9 = vsmask.f32 7440 }
  0x3e   : > { %395 = vst.msk [vmem:[#allocation2 + $0x24] sm:$0x1] %vm386_vm1, %v3740_v0  ;;  %892 = vmatpush.bf16.msrb.mxu2 %v883_v33  ;;  %vm4033_vm10 = vmor %vm558_vm8, %vm559_vm9  ;;  %vm821_vm11 = vcmask 1042432   ;;  %vm822_vm12 = vcmask 1046532   ;;  %vm2058_vm14 = vcmask 1043456   ;;  %vm1739_vm15 = vcmask 60416   ;;  %p3686_p10 = pnand %p3685_p2, %p3681_p8 }
  0x3f   : > { %396 = vst.msk [vmem:[#allocation2 + $0x28] sm:$0xf] %vm384_vm0, %v3740_v0  ;;  %358 = vrot.lane.b32.xlu2 %v335_v38, %s3741_s24  ;;  %v567_v1 = vrot.slane %v565_v45, 5  ;;  %vm4085_vm13 = vmor %vm821_vm11, %vm822_vm12 }
  0x40   : > { %397 = vst.msk [vmem:[#allocation2 + $0x2c] sm:$0x1] %vm386_vm1, %v3740_v0  ;;  %3566 = vrot.lane.b32.xlu1 %v3565_v37, %s3741_s24 }
  0x41   : > { %402 = vst.msk [vmem:[#allocation2 + $0x40] sm:$0xf] %vm384_vm0, %v3740_v0  ;;  %344 = vrot.lane.b32.xlu0 %v3958_v39, %s3741_s24 }
  0x42   : > { %403 = vst.msk [vmem:[#allocation2 + $0x44] sm:$0x1] %vm386_vm1, %v3740_v0 }
  0x43   : > { %404 = vst.msk [vmem:[#allocation2 + $0x48] sm:$0xf] %vm384_vm0, %v3740_v0  ;;  %vm1741_vm0 = vcmask 57344  }
  0x44   : > { %405 = vst.msk [vmem:[#allocation2 + $0x4c] sm:$0x1] %vm386_vm1, %v3740_v0  ;;  %vm4371_vm1 = vmand %vm1739_vm15, %vm488_vm3  ;;  %vm2045_vm3 = vcmask 64512  }
  0x45   : > { %1743 = vst.msk [vmem:[#allocation3 + $0x8] sm:$0xf] %vm1739_vm15, %v3740_v0 }
  0x46   : > { %1744 = vst.msk [vmem:[#allocation3 + $0xc] sm:$0x1] %vm1741_vm0, %v3740_v0 }
  0x47   : > { %1740 = vst.msk [vmem:[#allocation3] sm:$0xf] %vm1739_vm15, %v3740_v0 }
  0x48   : > { %v535_v48 = vld [vmem:[#allocation2 + $0x40] sm:$0xf]  ;;  %1742 = vst.msk [vmem:[#allocation3 + $0x4] sm:$0x1] %vm1741_vm0, %v3740_v0 }
  0x49   : > { %v538_v49 = vld [vmem:[#allocation2 + $0x44] sm:$0x1]  ;;  %1745 = vst.msk [vmem:[#allocation3 + $0x10] sm:$0xf] %vm1739_vm15, %v3740_v0 }
  0x4a   : > { %1746 = vst.msk [vmem:[#allocation3 + $0x14] sm:$0x1] %vm1741_vm0, %v3740_v0 }
  0x4b   : > { %1747 = vst.msk [vmem:[#allocation3 + $0x18] sm:$0xf] %vm1739_vm15, %v3740_v0 }
  0x4c   : > { %1748 = vst.msk [vmem:[#allocation3 + $0x1c] sm:$0x1] %vm1741_vm0, %v3740_v0 }
  0x4d   : > { %1749 = vst.msk [vmem:[#allocation3 + $0x20] sm:$0xf] %vm1739_vm15, %v3740_v0 }
  0x4e   : > { %1750 = vst.msk [vmem:[#allocation3 + $0x24] sm:$0x1] %vm1741_vm0, %v3740_v0 }
  0x4f   : > { %1751 = vst.msk [vmem:[#allocation3 + $0x28] sm:$0xf] %vm1739_vm15, %v3740_v0 }
  0x50   : > { %1752 = vst.msk [vmem:[#allocation3 + $0x2c] sm:$0x1] %vm1741_vm0, %v3740_v0 }
  0x51   : > { %1753 = vst.msk [vmem:[#allocation3 + $0x30] sm:$0xf] %vm1739_vm15, %v3740_v0 }
  0x52   : > { %1754 = vst.msk [vmem:[#allocation3 + $0x34] sm:$0x1] %vm1741_vm0, %v3740_v0 }
  0x53   : > { %1755 = vst.msk [vmem:[#allocation3 + $0x38] sm:$0xf] %vm1739_vm15, %v3740_v0 }
  0x54   : > { %1756 = vst.msk [vmem:[#allocation3 + $0x3c] sm:$0x1] %vm1741_vm0, %v3740_v0 }
  0x55   : > { %1757 = vst.msk [vmem:[#allocation3 + $0x40] sm:$0xf] %vm1739_vm15, %v3740_v0 }
  0x56   : > { %1758 = vst.msk [vmem:[#allocation3 + $0x44] sm:$0x1] %vm1741_vm0, %v3740_v0 }
  0x57   : > { %1759 = vst.msk [vmem:[#allocation3 + $0x48] sm:$0xf] %vm1739_vm15, %v3740_v0 }
  0x58   : > { %1760 = vst.msk [vmem:[#allocation3 + $0x4c] sm:$0x1] %vm1741_vm0, %v3740_v0 }
  0x99   : > { %v359_v40 = vpop.permute.xlu2 %358 }
  0x9a   : > { %v375_v41 = vmax.f32 %v335_v38, %v359_v40  ;;  %v517_v40 = vld [vmem:[#allocation2 + $0x28] sm:$0xf] }
  0x9c   : > { %v383_v42 = vpack.c.bf16 %v375_v41, %v375_v41 }
  0x9e   : > { %v463_v43 = vshrl.u32 %v383_v42, 16  ;;  %v466_v47 = vshll.u32 %v383_v42, 16 }
  0xa0   : > { %v465_v46 = vrot.slane %v463_v43, 7  ;;  %v931_v43 = vld [vmem:[#allocation7 + $0x6] sm:$0x3] }
  0xa2   : > { %v468_v51 = vor.u32 %v466_v47, %v465_v46  ;;  %v469_v52 = vrot.slane %v465_v46, 4 }
  0xa4   : > { %v536_v58 = vsel %vm3964_vm5, %v468_v51, %v535_v48  ;;  %v539_v59 = vsel %vm3970_vm6, %v469_v52, %v538_v49  ;;  %v511_v48 = vld [vmem:[#allocation2 + $0x20] sm:$0xf]  ;;  %v520_v49 = vld [vmem:[#allocation2 + $0x2c] sm:$0x1] }
  0xa5   : > { %537 = vst [vmem:[#allocation2 + $0x40] sm:$0xf] %v536_v58 }
  0xa6   : > { %540 = vst [vmem:[#allocation2 + $0x44] sm:$0x1] %v539_v59 }
  0xaa   : > { %v3562_v54 = vpop.permute.xlu1 %3561 }
  0xab   : > { %v3564_v55 = vunpack.i.h.bf16 %v3562_v54  ;;  %v3563_v56 = vunpack.i.l.bf16 %v3562_v54  ;;  %v3557_v57 = vpop.permute.xlu0 %3556  ;;  %v514_v54 = vld [vmem:[#allocation2 + $0x24] sm:$0x1] }
  0xac   : > { %v3559_v60 = vunpack.i.h.bf16 %v3557_v57  ;;  %v3558_v61 = vunpack.i.l.bf16 %v3557_v57 }
  0xad   : > { %v374_v62 = vmax.f32 %v3919_v17, %v3564_v55  ;;  %v373_v63 = vmax.f32 %v3917_v16, %v3563_v56 }
  0xae   : > { %v372_v2 = vmax.f32 %v3925_v21, %v3559_v60  ;;  %v371_v3 = vmax.f32 %v3923_v20, %v3558_v61  ;;  %v965_v60 = vsel %vm700_vm2, %v931_v43, 0  ;;  %v1133_v61 = vld [vmem:[#allocation7 + $0x8] sm:$0x3] }
  0xaf   : > { %v382_v5 = vpack.c.bf16 %v374_v62, %v374_v62  ;;  %v381_v6 = vpack.c.bf16 %v373_v63, %v373_v63  ;;  %974 = vmatpush.bf16.msrb.mxu3 %v965_v60  ;;  %v564_v63 = vrot.slane %v562_v44, 4 }
  0xb0   : > { %v380_v7 = vpack.c.bf16 %v372_v2, %v372_v2  ;;  %v379_v8 = vpack.c.bf16 %v371_v3, %v371_v3  ;;  %v1159_v2 = vsel %vm700_vm2, %v1133_v61, 0 }
  0xb1   : > { %v455_v9 = vshrl.u32 %v382_v5, 16  ;;  %v458_v10 = vshll.u32 %v382_v5, 16  ;;  %v447_v11 = vshrl.u32 %v381_v6, 16  ;;  %v450_v12 = vshll.u32 %v381_v6, 16  ;;  %1168 = vmatpush.bf16.msrb.mxu0 %v1159_v2 }
  0xb2   : > { %v439_v15 = vshrl.u32 %v380_v7, 16  ;;  %v442_v16 = vshll.u32 %v380_v7, 16  ;;  %v431_v17 = vshrl.u32 %v379_v8, 16  ;;  %v434_v18 = vshll.u32 %v379_v8, 16  ;;  %v3567_v19 = vpop.permute.xlu1 %3566  ;;  %v4005_v7 = vld [vmem:[#allocation2 + $0x4] sm:$0x1] }
  0xb3   : > { %v457_v20 = vrot.slane %v455_v9, 7  ;;  %v449_v21 = vrot.slane %v447_v11, 7  ;;  %v3569_v22 = vunpack.i.h.bf16 %v3567_v19  ;;  %v3568_v23 = vunpack.i.l.bf16 %v3567_v19  ;;  %v345_v24 = vpop.permute.xlu0 %344  ;;  %v490_v19 = vld [vmem:[#allocation2 + $0x8] sm:$0xf] }
  0xb4   : > { %v441_v30 = vrot.slane %v439_v15, 7  ;;  %v433_v31 = vrot.slane %v431_v17, 7  ;;  %v368_v32 = vmax.f32 %v3958_v39, %v345_v24  ;;  %v568_v15 = vor.u32 %v567_v1, %v564_v63 }
  0xb5   : > { %v460_v35 = vor.u32 %v458_v10, %v457_v20  ;;  %v461_v36 = vrot.slane %v457_v20, 4  ;;  %v452_v37 = vor.u32 %v450_v12, %v449_v21  ;;  %v453_v38 = vrot.slane %v449_v21, 4  ;;  %v499_v12 = vld [vmem:[#allocation2 + $0x10] sm:$0xf]  ;;  %v508_v20 = vld [vmem:[#allocation2 + $0x1c] sm:$0x1] }
  0xb6   : > { %v444_v41 = vor.u32 %v442_v16, %v441_v30  ;;  %v445_v42 = vrot.slane %v441_v30, 4  ;;  %v436_v51 = vor.u32 %v434_v18, %v433_v31  ;;  %v437_v56 = vrot.slane %v433_v31, 4  ;;  %v496_v30 = vld [vmem:[#allocation2 + $0xc] sm:$0x1] }
  0xb7   : > { %v530_v46 = vsel %vm3964_vm5, %v460_v35, %v529_v14  ;;  %v533_v39 = vsel %vm3970_vm6, %v461_v36, %v532_v29  ;;  %v524_v47 = vsel %vm3964_vm5, %v452_v37, %v523_v13  ;;  %v527_v52 = vsel %vm3970_vm6, %v453_v38, %v526_v34  ;;  %v505_v13 = vld [vmem:[#allocation2 + $0x18] sm:$0xf] }
  0xb8   : > { %531 = vst [vmem:[#allocation2 + $0x38] sm:$0xf] %v530_v46  ;;  %v518_v55 = vsel %vm3964_vm5, %v444_v41, %v517_v40  ;;  %v370_v57 = vmax.f32 %v3934_v28, %v3569_v22  ;;  %v369_v58 = vmax.f32 %v3932_v27, %v3568_v23  ;;  %v376_v59 = vpack.c.bf16 %v368_v32, %v368_v32  ;;  %v502_v23 = vld [vmem:[#allocation2 + $0x14] sm:$0x1] }
  0xb9   : > { %534 = vst [vmem:[#allocation2 + $0x3c] sm:$0x1] %v533_v39  ;;  %v521_v62 = vsel %vm3970_vm6, %v445_v42, %v520_v49  ;;  %v512_v3 = vsel %vm3964_vm5, %v436_v51, %v511_v48  ;;  %v515_v5 = vsel %vm3970_vm6, %v437_v56, %v514_v54  ;;  %v571_v16 = vshll.u32 %v4005_v7, 16 }
  0xba   : > { %525 = vst [vmem:[#allocation2 + $0x30] sm:$0xf] %v524_v47  ;;  %v378_v28 = vpack.c.bf16 %v370_v57, %v370_v57  ;;  %v377_v4 = vpack.c.bf16 %v369_v58, %v369_v58  ;;  %v407_v27 = vshrl.u32 %v376_v59, 16  ;;  %v410_v6 = vshll.u32 %v376_v59, 16  ;;  %v3237_v47 = vld [vmem:[#allocation2] sm:$0xf] }
  0xbb   : > { %528 = vst [vmem:[#allocation2 + $0x34] sm:$0x1] %v527_v52  ;;  %v4010_v32 = vrot.slane %v568_v15, 4  ;;  %v4012_v33 = vrot.slane %v571_v16, 5 }
  0xbc   : > { %519 = vst [vmem:[#allocation2 + $0x28] sm:$0xf] %v518_v55  ;;  %v423_v8 = vshrl.u32 %v378_v28, 16  ;;  %v426_v9 = vshll.u32 %v378_v28, 16  ;;  %v415_v10 = vshrl.u32 %v377_v4, 16  ;;  %v418_v11 = vshll.u32 %v377_v4, 16 }
  0xbd   : > { %522 = vst [vmem:[#allocation2 + $0x2c] sm:$0x1] %v521_v62  ;;  %v409_v14 = vrot.slane %v407_v27, 7 }
  0xbe   : > { %513 = vst [vmem:[#allocation2 + $0x20] sm:$0xf] %v512_v3  ;;  %v425_v17 = vrot.slane %v423_v8, 7  ;;  %v417_v18 = vrot.slane %v415_v10, 7 }
  0xbf   : > { %516 = vst [vmem:[#allocation2 + $0x24] sm:$0x1] %v515_v5  ;;  %v412_v21 = vor.u32 %v410_v6, %v409_v14  ;;  %v413_v22 = vrot.slane %v409_v14, 4  ;;  %v548_v62 = vld [vmem:[#allocation2 + $0x38] sm:$0xf] }
  0xc0   : > { %v428_v24 = vor.u32 %v426_v9, %v425_v17  ;;  %v429_v25 = vrot.slane %v425_v17, 4  ;;  %v420_v26 = vor.u32 %v418_v11, %v417_v18  ;;  %v421_v29 = vrot.slane %v417_v18, 4 }
  0xc1   : > { %v491_v31 = vsel %vm3964_vm5, %v412_v21, %v490_v19  ;;  %v547_v40 = vld [vmem:[#allocation2 + $0x30] sm:$0xf]  ;;  %v497_v45 = vsel %vm3970_vm6, %v413_v22, %v496_v30  ;;  %v574_v11 = vsel %vm4033_vm10, %v4010_v32, %v4012_v33  ;;  %v663_v17 = vshll.u32 %v548_v62, 16 }
  0xc2   : > { %v506_v34 = vsel %vm3964_vm5, %v428_v24, %v505_v13  ;;  %v509_v35 = vsel %vm3970_vm6, %v429_v25, %v508_v20  ;;  %v500_v36 = vsel %vm3964_vm5, %v420_v26, %v499_v12  ;;  %492 = vst [vmem:[#allocation2 + $0x8] sm:$0xf] %v491_v31  ;;  %v503_v41 = vsel %vm3970_vm6, %v421_v29, %v502_v23  ;;  %v4044_v16 = vld [vmem:[#allocation2 + $0x34] sm:$0x1]  ;;  %v4048_v20 = vld [vmem:[#allocation2 + $0x3c] sm:$0x1] }
  0xc3   : > { %v3455_v37 = vld [vmem:[#allocation2 + $0x24] sm:$0xf0]  ;;  %507 = vst [vmem:[#allocation2 + $0x18] sm:$0xf] %v506_v34  ;;  %v646_v58 = vshrl.u32 %v547_v40, 16  ;;  %v649_v59 = vshll.u32 %v547_v40, 16 }
  0xc4   : > { %v546_v38 = vld [vmem:[#allocation2 + $0x28] sm:$0xf]  ;;  %v4022_v42 = vld [vmem:[#allocation2 + $0x2c] sm:$0x1]  ;;  %510 = vst [vmem:[#allocation2 + $0x1c] sm:$0x1] %v509_v35 }
  0xc5   : > { %v632_v43 = vshrl.u32 %v546_v38, 16  ;;  %v635_v44 = vshll.u32 %v546_v38, 16  ;;  %v3245_v46 = vld [vmem:[#allocation2 + $0x20] sm:$0xf]  ;;  %501 = vst [vmem:[#allocation2 + $0x10] sm:$0xf] %v500_v36 }
  0xc6   : > { %v545_v39 = vld [vmem:[#allocation2 + $0x20] sm:$0xf]  ;;  %v3246_v50 = vor.u32 %v3455_v37, %v3245_v46  ;;  %v4026_v48 = vld [vmem:[#allocation2 + $0x24] sm:$0x1]  ;;  %504 = vst [vmem:[#allocation2 + $0x14] sm:$0x1] %v503_v41  ;;  %v675_v41 = vunpack.c.l.b16 %v574_v11 }
  0xc7   : > { %v618_v49 = vshrl.u32 %v545_v39, 16  ;;  %v621_v51 = vshll.u32 %v545_v39, 16  ;;  %v627_v52 = vshll.u32 %v4026_v48, 16  ;;  %v634_v54 = vrot.slane %v632_v43, 4  ;;  %498 = vst [vmem:[#allocation2 + $0xc] sm:$0x1] %v497_v45 }
  0xc8   : > { %v637_v55 = vrot.slane %v635_v44, 5  ;;  %v641_v56 = vshll.u32 %v4022_v42, 16  ;;  %3253 = vmatmul.msk.bf16.vlgmr.msra.gmra.mxu3 %vm687_vm7, %v3246_v50  ;;  %v648_v28 = vrot.slane %v646_v58, 4  ;;  %v651_v4 = vrot.slane %v649_v59, 5  ;;  %v3456_v35 = vld [vmem:[#allocation2 + $0x34] sm:$0xf0] }
  0xc9   : > { %v620_v53 = vrot.slane %v618_v49, 4  ;;  %v623_v57 = vrot.slane %v621_v51, 5  ;;  %v3453_v63 = vld [vmem:[#allocation2 + $0x4] sm:$0xf0]  ;;  %v629_v10 = vrot.slane %v627_v52, 5  ;;  %v660_v12 = vshrl.u32 %v548_v62, 16 }
  0xca   : > { %v638_v60 = vor.u32 %v637_v55, %v634_v54  ;;  %v643_v61 = vrot.slane %v641_v56, 5  ;;  %v542_v3 = vld [vmem:[#allocation2 + $0x8] sm:$0xf]  ;;  %v3238_v27 = vor.u32 %v3453_v63, %v3237_v47  ;;  %v652_v21 = vor.u32 %v651_v4, %v648_v28  ;;  %v544_v33 = vld [vmem:[#allocation2 + $0x18] sm:$0xf] }
  0xcb   : > { %v624_v2 = vor.u32 %v623_v57, %v620_v53  ;;  %v576_v6 = vshrl.u32 %v542_v3, 16  ;;  %v579_v8 = vshll.u32 %v542_v3, 16  ;;  %v655_v22 = vshll.u32 %v4044_v16, 16  ;;  %v3249_v38 = vld [vmem:[#allocation2 + $0x30] sm:$0xf] }
  0xcc   : > { %v639_v5 = vrot.slane %v638_v60, 4  ;;  %3251 = vmatmul.msk.bf16.vlgmr.msra.gmra.mxu1 %vm687_vm7, %v3238_v27  ;;  %v662_v26 = vrot.slane %v660_v12, 4  ;;  %v665_v29 = vrot.slane %v663_v17, 5  ;;  %v543_v30 = vld [vmem:[#allocation2 + $0x10] sm:$0xf]  ;;  %v669_v32 = vshll.u32 %v4048_v20, 16 }
  0xcd   : > { %v625_v9 = vrot.slane %v624_v2, 4  ;;  %v578_v14 = vrot.slane %v576_v6, 4  ;;  %v581_v15 = vrot.slane %v579_v8, 5  ;;  %v590_v43 = vshrl.u32 %v543_v30, 16  ;;  %v1255_v44 = vld [vmem:[#allocation7 + $0xa] sm:$0x3] }
  0xce   : > { %v644_v13 = vsel %vm4033_vm10, %v639_v5, %v643_v61  ;;  %v4051_v24 = vld [vmem:[#allocation2 + $0xc] sm:$0x1]  ;;  %v666_v37 = vor.u32 %v665_v29, %v662_v26  ;;  %v3241_v45 = vld [vmem:[#allocation2 + $0x10] sm:$0xf]  ;;  %v3454_v46 = vld [vmem:[#allocation2 + $0x14] sm:$0xf0]  ;;  %v3250_v61 = vor.u32 %v3456_v35, %v3249_v38 }
  0xcf   : > { %v630_v18 = vsel %vm4033_vm10, %v625_v9, %v629_v10  ;;  %v680_v19 = vunpack.c.l.b16 %v644_v13  ;;  %v582_v25 = vor.u32 %v581_v15, %v578_v14  ;;  %v585_v31 = vshll.u32 %v4051_v24, 16  ;;  %v4058_v54 = vld [vmem:[#allocation2 + $0x14] sm:$0x1]  ;;  %v4060_v58 = vld [vmem:[#allocation2 + $0x1c] sm:$0x1] }
  0xd0   : > { %v679_v23 = vunpack.c.l.b16 %v630_v18  ;;  %v653_v39 = vrot.slane %v652_v21, 4  ;;  %v657_v50 = vrot.slane %v655_v22, 5  ;;  %v593_v47 = vshll.u32 %v543_v30, 16  ;;  %v1330_v3 = vld [vmem:[#allocation7 + $0xc] sm:$0x3] }
  0xd1   : > { %v583_v36 = vrot.slane %v582_v25, 4  ;;  %v587_v40 = vrot.slane %v585_v31, 5  ;;  %v604_v49 = vshrl.u32 %v544_v33, 16  ;;  %v671_v52 = vrot.slane %v669_v32, 5  ;;  %v1532_v5 = vld [vmem:[#allocation7 + $0xe] sm:$0x3] }
  0xd2   : > { %v685_v34 = vpack.c.b16 %v680_v19, %v679_v23  ;;  %v592_v55 = vrot.slane %v590_v43, 4  ;;  %v607_v56 = vshll.u32 %v544_v33, 16  ;;  %v667_v57 = vrot.slane %v666_v37, 4  ;;  %v4073_v18 = vld [vmem:[#allocation2 + $0xc] sm:$0x1] }
  0xd3   : > { %v588_v51 = vsel %vm4033_vm10, %v583_v36, %v587_v40  ;;  %v595_v59 = vrot.slane %v593_v47, 5  ;;  %v599_v60 = vshll.u32 %v4058_v54, 16  ;;  %v606_v62 = vrot.slane %v604_v49, 4  ;;  %v1198_v19 = vld [vmem:[#allocation2 + $0x8] sm:$0xe] }
  0xd4   : > { %3233 = vmatmul.msk.bf16.vlgmr.msra.gmra.mxu2 %vm687_vm7, %v685_v34  ;;  %v676_v53 = vunpack.c.l.b16 %v588_v51  ;;  %v609_v63 = vrot.slane %v607_v56, 5  ;;  %v613_v2 = vshll.u32 %v4060_v58, 16  ;;  %v1281_v27 = vsel %vm700_vm2, %v1255_v44, 0  ;;  %v1006_v21 = vld [vmem:[#allocation2 + $0x10] sm:$0xf] }
  0xd5   : > { %v596_v4 = vor.u32 %v595_v59, %v592_v55  ;;  %v3242_v6 = vor.u32 %v3454_v46, %v3241_v45  ;;  %1290 = vmatpush.bf16.msrb.mxu1 %v1281_v27  ;;  %v658_v9 = vsel %vm4033_vm10, %v653_v39, %v657_v50  ;;  %v672_v10 = vsel %vm4033_vm10, %v667_v57, %v671_v52  ;;  %v1007_v25 = vld [vmem:[#allocation2 + $0x14] sm:$0x1]  ;;  %v1199_v26 = vld [vmem:[#allocation2 + $0x10] sm:$0xe]  ;;  %v1004_v33 = vld [vmem:[#allocation2 + $0x8] sm:$0xf] }
  0xd6   : > { %v683_v28 = vpack.c.b16 %v676_v53, %v675_v41  ;;  %v610_v8 = vor.u32 %v609_v63, %v606_v62  ;;  %v601_v11 = vrot.slane %v599_v60, 5  ;;  %v1364_v12 = vsel %vm700_vm2, %v1330_v3, 0  ;;  %v1654_v29 = vld [vmem:[#allocation7 + $0x10] sm:$0x3]  ;;  %v3269_v45 = vld [vmem:[#allocation2 + $0x8] sm:$0xf] }
  0xd7   : > { %v597_v13 = vrot.slane %v596_v4, 4  ;;  %v615_v15 = vrot.slane %v613_v2, 5  ;;  %1373 = vmatpush.bf16.msra.mxu2 %v1364_v12  ;;  %v1558_v17 = vsel %vm700_vm2, %v1532_v5, 0  ;;  %v681_v22 = vunpack.c.l.b16 %v658_v9  ;;  %v797_v46 = vld [vmem:[#allocation2] sm:$0xe] }
  0xd8   : > { %3254 = vmatmul.msk.bf16.gmra.mxu3 %vm687_vm7, %v3250_v61  ;;  %3231 = vmatmul.msk.bf16.vlgmr.msra.gmra.mxu0 %vm687_vm7, %v683_v28  ;;  %v611_v14 = vrot.slane %v610_v8, 4  ;;  %v682_v23 = vunpack.c.l.b16 %v672_v10  ;;  %v3291_v32 = vrot.slane %v1198_v19, 9  ;;  %v1035_v34 = vshrl.u32 %v1006_v21, 16  ;;  %v3457_v47 = vld [vmem:[#allocation2 + $0xc] sm:$0xf0] }
  0xd9   : > { %1567 = vmatpush.bf16.msra.mxu3 %v1558_v17  ;;  %v602_v30 = vsel %vm4033_vm10, %v597_v13, %v601_v11  ;;  %v1038_v35 = vshll.u32 %v1006_v21, 16  ;;  %v1224_v36 = vrot.slane %v4073_v18, 5  ;;  %v3292_v37 = vrot.slane %v1199_v26, 9  ;;  %v798_v51 = vld [vmem:[#allocation2 + $0x8] sm:$0xe] }
  0xda   : > { %v616_v31 = vsel %vm4033_vm10, %v611_v14, %v615_v15  ;;  %v1228_v38 = vrot.slane %v1007_v25, 5  ;;  %v1680_v40 = vsel %vm700_vm2, %v1654_v29, 0  ;;  %v686_v41 = vpack.c.b16 %v682_v23, %v681_v22  ;;  %v802_v10 = vld [vmem:[#allocation2 + $0x28] sm:$0xe]  ;;  %v1200_v14 = vld [vmem:[#allocation2 + $0x18] sm:$0xe]  ;;  %vm4379_vm2 = vmand %vm1741_vm0, %vm494_vm4 }
  0xdb   : > { %v677_v43 = vunpack.c.l.b16 %v602_v30  ;;  %v678_v44 = vunpack.c.l.b16 %v616_v31  ;;  %1689 = vmatpush.bf16.msra.mxu0 %v1680_v40  ;;  %v1021_v39 = vshrl.u32 %v1004_v33, 16  ;;  %v1024_v50 = vshll.u32 %v1004_v33, 16  ;;  %v4102_v17 = vld [vmem:[#allocation2 + $0x1c] sm:$0x1]  ;;  %v4104_v19 = vld [vmem:[#allocation2 + $0x24] sm:$0x1] }
  0xdc   : > { %3252 = vmatmul.msk.bf16.gmra.mxu1 %vm687_vm7, %v3242_v6  ;;  %v1037_v52 = vrot.slane %v1035_v34, 4  ;;  %v1040_v55 = vrot.slane %v1038_v35, 5  ;;  %v1225_v56 = vsel %vm4085_vm13, %v3291_v32, %v1224_v36  ;;  %v1229_v53 = vsel %vm4085_vm13, %v3292_v37, %v1228_v38  ;;  %v1008_v23 = vld [vmem:[#allocation2 + $0x18] sm:$0xf]  ;;  %v1201_v31 = vld [vmem:[#allocation2 + $0x20] sm:$0xe] }
  0xdd   : > { %v826_v57 = vrot.slane %v4005_v7, 5  ;;  %v830_v59 = vrot.slane %v4051_v24, 5  ;;  %v684_v60 = vpack.c.b16 %v678_v44, %v677_v43  ;;  %v3255_v61 = vrot.slane %v797_v46, 9  ;;  %v801_v7 = vld [vmem:[#allocation2 + $0x20] sm:$0xe] }
  0xde   : > { %v3270_v62 = vor.u32 %v3457_v47, %v3269_v45  ;;  %v3256_v63 = vrot.slane %v798_v51, 9  ;;  %v1023_v2 = vrot.slane %v1021_v39, 4  ;;  %v1026_v3 = vrot.slane %v1024_v50, 5  ;;  %v1010_v35 = vld [vmem:[#allocation2 + $0x20] sm:$0xf] }
  0xdf   : > { %v1256_v28 = vunpack.c.l.b16 %v1225_v56  ;;  %v1257_v4 = vunpack.c.l.b16 %v1229_v53  ;;  %v1041_v27 = vor.u32 %v1040_v55, %v1037_v52  ;;  %v1044_v5 = vshll.u32 %v1007_v25, 16  ;;  %v799_v38 = vld [vmem:[#allocation2 + $0x10] sm:$0xe]  ;;  %v3458_v39 = vld [vmem:[#allocation2 + $0x1c] sm:$0xf0] }
  0xe0   : > { %v827_v6 = vsel %vm4085_vm13, %v3255_v61, %v826_v57  ;;  %v831_v24 = vsel %vm4085_vm13, %v3256_v63, %v830_v59  ;;  %v1027_v8 = vor.u32 %v1026_v3, %v1023_v2  ;;  %v1030_v9 = vshll.u32 %v4073_v18, 16  ;;  %v800_v47 = vld [vmem:[#allocation2 + $0x18] sm:$0xe]  ;;  %v803_v59 = vld [vmem:[#allocation2 + $0x30] sm:$0xe] }
  0xe1   : > { %v1264_v11 = vpack.c.b16 %v1257_v4, %v1256_v28  ;;  %v1042_v12 = vrot.slane %v1041_v27, 4  ;;  %v1046_v13 = vrot.slane %v1044_v5, 5  ;;  %v858_v15 = vunpack.c.l.b16 %v827_v6  ;;  %v804_v2 = vld [vmem:[#allocation2 + $0x38] sm:$0xe] }
  0xe2   : > { %v3259_v21 = vrot.slane %v801_v7, 9  ;;  %v859_v22 = vunpack.c.l.b16 %v831_v24  ;;  %v842_v25 = vrot.slane %v4026_v48, 5  ;;  %v3260_v26 = vrot.slane %v802_v10, 9  ;;  %v3273_v48 = vld [vmem:[#allocation2 + $0x18] sm:$0xf] }
  0xe3   : > { %v846_v18 = vrot.slane %v4022_v42, 5  ;;  %v1028_v29 = vrot.slane %v1027_v8, 4  ;;  %v1032_v30 = vrot.slane %v1030_v9, 5  ;;  %v3293_v32 = vrot.slane %v1200_v14, 9 }
  0xe4   : > { %3234 = vmatmul.msk.bf16.gmra.mxu2 %vm687_vm7, %v686_v41  ;;  %v1047_v33 = vsel %vm4033_vm10, %v1042_v12, %v1046_v13  ;;  %v1232_v34 = vrot.slane %v4102_v17, 5  ;;  %v843_v36 = vsel %vm4085_vm13, %v3259_v21, %v842_v25  ;;  %v1049_v40 = vshrl.u32 %v1008_v23, 16  ;;  %v1202_v25 = vld [vmem:[#allocation2 + $0x28] sm:$0xe] }
  0xe5   : > { %v847_v37 = vsel %vm4085_vm13, %v3260_v26, %v846_v18  ;;  %v1052_v42 = vshll.u32 %v1008_v23, 16  ;;  %v862_v41 = vunpack.c.l.b16 %v843_v36  ;;  %v866_v44 = vpack.c.b16 %v859_v22, %v858_v15  ;;  %v1012_v26 = vld [vmem:[#allocation2 + $0x28] sm:$0xf]  ;;  %v1203_v36 = vld [vmem:[#allocation2 + $0x30] sm:$0xe] }
  0xe6   : > { %v863_v43 = vunpack.c.l.b16 %v847_v37  ;;  %v3294_v45 = vrot.slane %v1201_v31, 9  ;;  %v1236_v46 = vrot.slane %v4104_v19, 5  ;;  %v1033_v50 = vsel %vm4033_vm10, %v1028_v29, %v1032_v30  ;;  %v1014_v31 = vld [vmem:[#allocation2 + $0x30] sm:$0xf] }
  0xe7   : > { %v1063_v51 = vshrl.u32 %v1010_v35, 16  ;;  %v1066_v52 = vshll.u32 %v1010_v35, 16  ;;  %v3274_v56 = vor.u32 %v3458_v39, %v3273_v48  ;;  %v1135_v53 = vunpack.c.l.b16 %v1047_v33  ;;  %v1015_v35 = vld [vmem:[#allocation2 + $0x34] sm:$0x1] }
  0xe8   : > { %3283 = vmatmul.msk.bf16.vlgmr.msrb.gmra.mxu3 %vm687_vm7, %v3270_v62  ;;  %3232 = vmatmul.msk.bf16.gmra.mxu0 %vm687_vm7, %v684_v60  ;;  %v4119_v55 = vpack.c.b16 %v863_v43, %v862_v41  ;;  %v3257_v57 = vrot.slane %v799_v38, 9  ;;  %v1233_v60 = vsel %vm4085_vm13, %v3293_v32, %v1232_v34  ;;  %v834_v61 = vrot.slane %v4058_v54, 5 }
  0xe9   : > { %v1051_v62 = vrot.slane %v1049_v40, 4  ;;  %v1054_v63 = vrot.slane %v1052_v42, 5  ;;  %v1134_v3 = vunpack.c.l.b16 %v1033_v50  ;;  %v1237_v28 = vsel %vm4085_vm13, %v3294_v45, %v1236_v46 }
  0xea   : > { %v3258_v4 = vrot.slane %v800_v47, 9  ;;  %v838_v27 = vrot.slane %v4060_v58, 5  ;;  %v1065_v5 = vrot.slane %v1063_v51, 4  ;;  %v1068_v6 = vrot.slane %v1066_v52, 5  ;;  %v3277_v52 = vld [vmem:[#allocation2 + $0x28] sm:$0xf] }
  0xeb   : > { %v3261_v7 = vrot.slane %v803_v59, 9  ;;  %v850_v24 = vrot.slane %v4044_v16, 5  ;;  %v1142_v8 = vpack.c.b16 %v1135_v53, %v1134_v3  ;;  %v1258_v9 = vunpack.c.l.b16 %v1233_v60 }
  0xec   : > { %3299 = vmatmul.msk.bf16.vlgmr.msrb.gmra.mxu1 %vm687_vm7, %v1264_v11  ;;  %v3262_v10 = vrot.slane %v804_v2, 9  ;;  %v854_v54 = vrot.slane %v4048_v20, 5  ;;  %v1055_v11 = vor.u32 %v1054_v63, %v1051_v62  ;;  %v1058_v12 = vshll.u32 %v4102_v17, 16  ;;  %v1013_v17 = vld [vmem:[#allocation2 + $0x2c] sm:$0x1] }
  0xed   : > { %v851_v13 = vsel %vm4085_vm13, %v3261_v7, %v850_v24  ;;  %v1259_v58 = vunpack.c.l.b16 %v1237_v28  ;;  %v835_v15 = vsel %vm4085_vm13, %v3257_v57, %v834_v61  ;;  %v839_v20 = vsel %vm4085_vm13, %v3258_v4, %v838_v27  ;;  %v4156_v7 = vld [vmem:[#allocation2 + $0x3c] sm:$0x1] }
  0xee   : > { %v855_v14 = vsel %vm4085_vm13, %v3262_v10, %v854_v54  ;;  %v864_v16 = vunpack.c.l.b16 %v851_v13  ;;  %v1069_v21 = vor.u32 %v1068_v6, %v1065_v5  ;;  %v1056_v18 = vrot.slane %v1055_v11, 4  ;;  %v1403_v13 = vld [vmem:[#allocation2 + $0x10] sm:$0xf] }
  0xef   : > { %v865_v22 = vunpack.c.l.b16 %v855_v14  ;;  %v1265_v23 = vpack.c.b16 %v1259_v58, %v1258_v9  ;;  %v1060_v29 = vrot.slane %v1058_v12, 5  ;;  %v1072_v30 = vshll.u32 %v4104_v19, 16  ;;  %v1204_v9 = vld [vmem:[#allocation2 + $0x38] sm:$0xe]  ;;  %v1205_v12 = vld [vmem:[#allocation2 + $0x40] sm:$0xe] }
  0xf0   : > { %v860_v33 = vunpack.c.l.b16 %v835_v15  ;;  %v861_v34 = vunpack.c.l.b16 %v839_v20  ;;  %v1070_v37 = vrot.slane %v1069_v21, 4  ;;  %v1077_v48 = vshrl.u32 %v1012_v26, 16  ;;  %v1405_v14 = vld [vmem:[#allocation2 + $0x18] sm:$0xf]  ;;  %v1018_v21 = vld [vmem:[#allocation2 + $0x40] sm:$0xf] }
  0xf1   : > { %v4142_v32 = vpack.c.b16 %v865_v22, %v864_v16  ;;  %v1080_v38 = vshll.u32 %v1012_v26, 16  ;;  %v3295_v40 = vrot.slane %v1202_v25, 9  ;;  %v1240_v42 = vrot.slane %v1013_v17, 5  ;;  %v1016_v20 = vld [vmem:[#allocation2 + $0x38] sm:$0xf] }
  0xf2   : > { %v1091_v41 = vshrl.u32 %v1014_v31, 16  ;;  %v1094_v43 = vshll.u32 %v1014_v31, 16  ;;  %v1074_v19 = vrot.slane %v1072_v30, 5  ;;  %v3296_v45 = vrot.slane %v1203_v36, 9  ;;  %v3281_v36 = vld [vmem:[#allocation2 + $0x38] sm:$0xf] }
  0xf3   : > { %v1244_v46 = vrot.slane %v1015_v35, 5  ;;  %v867_v39 = vpack.c.b16 %v861_v34, %v860_v33  ;;  %v1079_v47 = vrot.slane %v1077_v48, 4  ;;  %v1082_v51 = vrot.slane %v1080_v38, 5 }
  0xf4   : > { %3263 = vmatmul.msk.bf16.vlgmr.msrb.gmra.mxu2 %vm687_vm7, %v866_v44  ;;  %v1061_v44 = vsel %vm4033_vm10, %v1056_v18, %v1060_v29  ;;  %v1075_v50 = vsel %vm4033_vm10, %v1070_v37, %v1074_v19  ;;  %v1241_v57 = vsel %vm4085_vm13, %v3295_v40, %v1240_v42  ;;  %v1093_v59 = vrot.slane %v1091_v41, 4  ;;  %v3460_v42 = vld [vmem:[#allocation2 + $0x3c] sm:$0xf0] }
  0xf5   : > { %v1136_v53 = vunpack.c.l.b16 %v1061_v44  ;;  %v1096_v60 = vrot.slane %v1094_v43, 5  ;;  %v1245_v61 = vsel %vm4085_vm13, %v3296_v45, %v1244_v46  ;;  %v1137_v62 = vunpack.c.l.b16 %v1075_v50 }
  0xf6   : > { %v1260_v2 = vunpack.c.l.b16 %v1241_v57  ;;  %v1083_v3 = vor.u32 %v1082_v51, %v1079_v47  ;;  %v1261_v4 = vunpack.c.l.b16 %v1245_v61  ;;  %v1100_v5 = vshll.u32 %v1015_v35, 16  ;;  %v4173_v47 = vld [vmem:[#allocation2 + $0x14] sm:$0x1] }
  0xf7   : > { %v1143_v28 = vpack.c.b16 %v1137_v62, %v1136_v53  ;;  %v1097_v27 = vor.u32 %v1096_v60, %v1093_v59  ;;  %v1086_v6 = vshll.u32 %v1013_v17, 16  ;;  %v3297_v16 = vrot.slane %v1204_v9, 9  ;;  %v4175_v53 = vld [vmem:[#allocation2 + $0x1c] sm:$0x1] }
  0xf8   : > { %3284 = vmatmul.msk.bf16.gmra.mxu3 %vm687_vm7, %v3274_v56  ;;  %3287 = vmatmul.msk.bf16.vlgmr.msrb.gmra.mxu0 %vm687_vm7, %v1142_v8  ;;  %v3459_v56 = vld [vmem:[#allocation2 + $0x2c] sm:$0xf0]  ;;  %v1084_v24 = vrot.slane %v1083_v3, 4  ;;  %v4158_v8 = vld [vmem:[#allocation2 + $0x44] sm:$0x1]  ;;  %v1266_v10 = vpack.c.b16 %v1261_v4, %v1260_v2  ;;  %v1102_v11 = vrot.slane %v1100_v5, 5  ;;  %v3282_v51 = vor.u32 %v3460_v42, %v3281_v36 }
  0xf9   : > { %v3278_v63 = vor.u32 %v3459_v56, %v3277_v52  ;;  %v1098_v54 = vrot.slane %v1097_v27, 4  ;;  %v1088_v58 = vrot.slane %v1086_v6, 5  ;;  %v1248_v15 = vrot.slane %v4156_v7, 5  ;;  %v1411_v42 = vld [vmem:[#allocation2 + $0x30] sm:$0xf] }
  0xfa   : > { %v1252_v17 = vrot.slane %v4158_v8, 5  ;;  %v1420_v25 = vshrl.u32 %v1403_v13, 16  ;;  %v1423_v18 = vshll.u32 %v1403_v13, 16  ;;  %v1434_v29 = vshrl.u32 %v1405_v14, 16 }
  0xfb   : > { %v1089_v22 = vsel %vm4033_vm10, %v1084_v24, %v1088_v58  ;;  %v1103_v26 = vsel %vm4033_vm10, %v1098_v54, %v1102_v11  ;;  %v1437_v30 = vshll.u32 %v1405_v14, 16  ;;  %v1105_v31 = vshrl.u32 %v1016_v20, 16  ;;  %v1407_v24 = vld [vmem:[#allocation2 + $0x20] sm:$0xf] }
  0xfc   : > { %3300 = vmatmul.msk.bf16.gmra.mxu1 %vm687_vm7, %v1265_v23  ;;  %v3298_v23 = vrot.slane %v1205_v12, 9  ;;  %v1108_v33 = vshll.u32 %v1016_v20, 16  ;;  %v1119_v34 = vshrl.u32 %v1018_v21, 16  ;;  %v1122_v35 = vshll.u32 %v1018_v21, 16  ;;  %v1409_v12 = vld [vmem:[#allocation2 + $0x28] sm:$0xf] }
  0xfd   : > { %v1138_v37 = vunpack.c.l.b16 %v1089_v22  ;;  %v1139_v48 = vunpack.c.l.b16 %v1103_v26  ;;  %v1249_v38 = vsel %vm4085_vm13, %v3297_v16, %v1248_v15  ;;  %v1422_v41 = vrot.slane %v1420_v25, 4 }
  0xfe   : > { %v1253_v40 = vsel %vm4085_vm13, %v3298_v23, %v1252_v17  ;;  %v1425_v43 = vrot.slane %v1423_v18, 5  ;;  %v1436_v44 = vrot.slane %v1434_v29, 4  ;;  %v1439_v19 = vrot.slane %v1437_v30, 5  ;;  %v4194_v30 = vld [vmem:[#allocation2 + $0x24] sm:$0x1] }
  0xff   : > { %v1107_v45 = vrot.slane %v1105_v31, 4  ;;  %v1110_v46 = vrot.slane %v1108_v33, 5  ;;  %v1124_v50 = vrot.slane %v1122_v35, 5  ;;  %v1262_v52 = vunpack.c.l.b16 %v1249_v38  ;;  %v4196_v33 = vld [vmem:[#allocation2 + $0x2c] sm:$0x1] }
 0x100   : > { %v1263_v56 = vunpack.c.l.b16 %v1253_v40  ;;  %v1429_v57 = vshll.u32 %v4173_v47, 16  ;;  %v1144_v59 = vpack.c.b16 %v1139_v48, %v1138_v37  ;;  %v1440_v60 = vor.u32 %v1439_v19, %v1436_v44  ;;  %v1597_v48 = vld [vmem:[#allocation2 + $0x10] sm:$0xe]  ;;  %v1598_v38 = vld [vmem:[#allocation2 + $0x18] sm:$0xe] }
 0x101   : > { %v1443_v61 = vshll.u32 %v4175_v53, 16  ;;  %v1111_v62 = vor.u32 %v1110_v46, %v1107_v45  ;;  %v1128_v3 = vshll.u32 %v4158_v8, 16  ;;  %v1448_v13 = vshrl.u32 %v1407_v24, 16  ;;  %v1413_v44 = vld [vmem:[#allocation2 + $0x38] sm:$0xf] }
 0x102   : > { %v1431_v27 = vrot.slane %v1429_v57, 5  ;;  %v1441_v5 = vrot.slane %v1440_v60, 4  ;;  %v1462_v14 = vshrl.u32 %v1409_v12, 16  ;;  %v1465_v16 = vshll.u32 %v1409_v12, 16 }
 0x103   : > { %v1445_v6 = vrot.slane %v1443_v61, 5  ;;  %v1112_v9 = vrot.slane %v1111_v62, 4  ;;  %v1130_v11 = vrot.slane %v1128_v3, 5  ;;  %v1450_v23 = vrot.slane %v1448_v13, 4 }
 0x104   : > { %3264 = vmatmul.msk.bf16.gmra.mxu2 %vm687_vm7, %v867_v39  ;;  %v1121_v39 = vrot.slane %v1119_v34, 4  ;;  %v1464_v18 = vrot.slane %v1462_v14, 4  ;;  %v1467_v29 = vrot.slane %v1465_v16, 5  ;;  %v1457_v36 = vshll.u32 %v4194_v30, 16 }
 0x105   : > { %v1446_v58 = vsel %vm4033_vm10, %v1441_v5, %v1445_v6  ;;  %v3327_v19 = vrot.slane %v1597_v48, 9  ;;  %v1623_v45 = vrot.slane %v4173_v47, 5  ;;  %v3328_v46 = vrot.slane %v1598_v38, 9 }
 0x106   : > { %v1125_v2 = vor.u32 %v1124_v50, %v1121_v39  ;;  %v1534_v22 = vunpack.c.l.b16 %v1446_v58  ;;  %v1468_v37 = vor.u32 %v1467_v29, %v1464_v18  ;;  %v1627_v39 = vrot.slane %v4175_v53, 5  ;;  %v3305_v50 = vld [vmem:[#allocation2 + $0x10] sm:$0xf]  ;;  %v1600_v58 = vld [vmem:[#allocation2 + $0x28] sm:$0xe] }
 0x107   : > { %v1493_v60 = vshll.u32 %v1413_v44, 16  ;;  %v1624_v62 = vsel %vm4085_vm13, %v3327_v19, %v1623_v45  ;;  %v3309_v18 = vld [vmem:[#allocation2 + $0x20] sm:$0xf]  ;;  %v3462_v29 = vld [vmem:[#allocation2 + $0x24] sm:$0xf0] }
 0x108   : > { %3285 = vmatmul.msk.bf16.gmra.mxu3 %vm687_vm7, %v3278_v63  ;;  %3288 = vmatmul.msk.bf16.gmra.mxu0 %vm687_vm7, %v1143_v28  ;;  %v1114_v63 = vshll.u32 %v4156_v7, 16  ;;  %v1267_v28 = vpack.c.b16 %v1263_v56, %v1262_v52  ;;  %v1126_v54 = vrot.slane %v1125_v2, 4  ;;  %v1451_v7 = vshll.u32 %v1407_v24, 16  ;;  %v3461_v56 = vld [vmem:[#allocation2 + $0x14] sm:$0xf0] }
 0x109   : > { %v1476_v52 = vshrl.u32 %v1411_v42, 16  ;;  %v1628_v47 = vsel %vm4085_vm13, %v3328_v46, %v1627_v39  ;;  %v3306_v53 = vor.u32 %v3461_v56, %v3305_v50  ;;  %v1655_v5 = vunpack.c.l.b16 %v1624_v62  ;;  %v4213_v24 = vld [vmem:[#allocation2 + $0x34] sm:$0x1]  ;;  %v1416_v50 = vld [vmem:[#allocation2 + $0x44] sm:$0x1] }
 0x10a   : > { %v1131_v20 = vsel %vm4033_vm10, %v1126_v54, %v1130_v11  ;;  %v1453_v17 = vrot.slane %v1451_v7, 5  ;;  %v1656_v6 = vunpack.c.l.b16 %v1628_v47  ;;  %v1599_v7 = vld [vmem:[#allocation2 + $0x20] sm:$0xe]  ;;  %v3310_v48 = vor.u32 %v3462_v29, %v3309_v18 }
 0x10b   : > { %v1141_v26 = vunpack.c.l.b16 %v1131_v20  ;;  %v1478_v2 = vrot.slane %v1476_v52, 4  ;;  %v1631_v20 = vrot.slane %v4194_v30, 5  ;;  %v1513_v56 = vshll.u32 %v1416_v50, 16 }
 0x10c   : > { %3301 = vmatmul.msk.bf16.gmra.mxu1 %vm687_vm7, %v1266_v10  ;;  %v1116_v10 = vrot.slane %v1114_v63, 5  ;;  %v1454_v34 = vor.u32 %v1453_v17, %v1450_v23  ;;  %v3330_v23 = vrot.slane %v1600_v58, 9  ;;  %v1635_v17 = vrot.slane %v4196_v33, 5 }
 0x10d   : > { %v1515_v47 = vrot.slane %v1513_v56, 5 }
 0x10e   : > { %v1117_v15 = vsel %vm4033_vm10, %v1112_v9, %v1116_v10  ;;  %v1455_v40 = vrot.slane %v1454_v34, 4  ;;  %v4215_v9 = vld [vmem:[#allocation2 + $0x3c] sm:$0x1]  ;;  %v1485_v10 = vshll.u32 %v4213_v24, 16  ;;  %v1636_v30 = vsel %vm4085_vm13, %v3330_v23, %v1635_v17 }
 0x10f   : > { %v1140_v25 = vunpack.c.l.b16 %v1117_v15  ;;  %v1499_v54 = vshll.u32 %v4215_v9, 16  ;;  %v3329_v15 = vrot.slane %v1599_v7, 9 }
 0x110   : > { %v1487_v14 = vrot.slane %v1485_v10, 5 }
 0x111   : > { %v1145_v35 = vpack.c.b16 %v1141_v26, %v1140_v25  ;;  %v1501_v16 = vrot.slane %v1499_v54, 5  ;;  %v1415_v25 = vld [vmem:[#allocation2 + $0x40] sm:$0xf]  ;;  %v1417_v26 = vld [vmem:[#allocation2 + $0x48] sm:$0xf] }
 0x114   : > { %3265 = vmatmul.msk.bf16.gmra.mxu2 %vm687_vm7, %v4119_v55  ;;  %v1426_v55 = vor.u32 %v1425_v43, %v1422_v41  ;;  %v1459_v41 = vrot.slane %v1457_v36, 5  ;;  %v1469_v43 = vrot.slane %v1468_v37, 4  ;;  %v1504_v36 = vshrl.u32 %v1415_v25, 16 }
 0x115   : > { %v1507_v37 = vshll.u32 %v1415_v25, 16  ;;  %v1647_v25 = vrot.slane %v1416_v50, 5 }
 0x116   : > { %v1427_v4 = vrot.slane %v1426_v55, 4  ;;  %v1460_v57 = vsel %vm4033_vm10, %v1455_v40, %v1459_v41  ;;  %v1490_v55 = vshrl.u32 %v1413_v44, 16  ;;  %v1658_v41 = vunpack.c.l.b16 %v1636_v30 }
 0x117   : > { %v1535_v63 = vunpack.c.l.b16 %v1460_v57  ;;  %v1509_v44 = vrot.slane %v1507_v37, 5 }
 0x118   : > { %3286 = vmatmul.msk.bf16.gmra.mxu3 %vm687_vm7, %v3282_v51  ;;  %3289 = vmatmul.msk.bf16.gmra.mxu0 %vm687_vm7, %v1144_v59  ;;  %v1432_v8 = vsel %vm4033_vm10, %v1427_v4, %v1431_v27  ;;  %v1479_v59 = vshll.u32 %v1411_v42, 16  ;;  %v1492_v4 = vrot.slane %v1490_v55, 4  ;;  %v1495_v27 = vrot.slane %v1493_v60, 5  ;;  %v1601_v55 = vld [vmem:[#allocation2 + $0x30] sm:$0xe] }
 0x119   : > { %v1533_v21 = vunpack.c.l.b16 %v1432_v8  ;;  %v1663_v8 = vpack.c.b16 %v1656_v6, %v1655_v5  ;;  %v1602_v60 = vld [vmem:[#allocation2 + $0x38] sm:$0xe] }
 0x11a   : > { %v1496_v13 = vor.u32 %v1495_v27, %v1492_v4  ;;  %v1643_v4 = vrot.slane %v4215_v9, 5  ;;  %v3313_v27 = vld [vmem:[#allocation2 + $0x30] sm:$0xf]  ;;  %v3463_v5 = vld [vmem:[#allocation2 + $0x34] sm:$0xf0] }
 0x11b   : > { %v1541_v31 = vpack.c.b16 %v1534_v22, %v1533_v21 }
 0x11c   : > { %3302 = vmatmul.msk.bf16.gmra.mxu1 %vm687_vm7, %v1267_v28  ;;  %v1481_v28 = vrot.slane %v1479_v59, 5  ;;  %v1497_v22 = vrot.slane %v1496_v13, 4 }
 0x11e   : > { %v1482_v12 = vor.u32 %v1481_v28, %v1478_v2  ;;  %v1502_v34 = vsel %vm4033_vm10, %v1497_v22, %v1501_v16  ;;  %v3331_v2 = vrot.slane %v1601_v55, 9  ;;  %v3332_v28 = vrot.slane %v1602_v60, 9  ;;  %v1604_v22 = vld [vmem:[#allocation2 + $0x48] sm:$0xe] }
 0x11f   : > { %v1538_v40 = vunpack.c.l.b16 %v1502_v34  ;;  %v3317_v34 = vld [vmem:[#allocation2 + $0x40] sm:$0xf] }
 0x120   : > { %v1483_v21 = vrot.slane %v1482_v12, 4  ;;  %v3314_v12 = vor.u32 %v3463_v5, %v3313_v27 }
 0x124   : > { %3266 = vmatmul.msk.bf16.gmra.mxu2 %vm687_vm7, %v4142_v32  ;;  %v1471_v32 = vshll.u32 %v4196_v33, 16  ;;  %v1521_v33 = vshll.u32 %v1417_v26, 16 }
 0x126   : > { %v1473_v51 = vrot.slane %v1471_v32, 5  ;;  %v1518_v32 = vshrl.u32 %v1417_v26, 16  ;;  %v1523_v45 = vrot.slane %v1521_v33, 5  ;;  %v3334_v26 = vrot.slane %v1604_v22, 9 }
 0x128   : > { %3323 = vmatmul.msk.bf16.vlgmr.msra.gmra.mxu3 %vm687_vm7, %v1541_v31  ;;  %3290 = vmatmul.msk.bf16.gmra.mxu0 %vm687_vm7, %v1145_v35  ;;  %v1474_v61 = vsel %vm4033_vm10, %v1469_v43, %v1473_v51  ;;  %v1488_v31 = vsel %vm4033_vm10, %v1483_v21, %v1487_v14  ;;  %v1632_v35 = vsel %vm4085_vm13, %v3329_v15, %v1631_v20  ;;  %v1506_v43 = vrot.slane %v1504_v36, 4  ;;  %v1418_v51 = vld [vmem:[#allocation2 + $0x4c] sm:$0x1]  ;;  %v1603_v21 = vld [vmem:[#allocation2 + $0x40] sm:$0xe] }
 0x129   : > { %v1536_v3 = vunpack.c.l.b16 %v1474_v61  ;;  %v1537_v38 = vunpack.c.l.b16 %v1488_v31  ;;  %v1657_v42 = vunpack.c.l.b16 %v1632_v35  ;;  %v1520_v19 = vrot.slane %v1518_v32, 4  ;;  %v3464_v35 = vld [vmem:[#allocation2 + $0x44] sm:$0xf0] }
 0x12a   : > { %v1510_v52 = vor.u32 %v1509_v44, %v1506_v43  ;;  %v1527_v59 = vshll.u32 %v1418_v51, 16  ;;  %v3333_v17 = vrot.slane %v1603_v21, 9  ;;  %v1651_v18 = vrot.slane %v1418_v51, 5 }
 0x12b   : > { %v1542_v11 = vpack.c.b16 %v1536_v3, %v1535_v63  ;;  %v1543_v46 = vpack.c.b16 %v1538_v40, %v1537_v38  ;;  %v1664_v39 = vpack.c.b16 %v1658_v41, %v1657_v42  ;;  %v1524_v57 = vor.u32 %v1523_v45, %v1520_v19 }
 0x12c   : > { %v1511_v62 = vrot.slane %v1510_v52, 4  ;;  %v1529_v63 = vrot.slane %v1527_v59, 5  ;;  %v1639_v3 = vrot.slane %v4213_v24, 5  ;;  %v1648_v30 = vsel %vm4085_vm13, %v3333_v17, %v1647_v25  ;;  %v2032_v59 = vld [vmem:[#allocation9 + $0x4] sm:$0xf] }
 0x12d   : > { %v1652_v36 = vsel %vm4085_vm13, %v3334_v26, %v1651_v18  ;;  %v3318_v37 = vor.u32 %v3464_v35, %v3317_v34  ;;  %v1661_v33 = vunpack.c.l.b16 %v1648_v30  ;;  %v2060_v55 = vsel %vm2058_vm14, %v2032_v59, 0 }
 0x12e   : > { %v1516_v6 = vsel %vm4033_vm10, %v1511_v62, %v1515_v47  ;;  %v1640_v54 = vsel %vm4085_vm13, %v3331_v2, %v1639_v3  ;;  %2069 = vmatpush.bf16.msra.mxu1 %v2060_v55 }
 0x12f   : > { %v1539_v13 = vunpack.c.l.b16 %v1516_v6  ;;  %v1659_v9 = vunpack.c.l.b16 %v1640_v54 }
 0x134   : > { %3319 = vmatmul.msk.bf16.vlgmr.msra.gmra.mxu2 %vm687_vm7, %v3306_v53  ;;  %v1525_v53 = vrot.slane %v1524_v57, 4 }
 0x136   : > { %v1530_v10 = vsel %vm4033_vm10, %v1525_v53, %v1529_v63 }
 0x137   : > { %v1540_v24 = vunpack.c.l.b16 %v1530_v10 }
 0x138   : > { %3324 = vmatmul.msk.bf16.gmra.mxu3 %vm687_vm7, %v1542_v11  ;;  %3335 = vmatmul.msk.bf16.vlgmr.msra.gmra.mxu0 %vm687_vm7, %v1663_v8  ;;  %v1644_v11 = vsel %vm4085_vm13, %v3332_v28, %v1643_v4 }
 0x139   : > { %v1660_v8 = vunpack.c.l.b16 %v1644_v11  ;;  %v1544_v16 = vpack.c.b16 %v1540_v24, %v1539_v13 }
 0x13b   : > { %v1665_v20 = vpack.c.b16 %v1660_v8, %v1659_v9 }
 0x144   : > { %3320 = vmatmul.msk.bf16.gmra.mxu2 %vm687_vm7, %v3310_v48  ;;  %v1662_v48 = vunpack.c.l.b16 %v1652_v36 }
 0x146   : > { %v1666_v41 = vpack.c.b16 %v1662_v48, %v1661_v33  ;;  %v4360_v48 = vld [vmem:[%s4791_s2] ss:$0 sm:$0xff] }
 0x148   : > { %3325 = vmatmul.msk.bf16.gmra.mxu3 %vm687_vm7, %v1543_v46  ;;  %3336 = vmatmul.msk.bf16.gmra.mxu0 %vm687_vm7, %v1664_v39 }
 0x149   : > { %v777_v50 = vpop.f32.mrf.mxu1 }
 0x14b   : > { %v787_v61 = vpop.f32.mrf.mxu3 }
 0x151   : > { %v779_v60 = vpop.f32.mrf.mxu1 }
 0x153   : > { %v4244_v7 = vpop.f32.mrf.mxu3 }
 0x154   : > { %3321 = vmatmul.msk.bf16.gmra.mxu2 %vm687_vm7, %v3314_v12 }
 0x155   : > { %v4247_v58 = vpop.f32.mrf.mxu0 }
 0x156   : > { %v778_v24 = vadd.f32 %v777_v50, %v4247_v58 }
 0x157   : > { %v723_v14 = vpop.f32.mrf.mxu2 }
 0x158   : > { %v4249_v15 = vadd.f32 %v787_v61, %v723_v14  ;;  %3326 = vmatmul.msk.bf16.gmra.mxu3 %vm687_vm7, %v1544_v16  ;;  %3337 = vmatmul.msk.bf16.gmra.mxu0 %vm687_vm7, %v1665_v20 }
 0x159   : > { %v782_v2 = vpop.f32.mrf.mxu1 }
 0x15b   : > { %v792_v23 = vpop.f32.mrf.mxu3 }
 0x15d   : > { %v4253_v29 = vpop.f32.mrf.mxu0 }
 0x15e   : > { %v780_v21 = vadd.f32 %v779_v60, %v4253_v29 }
 0x15f   : > { %v4255_v31 = vpop.f32.mrf.mxu2 }
 0x161   : > { %v784_v27 = vpop.f32.mrf.mxu1 }
 0x163   : > { %v4261_v32 = vpop.f32.mrf.mxu3 }
 0x164   : > { %3322 = vmatmul.msk.bf16.gmra.mxu2 %vm687_vm7, %v3318_v37 }
 0x165   : > { %v4264_v38 = vpop.f32.mrf.mxu0 }
 0x166   : > { %v783_v18 = vadd.f32 %v782_v2, %v4264_v38 }
 0x167   : > { %v728_v40 = vpop.f32.mrf.mxu2 }
 0x168   : > { %v4266_v42 = vadd.f32 %v792_v23, %v728_v40  ;;  %3338 = vmatmul.msk.bf16.gmra.mxu0 %vm687_vm7, %v1666_v41 }
 0x169   : > { %v1292_v54 = vpop.f32.mrf.mxu1 }
 0x16b   : > { %v976_v43 = vpop.f32.mrf.mxu3 }
 0x16d   : > { %v4269_v44 = vpop.f32.mrf.mxu0 }
 0x16f   : > { %v4271_v19 = vpop.f32.mrf.mxu2 }
 0x171   : > { %v1294_v58 = vpop.f32.mrf.mxu1 }
 0x173   : > { %v4273_v45 = vpop.f32.mrf.mxu3 }
 0x175   : > { %v1170_v39 = vpop.f32.mrf.mxu0 }
 0x177   : > { %v894_v46 = vpop.f32.mrf.mxu2 }
 0x178   : > { %v914_v9 = vadd.f32 %v894_v46, %v778_v24 }
 0x179   : > { %v1297_v35 = vpop.f32.mrf.mxu1 }
 0x17a   : > { %v996_v14 = vadd.f32 %v976_v43, %v914_v9 }
 0x17b   : > { %v4275_v51 = vpop.f32.mrf.mxu3 }
 0x17c   : > { %v1190_v22 = vadd.f32 %v1170_v39, %v996_v14 }
 0x17d   : > { %v4277_v56 = vpop.f32.mrf.mxu0 }
 0x17e   : > { %v1312_v26 = vadd.f32 %v1292_v54, %v1190_v22  ;;  %v1857_v22 = vld [vmem:[#allocation3 + $0xc] sm:$0x1] }
 0x17f   : > { %v896_v52 = vpop.f32.mrf.mxu2 }
 0x180   : > { %v915_v23 = vadd.f32 %v896_v52, %v780_v21  ;;  %v1852_v21 = vld [vmem:[#allocation3 + $0x8] sm:$0xf] }
 0x181   : > { %v1299_v55 = vpop.f32.mrf.mxu1 }
 0x182   : > { %v997_v25 = vadd.f32 %v4273_v45, %v915_v23  ;;  %v785_v45 = vadd.f32 %v784_v27, %v4269_v44  ;;  %v2212_v44 = vld [vmem:[#allocation9 + $0x8] sm:$0xf] }
 0x183   : > { %v4279_v57 = vpop.f32.mrf.mxu3  ;;  %v2238_v14 = vsel %vm2058_vm14, %v2212_v44, 0 }
 0x184   : > { %v1191_v37 = vadd.f32 %v4277_v56, %v997_v25  ;;  %2247 = vmatpush.bf16.msrb.mxu3 %v2238_v14 }
 0x185   : > { %v4282_v62 = vpop.f32.mrf.mxu0 }
 0x186   : > { %v1313_v38 = vadd.f32 %v1294_v58, %v1191_v37 }
 0x187   : > { %v899_v61 = vpop.f32.mrf.mxu2 }
 0x188   : > { %v916_v36 = vadd.f32 %v899_v61, %v783_v18 }
 0x18a   : > { %v998_v0 = vadd.f32 %v4275_v51, %v916_v36  ;;  %v1910_v51 = vld [vmem:[#allocation9] sm:$0xf] }
 0x18b   : > { %v4284_v47 = vpop.f32.mrf.mxu3 }
 0x18c   : > { %v1192_v56 = vadd.f32 %v4282_v62, %v998_v0 }
 0x18d   : > { %v4288_v63 = vpop.f32.mrf.mxu0 }
 0x18e   : > { %v1314_v9 = vadd.f32 %v1297_v35, %v1192_v56 }
 0x18f   : > { %v4286_v53 = vpop.f32.mrf.mxu2 }
 0x190   : > { %v917_v59 = vadd.f32 %v4286_v53, %v785_v45 }
 0x192   : > { %v999_v24 = vadd.f32 %v4279_v57, %v917_v59 }
 0x193   : > { %v4290_v3 = vpop.f32.mrf.mxu3 }
 0x194   : > { %v1193_v35 = vadd.f32 %v4288_v63, %v999_v24  ;;  %v4393_v63 = vld [vmem:[#allocation3 + $0x4] sm:$0x1] }
 0x195   : > { %v4294_v4 = vpop.f32.mrf.mxu0 }
 0x196   : > { %v1315_v45 = vadd.f32 %v1299_v55, %v1193_v35 }
 0x197   : > { %v4292_v28 = vpop.f32.mrf.mxu2 }
 0x19b   : > { %v4296_v5 = vpop.f32.mrf.mxu3 }
 0x19d   : > { %v4300_v10 = vpop.f32.mrf.mxu0 }
 0x19f   : > { %v4298_v6 = vpop.f32.mrf.mxu2 }
 0x1a3   : > { %v4308_v11 = vpop.f32.mrf.mxu3 }
 0x1a5   : > { %v4318_v13 = vpop.f32.mrf.mxu0 }
 0x1a7   : > { %v4316_v12 = vpop.f32.mrf.mxu2 }
 0x1ab   : > { %v1569_v8 = vpop.f32.mrf.mxu3 }
 0x1ad   : > { %v4339_v20 = vpop.f32.mrf.mxu0 }
 0x1af   : > { %v4337_v16 = vpop.f32.mrf.mxu2 }
 0x1b3   : > { %v1571_v17 = vpop.f32.mrf.mxu3 }
 0x1b5   : > { %v1691_v34 = vpop.f32.mrf.mxu0 }
 0x1b7   : > { %v1375_v29 = vpop.f32.mrf.mxu2 }
 0x1b8   : > { %v1395_v30 = vadd.f32 %v1375_v29, %v1312_v26 }
 0x1ba   : > { %v1589_v33 = vadd.f32 %v1569_v8, %v1395_v30  ;;  %v2124_v8 = vsel %vm2058_vm14, %v1910_v51, 0  ;;  %v918_v30 = vadd.f32 %v4292_v28, %v4249_v15 }
 0x1bb   : > { %v1574_v43 = vpop.f32.mrf.mxu3  ;;  %2133 = vmatpush.bf16.msrb.mxu2 %v2124_v8  ;;  %v3345_v8 = vld [vmem:[#allocation3] sm:$0xf] }
 0x1bc   : > { %v1711_v40 = vadd.f32 %v1691_v34, %v1589_v33  ;;  %v790_v34 = vadd.f32 %v4244_v7, %v4255_v31  ;;  %v1000_v15 = vadd.f32 %v4284_v47, %v918_v30 }
 0x1bd   : > { %v1693_v39 = vpop.f32.mrf.mxu0 }
 0x1be   : > { %v1723_v41 = vadd.f32 %v4360_v48, %v1711_v40  ;;  %v1194_v44 = vadd.f32 %v4294_v4, %v1000_v15 }
 0x1bf   : > { %v1377_v46 = vpop.f32.mrf.mxu2 }
 0x1c0   : > { %v1731_v50 = vmax.f32 %v1723_v41, 0.0  ;;  %v1396_v52 = vadd.f32 %v1377_v46, %v1313_v38  ;;  %v919_v41 = vadd.f32 %v4298_v6, %v790_v34  ;;  %v1302_v38 = vpop.f32.mrf.mxu1  ;;  %v2155_v46 = vld [vmem:[#allocation3] sm:$0xe] }
 0x1c1   : > { %v3363_v56 = vrot.slane %v2155_v46, 9 }
 0x1c2   : > { %v1761_v60 = vpack.c.bf16 %v1731_v50, %v1731_v50  ;;  %v1590_v61 = vadd.f32 %v1571_v17, %v1396_v52  ;;  %v2286_v50 = vld [vmem:[#allocation9 + $0xc] sm:$0xf]  ;;  %v1001_v59 = vadd.f32 %v4290_v3, %v919_v41 }
 0x1c3   : > { %v1576_v36 = vpop.f32.mrf.mxu3  ;;  %v2320_v6 = vsel %vm2058_vm14, %v2286_v50, 0 }
 0x1c4   : > { %v1770_v2 = vshrl.u32 %v1761_v60, 16  ;;  %v1712_v54 = vadd.f32 %v1693_v39, %v1590_v61  ;;  %v1773_v58 = vshll.u32 %v1761_v60, 16  ;;  %v2181_v39 = vrot.slane %v4393_v63, 5  ;;  %v1860_v61 = vld [vmem:[#allocation3 + $0x10] sm:$0xf]  ;;  %2329 = vmatpush.bf16.msrb.mxu0 %v2320_v6 }
 0x1c5   : > { %v1696_v17 = vpop.f32.mrf.mxu0  ;;  %v920_v60 = vadd.f32 %v4316_v12, %v4266_v42 }
 0x1c6   : > { %v1772_v27 = vrot.slane %v1770_v2, 7  ;;  %v1724_v53 = vadd.f32 %v4360_v48, %v1712_v54  ;;  %v1863_v2 = vld [vmem:[#allocation3 + $0x14] sm:$0x1] }
 0x1c7   : > { %v1380_v23 = vpop.f32.mrf.mxu2 }
 0x1c8   : > { %v1775_v25 = vor.u32 %v1773_v58, %v1772_v27  ;;  %v1776_v26 = vrot.slane %v1772_v27, 4  ;;  %v1732_v18 = vmax.f32 %v1724_v53, 0.0  ;;  %v1397_v29 = vadd.f32 %v1380_v23, %v1314_v9 }
 0x1c9   : > { %v2182_v27 = vsel %vm4085_vm13, %v3363_v56, %v2181_v39 }
 0x1ca   : > { %v1853_v37 = vsel %vm4371_vm1, %v1775_v25, %v1852_v21  ;;  %v1858_v33 = vsel %vm4379_vm2, %v1776_v26, %v1857_v22  ;;  %v1762_v40 = vpack.c.bf16 %v1732_v18, %v1732_v18  ;;  %v1591_v0 = vadd.f32 %v1574_v43, %v1397_v29 }
 0x1cb   : > { %1854 = vst [vmem:[#allocation3 + $0x8] sm:$0xf] %v1853_v37  ;;  %v795_v21 = vadd.f32 %v4261_v32, %v4271_v19  ;;  %v1195_v22 = vadd.f32 %v4300_v10, %v1001_v59  ;;  %v1579_v4 = vpop.f32.mrf.mxu3  ;;  %v1002_v26 = vadd.f32 %v4296_v5, %v920_v60  ;;  %v1316_v32 = vadd.f32 %v1302_v38, %v1194_v44  ;;  %v1902_v10 = vld [vmem:[#allocation3] sm:$0xf]  ;;  %v1304_v37 = vpop.f32.mrf.mxu1 }
 0x1cc   : > { %1859 = vst [vmem:[#allocation3 + $0xc] sm:$0x1] %v1858_v33  ;;  %v1778_v7 = vshrl.u32 %v1762_v40, 16  ;;  %v1713_v31 = vadd.f32 %v1696_v17, %v1591_v0  ;;  %v1781_v28 = vshll.u32 %v1762_v40, 16  ;;  %v2213_v19 = vunpack.c.l.b16 %v2182_v27  ;;  %v1866_v40 = vld [vmem:[#allocation3 + $0x18] sm:$0xf] }
 0x1cd   : > { %v1698_v54 = vpop.f32.mrf.mxu0  ;;  %v921_v35 = vadd.f32 %v4337_v16, %v795_v21  ;;  %v1920_v41 = vshrl.u32 %v1902_v10, 16  ;;  %v1196_v44 = vadd.f32 %v4318_v13, %v1002_v26 }
 0x1ce   : > { %v1780_v52 = vrot.slane %v1778_v7, 7  ;;  %v1725_v43 = vadd.f32 %v4360_v48, %v1713_v31  ;;  %v1869_v7 = vld [vmem:[#allocation3 + $0x1c] sm:$0x1] }
 0x1cf   : > { %v1382_v47 = vpop.f32.mrf.mxu2  ;;  %v1922_v56 = vrot.slane %v1920_v41, 4 }
 0x1d0   : > { %v1783_v55 = vor.u32 %v1781_v28, %v1780_v52  ;;  %v1784_v51 = vrot.slane %v1780_v52, 4  ;;  %v1733_v24 = vmax.f32 %v1725_v43, 0.0  ;;  %v1398_v9 = vadd.f32 %v1382_v47, %v1315_v45 }
 0x1d1   : > { %v1923_v28 = vshll.u32 %v1902_v10, 16  ;;  %v1929_v45 = vshll.u32 %v4393_v63, 16  ;;  %v2488_v63 = vld [vmem:[#allocation9 + $0x10] sm:$0xf] }
 0x1d2   : > { %v1861_v3 = vsel %vm4371_vm1, %v1783_v55, %v1860_v61  ;;  %v1864_v42 = vsel %vm4379_vm2, %v1784_v51, %v1863_v2  ;;  %v1763_v12 = vpack.c.bf16 %v1733_v24, %v1733_v24  ;;  %v1592_v58 = vadd.f32 %v1576_v36, %v1398_v9  ;;  %v3465_v53 = vld [vmem:[#allocation3 + $0x4] sm:$0xf0] }
 0x1d3   : > { %v2156_v14 = vld [vmem:[#allocation3 + $0x8] sm:$0xe]  ;;  %1862 = vst [vmem:[#allocation3 + $0x10] sm:$0xf] %v1861_v3  ;;  %v3346_v23 = vor.u32 %v3465_v53, %v3345_v8  ;;  %v4412_v17 = vld [vmem:[#allocation3 + $0xc] sm:$0x1] }
 0x1d4   : > { %v3364_v25 = vrot.slane %v2156_v14, 9  ;;  %1865 = vst [vmem:[#allocation3 + $0x14] sm:$0x1] %v1864_v42  ;;  %v1786_v18 = vshrl.u32 %v1763_v12, 16  ;;  %v1714_v29 = vadd.f32 %v1698_v54, %v1592_v58  ;;  %v2185_v34 = vrot.slane %v4412_v17, 5 }
 0x1d5   : > { %v1789_v30 = vshll.u32 %v1763_v12, 16  ;;  %3359 = vmatmul.msk.bf16.vlgmr.msrb.gmra.mxu2 %vm2045_vm3, %v3346_v23  ;;  %v1903_v36 = vld [vmem:[#allocation3 + $0x8] sm:$0xf]  ;;  %v1701_v15 = vpop.f32.mrf.mxu0  ;;  %v1925_v6 = vrot.slane %v1923_v28, 5  ;;  %v1931_v59 = vrot.slane %v1929_v45, 5  ;;  %v1317_v42 = vadd.f32 %v1304_v37, %v1195_v22  ;;  %v1581_v12 = vpop.f32.mrf.mxu3 }
 0x1d6   : > { %v1788_v33 = vrot.slane %v1786_v18, 7  ;;  %v1726_v0 = vadd.f32 %v4360_v48, %v1714_v29  ;;  %v2186_v5 = vsel %vm4085_vm13, %v3364_v25, %v2185_v34  ;;  %v1934_v38 = vshrl.u32 %v1903_v36, 16  ;;  %v3377_v54 = vld [vmem:[#allocation3 + $0x8] sm:$0xf]  ;;  %v1872_v29 = vld [vmem:[#allocation3 + $0x20] sm:$0xf] }
 0x1d7   : > { %v1385_v31 = vpop.f32.mrf.mxu2  ;;  %v2214_v16 = vunpack.c.l.b16 %v2186_v5  ;;  %v1926_v24 = vor.u32 %v1925_v6, %v1922_v56  ;;  %v1937_v8 = vshll.u32 %v1903_v36, 16  ;;  %v1943_v14 = vshll.u32 %v4412_v17, 16  ;;  %v1875_v34 = vld [vmem:[#allocation3 + $0x24] sm:$0x1] }
 0x1d8   : > { %v1791_v46 = vor.u32 %v1789_v30, %v1788_v33  ;;  %v1792_v39 = vrot.slane %v1788_v33, 4  ;;  %v1734_v50 = vmax.f32 %v1726_v0, 0.0  ;;  %v1399_v52 = vadd.f32 %v1385_v31, %v1316_v32  ;;  %v1307_v0 = vpop.f32.mrf.mxu1 }
 0x1d9   : > { %v2221_v43 = vpack.c.b16 %v2214_v16, %v2213_v19  ;;  %v1936_v9 = vrot.slane %v1934_v38, 4  ;;  %v1927_v58 = vrot.slane %v1926_v24, 4  ;;  %v1939_v53 = vrot.slane %v1937_v8, 5 }
 0x1da   : > { %v1867_v60 = vsel %vm4371_vm1, %v1791_v46, %v1866_v40  ;;  %v1870_v61 = vsel %vm4379_vm2, %v1792_v39, %v1869_v7  ;;  %v1764_v2 = vpack.c.bf16 %v1734_v50, %v1734_v50  ;;  %v1593_v47 = vadd.f32 %v1579_v4, %v1399_v52  ;;  %v3469_v55 = vld [vmem:[#allocation3 + $0xc] sm:$0xf0] }
 0x1db   : > { %1868 = vst [vmem:[#allocation3 + $0x18] sm:$0xf] %v1867_v60  ;;  %3371 = vmatmul.msk.bf16.vlgmr.msrb.gmra.mxu3 %vm2045_vm3, %v2221_v43  ;;  %v3378_v51 = vor.u32 %v3469_v55, %v3377_v54  ;;  %v2514_v21 = vsel %vm2058_vm14, %v2488_v63, 0  ;;  %v4431_v4 = vld [vmem:[#allocation3 + $0x14] sm:$0x1]  ;;  %v1003_v22 = vadd.f32 %v4308_v11, %v921_v35  ;;  %v1932_v17 = vsel %vm4033_vm10, %v1927_v58, %v1931_v59 }
 0x1dc   : > { %1871 = vst [vmem:[#allocation3 + $0x1c] sm:$0x1] %v1870_v61  ;;  %v1794_v27 = vshrl.u32 %v1764_v2, 16  ;;  %v1715_v3 = vadd.f32 %v1701_v15, %v1593_v47  ;;  %v1797_v25 = vshll.u32 %v1764_v2, 16  ;;  %2523 = vmatpush.bf16.msrb.mxu1 %v2514_v21  ;;  %v2157_v13 = vld [vmem:[#allocation3 + $0x10] sm:$0xe]  ;;  %v1940_v19 = vor.u32 %v1939_v53, %v1936_v9 }
 0x1dd   : > { %3391 = vmatmul.msk.bf16.vlgmr.msrb.gmra.mxu0 %vm2045_vm3, %v3378_v51  ;;  %v2189_v26 = vrot.slane %v4431_v4, 5  ;;  %v1703_v32 = vpop.f32.mrf.mxu0  ;;  %v3365_v10 = vrot.slane %v2157_v13, 9  ;;  %v1945_v41 = vrot.slane %v1943_v14, 5  ;;  %v2033_v7 = vunpack.c.l.b16 %v1932_v17  ;;  %v3349_v28 = vld [vmem:[#allocation3 + $0x10] sm:$0xf] }
 0x1de   : > { %v1796_v23 = vrot.slane %v1794_v27, 7  ;;  %v1727_v18 = vadd.f32 %v4360_v48, %v1715_v3  ;;  %v1941_v5 = vrot.slane %v1940_v19, 4  ;;  %v1197_v43 = vadd.f32 %v4339_v20, %v1003_v22  ;;  %v1904_v54 = vld [vmem:[#allocation3 + $0x10] sm:$0xf]  ;;  %v1878_v51 = vld [vmem:[#allocation3 + $0x28] sm:$0xf]  ;;  %v1584_v27 = vpop.f32.mrf.mxu3 }
 0x1df   : > { %v1387_v30 = vpop.f32.mrf.mxu2  ;;  %v2190_v11 = vsel %vm4085_vm13, %v3365_v10, %v2189_v26  ;;  %v1318_v61 = vadd.f32 %v1307_v0, %v1196_v44  ;;  %v1948_v8 = vshrl.u32 %v1904_v54, 16  ;;  %v1881_v20 = vld [vmem:[#allocation3 + $0x2c] sm:$0x1]  ;;  %v1957_v44 = vshll.u32 %v4431_v4, 16 }
 0x1e0   : > { %v1799_v36 = vor.u32 %v1797_v25, %v1796_v23  ;;  %v1800_v37 = vrot.slane %v1796_v23, 4  ;;  %v1735_v33 = vmax.f32 %v1727_v18, 0.0  ;;  %v1400_v40 = vadd.f32 %v1387_v30, %v1317_v42  ;;  %v1309_v10 = vpop.f32.mrf.mxu1 }
 0x1e1   : > { %v1946_v46 = vsel %vm4033_vm10, %v1941_v5, %v1945_v41  ;;  %v2215_v47 = vunpack.c.l.b16 %v2190_v11  ;;  %v1950_v13 = vrot.slane %v1948_v8, 4 }
 0x1e2   : > { %v1873_v35 = vsel %vm4371_vm1, %v1799_v36, %v1872_v29  ;;  %v1876_v31 = vsel %vm4379_vm2, %v1800_v37, %v1875_v34  ;;  %v1765_v15 = vpack.c.bf16 %v1735_v33, %v1735_v33  ;;  %v1594_v16 = vadd.f32 %v1581_v12, %v1400_v40  ;;  %v3466_v45 = vld [vmem:[#allocation3 + $0x14] sm:$0xf0] }
 0x1e3   : > { %v2158_v38 = vld [vmem:[#allocation3 + $0x18] sm:$0xe]  ;;  %1874 = vst [vmem:[#allocation3 + $0x20] sm:$0xf] %v1873_v35  ;;  %v3350_v39 = vor.u32 %v3466_v45, %v3349_v28  ;;  %v4446_v50 = vld [vmem:[#allocation3 + $0x1c] sm:$0x1]  ;;  %v2034_v59 = vunpack.c.l.b16 %v1946_v46 }
 0x1e4   : > { %v3366_v52 = vrot.slane %v2158_v38, 9  ;;  %1877 = vst [vmem:[#allocation3 + $0x24] sm:$0x1] %v1876_v31  ;;  %v1802_v56 = vshrl.u32 %v1765_v15, 16  ;;  %v1716_v6 = vadd.f32 %v1703_v32, %v1594_v16  ;;  %v1805_v60 = vshll.u32 %v1765_v15, 16 }
 0x1e5   : > { %3360 = vmatmul.msk.bf16.gmra.mxu2 %vm2045_vm3, %v3350_v39  ;;  %v2193_v2 = vrot.slane %v4446_v50, 5  ;;  %v1905_v55 = vld [vmem:[#allocation3 + $0x18] sm:$0xf]  ;;  %v2041_v9 = vpack.c.b16 %v2034_v59, %v2033_v7  ;;  %v1951_v12 = vshll.u32 %v1904_v54, 16  ;;  %v1706_v25 = vpop.f32.mrf.mxu0  ;;  %v1319_v7 = vadd.f32 %v1309_v10, %v1197_v43  ;;  %v1884_v46 = vld [vmem:[#allocation3 + $0x30] sm:$0xf] }
 0x1e6   : > { %v1804_v63 = vrot.slane %v1802_v56, 7  ;;  %v1728_v24 = vadd.f32 %v4360_v48, %v1716_v6  ;;  %v1962_v58 = vshrl.u32 %v1905_v55, 16  ;;  %v3381_v32 = vld [vmem:[#allocation3 + $0x18] sm:$0xf]  ;;  %v1965_v40 = vshll.u32 %v1905_v55, 16  ;;  %v1586_v55 = vpop.f32.mrf.mxu3 }
 0x1e7   : > { %v1390_v3 = vpop.f32.mrf.mxu2  ;;  %v2194_v42 = vsel %vm4085_vm13, %v3366_v52, %v2193_v2  ;;  %3339 = vmatmul.msk.bf16.vlgmr.msra.gmra.mxu1 %vm2045_vm3, %v2041_v9  ;;  %v1953_v26 = vrot.slane %v1951_v12, 5  ;;  %v1971_v11 = vshll.u32 %v4446_v50, 16  ;;  %v1887_v56 = vld [vmem:[#allocation3 + $0x34] sm:$0x1]  ;;  %v1959_v6 = vrot.slane %v1957_v44, 5 }
 0x1e8   : > { %v1807_v53 = vor.u32 %v1805_v60, %v1804_v63  ;;  %v1808_v14 = vrot.slane %v1804_v63, 4  ;;  %v1736_v21 = vmax.f32 %v1728_v24, 0.0  ;;  %v1401_v23 = vadd.f32 %v1390_v3, %v1318_v61 }
 0x1e9   : > { %v2216_v18 = vunpack.c.l.b16 %v2194_v42  ;;  %v1964_v22 = vrot.slane %v1962_v58, 4  ;;  %v1954_v33 = vor.u32 %v1953_v26, %v1950_v13  ;;  %v1967_v31 = vrot.slane %v1965_v40, 5 }
 0x1ea   : > { %v1879_v29 = vsel %vm4371_vm1, %v1807_v53, %v1878_v51  ;;  %v1882_v34 = vsel %vm4379_vm2, %v1808_v14, %v1881_v20  ;;  %v1766_v30 = vpack.c.bf16 %v1736_v21, %v1736_v21  ;;  %v1595_v4 = vadd.f32 %v1584_v27, %v1401_v23  ;;  %v3470_v17 = vld [vmem:[#allocation3 + $0x1c] sm:$0xf0] }
 0x1eb   : > { %v2159_v19 = vld [vmem:[#allocation3 + $0x20] sm:$0xe]  ;;  %1880 = vst [vmem:[#allocation3 + $0x28] sm:$0xf] %v1879_v29  ;;  %v2222_v36 = vpack.c.b16 %v2216_v18, %v2215_v47  ;;  %v3382_v37 = vor.u32 %v3470_v17, %v3381_v32  ;;  %v4460_v0 = vld [vmem:[#allocation3 + $0x24] sm:$0x1]  ;;  %v1968_v50 = vor.u32 %v1967_v31, %v1964_v22 }
 0x1ec   : > { %1883 = vst [vmem:[#allocation3 + $0x2c] sm:$0x1] %v1882_v34  ;;  %v1810_v5 = vshrl.u32 %v1766_v30, 16  ;;  %v1717_v41 = vadd.f32 %v1706_v25, %v1595_v4  ;;  %v1955_v35 = vrot.slane %v1954_v33, 4  ;;  %v3367_v15 = vrot.slane %v2159_v19, 9 }
 0x1ed   : > { %3372 = vmatmul.msk.bf16.gmra.mxu3 %vm2045_vm3, %v2222_v36  ;;  %3392 = vmatmul.msk.bf16.gmra.mxu0 %vm2045_vm3, %v3382_v37  ;;  %v2197_v16 = vrot.slane %v4460_v0, 5  ;;  %v1906_v28 = vld [vmem:[#allocation3 + $0x20] sm:$0xf]  ;;  %v1813_v38 = vshll.u32 %v1766_v30, 16  ;;  %v1973_v59 = vrot.slane %v1971_v11, 5  ;;  %v1969_v51 = vrot.slane %v1968_v50, 4  ;;  %v1708_v58 = vpop.f32.mrf.mxu0 }
 0x1ee   : > { %v1812_v45 = vrot.slane %v1810_v5, 7  ;;  %v1729_v39 = vadd.f32 %v4360_v48, %v1717_v41  ;;  %v1976_v52 = vshrl.u32 %v1906_v28, 16  ;;  %v1979_v60 = vshll.u32 %v1906_v28, 16  ;;  %v3353_v42 = vld [vmem:[#allocation3 + $0x20] sm:$0xf] }
 0x1ef   : > { %v1392_v43 = vpop.f32.mrf.mxu2  ;;  %v1960_v63 = vsel %vm4033_vm10, %v1955_v35, %v1959_v6  ;;  %v2198_v24 = vsel %vm4085_vm13, %v3367_v15, %v2197_v16  ;;  %v1974_v53 = vsel %vm4033_vm10, %v1969_v51, %v1973_v59  ;;  %v1890_v37 = vld [vmem:[#allocation3 + $0x38] sm:$0xf]  ;;  %v1893_v33 = vld [vmem:[#allocation3 + $0x3c] sm:$0x1]  ;;  %v1985_v41 = vshll.u32 %v4460_v0, 16 }
 0x1f0   : > { %v1815_v61 = vor.u32 %v1813_v38, %v1812_v45  ;;  %v1816_v2 = vrot.slane %v1812_v45, 4  ;;  %v1737_v47 = vmax.f32 %v1729_v39, 0.0  ;;  %v1402_v54 = vadd.f32 %v1392_v43, %v1319_v7  ;;  %v2610_v16 = vld [vmem:[#allocation9 + $0x14] sm:$0xf] }
 0x1f1   : > { %v1978_v9 = vrot.slane %v1976_v52, 4  ;;  %v1981_v25 = vrot.slane %v1979_v60, 5  ;;  %v2035_v26 = vunpack.c.l.b16 %v1960_v63  ;;  %v2036_v22 = vunpack.c.l.b16 %v1974_v53 }
 0x1f2   : > { %v1885_v8 = vsel %vm4371_vm1, %v1815_v61, %v1884_v46  ;;  %v1888_v20 = vsel %vm4379_vm2, %v1816_v2, %v1887_v56  ;;  %v1767_v27 = vpack.c.bf16 %v1737_v47, %v1737_v47  ;;  %v1596_v3 = vadd.f32 %v1586_v55, %v1402_v54  ;;  %v3467_v12 = vld [vmem:[#allocation3 + $0x24] sm:$0xf0] }
 0x1f3   : > { %v2160_v44 = vld [vmem:[#allocation3 + $0x28] sm:$0xe]  ;;  %1886 = vst [vmem:[#allocation3 + $0x30] sm:$0xf] %v1885_v8  ;;  %v3354_v14 = vor.u32 %v3467_v12, %v3353_v42  ;;  %v1916_v21 = vld [vmem:[#allocation3 + $0x2c] sm:$0x1]  ;;  %v2217_v4 = vunpack.c.l.b16 %v2198_v24  ;;  %v2042_v10 = vpack.c.b16 %v2036_v22, %v2035_v26  ;;  %v1982_v5 = vor.u32 %v1981_v25, %v1978_v9 }
 0x1f4   : > { %v3368_v23 = vrot.slane %v2160_v44, 9  ;;  %1889 = vst [vmem:[#allocation3 + $0x34] sm:$0x1] %v1888_v20  ;;  %v1818_v18 = vshrl.u32 %v1767_v27, 16  ;;  %v1718_v13 = vadd.f32 %v1708_v58, %v1596_v3  ;;  %v1907_v29 = vld [vmem:[#allocation3 + $0x28] sm:$0xf] }
 0x1f5   : > { %v1821_v34 = vshll.u32 %v1767_v27, 16  ;;  %3361 = vmatmul.msk.bf16.gmra.mxu2 %vm2045_vm3, %v3354_v14  ;;  %v2201_v30 = vrot.slane %v1916_v21, 5  ;;  %v1990_v32 = vshrl.u32 %v1907_v29, 16  ;;  %v1993_v36 = vshll.u32 %v1907_v29, 16  ;;  %v3385_v52 = vld [vmem:[#allocation3 + $0x28] sm:$0xf] }
 0x1f6   : > { %v1820_v17 = vrot.slane %v1818_v18, 7  ;;  %v1730_v19 = vadd.f32 %v4360_v48, %v1718_v13  ;;  %v1999_v48 = vshll.u32 %v1916_v21, 16  ;;  %v2636_v45 = vsel %vm2058_vm14, %v2610_v16, 0  ;;  %v1896_v27 = vld [vmem:[#allocation3 + $0x40] sm:$0xf] }
 0x1f7   : > { %v2202_v40 = vsel %vm4085_vm13, %v3368_v23, %v2201_v30  ;;  %v1992_v7 = vrot.slane %v1990_v32, 4  ;;  %3340 = vmatmul.msk.bf16.gmra.mxu1 %vm2045_vm3, %v2042_v10  ;;  %v1995_v28 = vrot.slane %v1993_v36, 5  ;;  %2645 = vmatpush.bf16.msra.mxu2 %v2636_v45  ;;  %v1983_v50 = vrot.slane %v1982_v5, 4  ;;  %v1899_v3 = vld [vmem:[#allocation3 + $0x44] sm:$0x1] }
 0x1f8   : > { %v1823_v11 = vor.u32 %v1821_v34, %v1820_v17  ;;  %v1824_v35 = vrot.slane %v1820_v17, 4  ;;  %v1738_v31 = vmax.f32 %v1730_v19, 0.0  ;;  %v2218_v15 = vunpack.c.l.b16 %v2202_v40  ;;  %v2553_v13 = vld [vmem:[#allocation3 + $0x8] sm:$0xe]  ;;  %v2685_v26 = vld [vmem:[#allocation9 + $0x18] sm:$0xf] }
 0x1f9   : > { %v1996_v59 = vor.u32 %v1995_v28, %v1992_v7  ;;  %v1987_v2 = vrot.slane %v1985_v41, 5  ;;  %v2001_v54 = vrot.slane %v1999_v48, 5  ;;  %v4500_v32 = vld [vmem:[#allocation3 + $0xc] sm:$0x1]  ;;  %v2887_v17 = vld [vmem:[#allocation9 + $0x1c] sm:$0xf] }
 0x1fa   : > { %v1891_v38 = vsel %vm4371_vm1, %v1823_v11, %v1890_v37  ;;  %v1894_v46 = vsel %vm4379_vm2, %v1824_v35, %v1893_v33  ;;  %v1768_v39 = vpack.c.bf16 %v1738_v31, %v1738_v31  ;;  %v2223_v0 = vpack.c.b16 %v2218_v15, %v2217_v4  ;;  %v3471_v56 = vld [vmem:[#allocation3 + $0x2c] sm:$0xf0]  ;;  %v4502_v37 = vld [vmem:[#allocation3 + $0x14] sm:$0x1] }
 0x1fb   : > { %v2161_v43 = vld [vmem:[#allocation3 + $0x30] sm:$0xe]  ;;  %1892 = vst [vmem:[#allocation3 + $0x38] sm:$0xf] %v1891_v38  ;;  %v3386_v6 = vor.u32 %v3471_v56, %v3385_v52  ;;  %v1917_v60 = vld [vmem:[#allocation3 + $0x34] sm:$0x1]  ;;  %v1988_v42 = vsel %vm4033_vm10, %v1983_v50, %v1987_v2 }
 0x1fc   : > { %1895 = vst [vmem:[#allocation3 + $0x3c] sm:$0x1] %v1894_v46  ;;  %v1826_v61 = vshrl.u32 %v1768_v39, 16  ;;  %v1997_v47 = vrot.slane %v1996_v59, 4  ;;  %v3369_v55 = vrot.slane %v2161_v43, 9  ;;  %v2205_v63 = vrot.slane %v1917_v60, 5 }
 0x1fd   : > { %3373 = vmatmul.msk.bf16.gmra.mxu3 %vm2045_vm3, %v2223_v0  ;;  %3393 = vmatmul.msk.bf16.gmra.mxu0 %vm2045_vm3, %v3386_v6  ;;  %v1908_v51 = vld [vmem:[#allocation3 + $0x30] sm:$0xf]  ;;  %v1829_v9 = vshll.u32 %v1768_v39, 16  ;;  %v2013_v21 = vshll.u32 %v1917_v60, 16  ;;  %v2037_v34 = vunpack.c.l.b16 %v1988_v42  ;;  %v3399_v31 = vrot.slane %v2553_v13, 9 }
 0x1fe   : > { %v1828_v24 = vrot.slane %v1826_v61, 7  ;;  %v2004_v8 = vshrl.u32 %v1908_v51, 16  ;;  %v2007_v20 = vshll.u32 %v1908_v51, 16  ;;  %v2002_v12 = vsel %vm4033_vm10, %v1997_v47, %v2001_v54  ;;  %v3357_v14 = vld [vmem:[#allocation3 + $0x30] sm:$0xf] }
 0x1ff   : > { %v2038_v53 = vunpack.c.l.b16 %v2002_v12  ;;  %v2206_v23 = vsel %vm4085_vm13, %v3369_v55, %v2205_v63  ;;  %v2554_v33 = vld [vmem:[#allocation3 + $0x10] sm:$0xe]  ;;  %v2015_v57 = vrot.slane %v2013_v21, 5  ;;  %v2719_v48 = vsel %vm2058_vm14, %v2685_v26, 0  ;;  %v2760_v38 = vld [vmem:[#allocation3 + $0x18] sm:$0xf] }
 0x200   : > { %v1831_v44 = vor.u32 %v1829_v9, %v1828_v24  ;;  %v1832_v58 = vrot.slane %v1828_v24, 4  ;;  %v2006_v25 = vrot.slane %v2004_v8, 4  ;;  %v2009_v18 = vrot.slane %v2007_v20, 5  ;;  %v2758_v15 = vld [vmem:[#allocation3 + $0x10] sm:$0xf]  ;;  %2728 = vmatpush.bf16.msra.mxu3 %v2719_v48 }
 0x201   : > { %v2043_v40 = vpack.c.b16 %v2038_v53, %v2037_v34  ;;  %v2219_v5 = vunpack.c.l.b16 %v2206_v23  ;;  %v2913_v45 = vsel %vm2058_vm14, %v2887_v17, 0  ;;  %v2579_v52 = vrot.slane %v4500_v32, 5  ;;  %v4512_v47 = vld [vmem:[#allocation3 + $0x1c] sm:$0x1]  ;;  %v2361_v42 = vld [vmem:[#allocation3 + $0x10] sm:$0xf] }
 0x202   : > { %v1897_v22 = vsel %vm4371_vm1, %v1831_v44, %v1896_v27  ;;  %v1900_v29 = vsel %vm4379_vm2, %v1832_v58, %v1899_v3  ;;  %v3468_v30 = vld [vmem:[#allocation3 + $0x34] sm:$0xf0]  ;;  %v2010_v7 = vor.u32 %v2009_v18, %v2006_v25  ;;  %2922 = vmatpush.bf16.msra.mxu0 %v2913_v45  ;;  %v3400_v56 = vrot.slane %v2554_v33, 9  ;;  %v2359_v3 = vld [vmem:[#allocation3 + $0x8] sm:$0xf] }
 0x203   : > { %v2162_v4 = vld [vmem:[#allocation3 + $0x38] sm:$0xe]  ;;  %1898 = vst [vmem:[#allocation3 + $0x40] sm:$0xf] %v1897_v22  ;;  %v3358_v19 = vor.u32 %v3468_v30, %v3357_v14  ;;  %v1918_v10 = vld [vmem:[#allocation3 + $0x3c] sm:$0x1]  ;;  %v2580_v12 = vsel %vm4085_vm13, %v3399_v31, %v2579_v52 }
 0x204   : > { %v3370_v36 = vrot.slane %v2162_v4, 9  ;;  %1901 = vst [vmem:[#allocation3 + $0x44] sm:$0x1] %v1900_v29  ;;  %v2209_v62 = vrot.slane %v1918_v10, 5  ;;  %v1909_v41 = vld [vmem:[#allocation3 + $0x38] sm:$0xf]  ;;  %v2611_v17 = vunpack.c.l.b16 %v2580_v12 }
 0x205   : > { %3362 = vmatmul.msk.bf16.gmra.mxu2 %vm2045_vm3, %v3358_v19  ;;  %v2018_v11 = vshrl.u32 %v1909_v41, 16  ;;  %v2021_v35 = vshll.u32 %v1909_v41, 16  ;;  %v2027_v28 = vshll.u32 %v1918_v10, 16  ;;  %v2583_v43 = vrot.slane %v4502_v37, 5  ;;  %v3389_v60 = vld [vmem:[#allocation3 + $0x38] sm:$0xf] }
 0x206   : > { %v2210_v16 = vsel %vm4085_vm13, %v3370_v36, %v2209_v62  ;;  %v2775_v6 = vshrl.u32 %v2758_v15, 16  ;;  %v2778_v50 = vshll.u32 %v2758_v15, 16  ;;  %v2011_v61 = vrot.slane %v2010_v7, 4  ;;  %v4524_v21 = vld [vmem:[#allocation3 + $0x14] sm:$0x1] }
 0x207   : > { %v2220_v46 = vunpack.c.l.b16 %v2210_v16  ;;  %v2020_v39 = vrot.slane %v2018_v11, 4  ;;  %v2023_v0 = vrot.slane %v2021_v35, 5  ;;  %3341 = vmatmul.msk.bf16.gmra.mxu1 %vm2045_vm3, %v2043_v40  ;;  %v2789_v54 = vshrl.u32 %v2760_v38, 16  ;;  %v3009_v29 = vld [vmem:[#allocation9 + $0x20] sm:$0xf] }
 0x208   : > { %v2029_v63 = vrot.slane %v2027_v28, 5  ;;  %v2777_v51 = vrot.slane %v2775_v6, 4  ;;  %v2780_v24 = vrot.slane %v2778_v50, 5  ;;  %v2792_v9 = vshll.u32 %v2760_v38, 16  ;;  %v3473_v41 = vld [vmem:[#allocation3 + $0x14] sm:$0xf0] }
 0x209   : > { %v2224_v59 = vpack.c.b16 %v2220_v46, %v2219_v5  ;;  %v2024_v2 = vor.u32 %v2023_v0, %v2020_v39  ;;  %v2791_v27 = vrot.slane %v2789_v54, 4  ;;  %v2584_v44 = vsel %vm4085_vm13, %v3400_v56, %v2583_v43  ;;  %v2762_v5 = vld [vmem:[#allocation3 + $0x20] sm:$0xf]  ;;  %v3413_v16 = vld [vmem:[#allocation3 + $0x10] sm:$0xf] }
 0x20a   : > { %v3472_v55 = vld [vmem:[#allocation3 + $0x3c] sm:$0xf0]  ;;  %v2794_v58 = vrot.slane %v2792_v9, 5  ;;  %v2016_v53 = vsel %vm4033_vm10, %v2011_v61, %v2015_v57  ;;  %v2781_v23 = vor.u32 %v2780_v24, %v2777_v51  ;;  %v2798_v25 = vshll.u32 %v4512_v47, 16  ;;  %v2764_v45 = vld [vmem:[#allocation3 + $0x28] sm:$0xf] }
 0x20b   : > { %v3390_v8 = vor.u32 %v3472_v55, %v3389_v60  ;;  %v2025_v20 = vrot.slane %v2024_v2, 4  ;;  %v2376_v13 = vshrl.u32 %v2359_v3, 16  ;;  %v2379_v26 = vshll.u32 %v2359_v3, 16  ;;  %v4533_v0 = vld [vmem:[#allocation3 + $0x24] sm:$0x1] }
 0x20c   : > { %v2795_v18 = vor.u32 %v2794_v58, %v2791_v27  ;;  %v2390_v22 = vshrl.u32 %v2361_v42, 16  ;;  %v2612_v34 = vunpack.c.l.b16 %v2584_v44  ;;  %v2393_v30 = vshll.u32 %v2361_v42, 16  ;;  %v2556_v52 = vld [vmem:[#allocation3 + $0x20] sm:$0xe]  ;;  %v2555_v50 = vld [vmem:[#allocation3 + $0x18] sm:$0xe] }
 0x20d   : > { %3374 = vmatmul.msk.bf16.gmra.mxu3 %vm2045_vm3, %v2224_v59  ;;  %3394 = vmatmul.msk.bf16.gmra.mxu0 %vm2045_vm3, %v3390_v8  ;;  %v2030_v14 = vsel %vm4033_vm10, %v2025_v20, %v2029_v63  ;;  %v2784_v19 = vshll.u32 %v4524_v21, 16  ;;  %v2039_v36 = vunpack.c.l.b16 %v2016_v53  ;;  %v2782_v33 = vrot.slane %v2781_v23, 4  ;;  %v4538_v2 = vld [vmem:[#allocation3 + $0x1c] sm:$0x1]  ;;  %v2363_v9 = vld [vmem:[#allocation3 + $0x18] sm:$0xf] }
 0x20e   : > { %v2040_v4 = vunpack.c.l.b16 %v2030_v14  ;;  %v2796_v10 = vrot.slane %v2795_v18, 4  ;;  %v2800_v40 = vrot.slane %v2798_v25, 5  ;;  %v3035_v62 = vsel %vm2058_vm14, %v3009_v29, 0  ;;  %v2365_v42 = vld [vmem:[#allocation3 + $0x20] sm:$0xf] }
 0x20f   : > { %v2378_v57 = vrot.slane %v2376_v13, 4  ;;  %v2381_v7 = vrot.slane %v2379_v26, 5  ;;  %v2392_v11 = vrot.slane %v2390_v22, 4  ;;  %v2395_v35 = vrot.slane %v2393_v30, 5  ;;  %3044 = vmatpush.bf16.msra.mxu1 %v3035_v62  ;;  %v4543_v58 = vld [vmem:[#allocation3 + $0x24] sm:$0x1] }
 0x210   : > { %v2619_v31 = vpack.c.b16 %v2612_v34, %v2611_v17  ;;  %v2044_v15 = vpack.c.b16 %v2040_v4, %v2039_v36  ;;  %v2786_v28 = vrot.slane %v2784_v19, 5  ;;  %v2801_v48 = vsel %vm4033_vm10, %v2796_v10, %v2800_v40  ;;  %v4545_v23 = vld [vmem:[#allocation3 + $0x2c] sm:$0x1]  ;;  %v4556_v10 = vld [vmem:[#allocation3 + $0x24] sm:$0xf0] }
 0x211   : > { %v2803_v38 = vshrl.u32 %v2762_v5, 16  ;;  %v3414_v46 = vor.u32 %v3473_v41, %v3413_v16  ;;  %v2399_v39 = vshll.u32 %v4502_v37, 16  ;;  %v2382_v43 = vor.u32 %v2381_v7, %v2378_v57  ;;  %v3417_v7 = vld [vmem:[#allocation3 + $0x20] sm:$0xf] }
 0x212   : > { %v2787_v56 = vsel %vm4033_vm10, %v2782_v33, %v2786_v28  ;;  %v2396_v6 = vor.u32 %v2395_v35, %v2392_v11  ;;  %v2806_v59 = vshll.u32 %v2762_v5, 16  ;;  %v2889_v60 = vunpack.c.l.b16 %v2801_v48  ;;  %v2766_v33 = vld [vmem:[#allocation3 + $0x30] sm:$0xf]  ;;  %v4562_v48 = vld [vmem:[#allocation3 + $0x34] sm:$0x1] }
 0x213   : > { %v2385_v61 = vshll.u32 %v4500_v32, 16  ;;  %v2805_v54 = vrot.slane %v2803_v38, 4  ;;  %v2817_v55 = vshrl.u32 %v2764_v45, 16  ;;  %v3402_v37 = vrot.slane %v2556_v52, 9 }
 0x214   : > { %v2591_v63 = vrot.slane %v4533_v0, 5  ;;  %v2808_v51 = vrot.slane %v2806_v59, 5  ;;  %v2820_v24 = vshll.u32 %v2764_v45, 16  ;;  %v2888_v8 = vunpack.c.l.b16 %v2787_v56  ;;  %v2558_v45 = vld [vmem:[#allocation3 + $0x30] sm:$0xe] }
 0x215   : > { %3407 = vmatmul.msk.bf16.vlgmr.msra.gmra.mxu2 %vm2045_vm3, %v2619_v31  ;;  %v2401_v20 = vrot.slane %v2399_v39, 5  ;;  %v3401_v27 = vrot.slane %v2555_v50, 9  ;;  %v2819_v3 = vrot.slane %v2817_v55, 4  ;;  %v2383_v12 = vrot.slane %v2382_v43, 4  ;;  %v2768_v56 = vld [vmem:[#allocation3 + $0x38] sm:$0xf] }
 0x216   : > { %v2397_v44 = vrot.slane %v2396_v6, 4  ;;  %v2587_v32 = vrot.slane %v4538_v2, 5  ;;  %v2822_v53 = vrot.slane %v2820_v24, 5  ;;  %v2896_v14 = vpack.c.b16 %v2889_v60, %v2888_v8 }
 0x217   : > { %3342 = vmatmul.msk.bf16.gmra.mxu1 %vm2045_vm3, %v2044_v15  ;;  %v2809_v25 = vor.u32 %v2808_v51, %v2805_v54  ;;  %v2404_v18 = vshrl.u32 %v2363_v9, 16  ;;  %v2407_v13 = vshll.u32 %v2363_v9, 16  ;;  %v2592_v26 = vsel %vm4085_vm13, %v3402_v37, %v2591_v63  ;;  %v4569_v37 = vld [vmem:[#allocation3 + $0x2c] sm:$0x1] }
 0x218   : > { %v2823_v22 = vor.u32 %v2822_v53, %v2819_v3  ;;  %v2418_v29 = vshrl.u32 %v2365_v42, 16  ;;  %v2421_v34 = vshll.u32 %v2365_v42, 16  ;;  %v2812_v30 = vshll.u32 %v4543_v58, 16  ;;  %v4576_v53 = vld [vmem:[#allocation3 + $0x3c] sm:$0x1] }
 0x219   : > { %v2387_v4 = vrot.slane %v2385_v61, 5  ;;  %v2402_v17 = vsel %vm4033_vm10, %v2397_v44, %v2401_v20  ;;  %v2588_v19 = vsel %vm4085_vm13, %v3401_v27, %v2587_v32  ;;  %v2826_v36 = vshll.u32 %v4545_v23, 16  ;;  %v2367_v61 = vld [vmem:[#allocation3 + $0x28] sm:$0xf] }
 0x21a   : > { %v2614_v40 = vunpack.c.l.b16 %v2592_v26  ;;  %v2810_v62 = vrot.slane %v2809_v25, 4  ;;  %v2406_v5 = vrot.slane %v2404_v18, 4  ;;  %v2409_v41 = vrot.slane %v2407_v13, 5 }
 0x21b   : > { %v2388_v57 = vsel %vm4033_vm10, %v2383_v12, %v2387_v4  ;;  %v2824_v11 = vrot.slane %v2823_v22, 4  ;;  %v2420_v35 = vrot.slane %v2418_v29, 4  ;;  %v2423_v31 = vrot.slane %v2421_v34, 5  ;;  %v4574_v12 = vld [vmem:[#allocation3 + $0x34] sm:$0x1] }
 0x21c   : > { %v2613_v15 = vunpack.c.l.b16 %v2588_v19  ;;  %v3418_v16 = vor.u32 %v4556_v10, %v3417_v7  ;;  %v2814_v28 = vrot.slane %v2812_v30, 5  ;;  %v2831_v38 = vshrl.u32 %v2766_v33, 16  ;;  %v2369_v34 = vld [vmem:[#allocation3 + $0x30] sm:$0xf] }
 0x21d   : > { %3427 = vmatmul.msk.bf16.vlgmr.msra.gmra.mxu3 %vm2045_vm3, %v3414_v46  ;;  %3431 = vmatmul.msk.bf16.vlgmr.msra.gmra.mxu0 %vm2045_vm3, %v2896_v14  ;;  %v2490_v46 = vunpack.c.l.b16 %v2402_v17  ;;  %v2828_v39 = vrot.slane %v2826_v36, 5  ;;  %v2413_v52 = vshll.u32 %v4538_v2, 16  ;;  %v2834_v43 = vshll.u32 %v2766_v33, 16  ;;  %v2557_v2 = vld [vmem:[#allocation3 + $0x28] sm:$0xe] }
 0x21e   : > { %v2489_v6 = vunpack.c.l.b16 %v2388_v57  ;;  %v2620_v50 = vpack.c.b16 %v2614_v40, %v2613_v15  ;;  %v2815_v59 = vsel %vm4033_vm10, %v2810_v62, %v2814_v28  ;;  %v2410_v60 = vor.u32 %v2409_v41, %v2406_v5 }
 0x21f   : > { %v2829_v54 = vsel %vm4033_vm10, %v2824_v11, %v2828_v39  ;;  %v2424_v55 = vor.u32 %v2423_v31, %v2420_v35  ;;  %v3404_v63 = vrot.slane %v2558_v45, 9  ;;  %v2599_v51 = vrot.slane %v4562_v48, 5 }
 0x220   : > { %v2833_v24 = vrot.slane %v2831_v38, 4  ;;  %v2836_v9 = vrot.slane %v2834_v43, 5  ;;  %v2845_v8 = vshrl.u32 %v2768_v56, 16  ;;  %v2848_v20 = vshll.u32 %v2768_v56, 16  ;;  %v4593_v43 = vld [vmem:[#allocation3 + $0x3c] sm:$0x1] }
 0x221   : > { %v2497_v27 = vpack.c.b16 %v2490_v46, %v2489_v6  ;;  %v2415_v3 = vrot.slane %v2413_v52, 5  ;;  %v2427_v42 = vshll.u32 %v4533_v0, 16  ;;  %v2432_v44 = vshrl.u32 %v2367_v61, 16  ;;  %v2559_v6 = vld [vmem:[#allocation3 + $0x38] sm:$0xe] }
 0x222   : > { %v2891_v32 = vunpack.c.l.b16 %v2829_v54  ;;  %v2847_v14 = vrot.slane %v2845_v8, 4  ;;  %v2850_v25 = vrot.slane %v2848_v20, 5  ;;  %v2435_v18 = vshll.u32 %v2367_v61, 16 }
 0x223   : > { %v2890_v13 = vunpack.c.l.b16 %v2815_v59  ;;  %v2411_v26 = vrot.slane %v2410_v60, 4  ;;  %v3403_v22 = vrot.slane %v2557_v2, 9  ;;  %v2595_v29 = vrot.slane %v4569_v37, 5  ;;  %v2770_v59 = vld [vmem:[#allocation3 + $0x40] sm:$0xf] }
 0x224   : > { %v2425_v30 = vrot.slane %v2424_v55, 4  ;;  %v2600_v0 = vsel %vm4085_vm13, %v3404_v63, %v2599_v51  ;;  %v2837_v4 = vor.u32 %v2836_v9, %v2833_v24  ;;  %v2840_v17 = vshll.u32 %v4574_v12, 16  ;;  %v2772_v63 = vld [vmem:[#allocation3 + $0x48] sm:$0xf]  ;;  %v3475_v51 = vld [vmem:[#allocation3 + $0x34] sm:$0xf0] }
 0x225   : > { %3408 = vmatmul.msk.bf16.gmra.mxu2 %vm2045_vm3, %v2620_v50  ;;  %v2851_v19 = vor.u32 %v2850_v25, %v2847_v14  ;;  %v2854_v10 = vshll.u32 %v4576_v53, 16  ;;  %v2434_v36 = vrot.slane %v2432_v44, 4  ;;  %v2437_v33 = vrot.slane %v2435_v18, 5  ;;  %v2560_v50 = vld [vmem:[#allocation3 + $0x40] sm:$0xe] }
 0x226   : > { %v2897_v40 = vpack.c.b16 %v2891_v32, %v2890_v13  ;;  %v2429_v62 = vrot.slane %v2427_v42, 5  ;;  %v2446_v5 = vshrl.u32 %v2369_v34, 16  ;;  %v2449_v41 = vshll.u32 %v2369_v34, 16  ;;  %v3421_v42 = vld [vmem:[#allocation3 + $0x30] sm:$0xf] }
 0x227   : > { %3395 = vmatmul.msk.bf16.vlgmr.msrb.gmra.mxu1 %vm2045_vm3, %v2497_v27  ;;  %v2416_v57 = vsel %vm4033_vm10, %v2411_v26, %v2415_v3  ;;  %v2596_v7 = vsel %vm4085_vm13, %v3403_v22, %v2595_v29  ;;  %v2616_v35 = vunpack.c.l.b16 %v2600_v0  ;;  %v2838_v31 = vrot.slane %v2837_v4, 4  ;;  %v2952_v22 = vld [vmem:[#allocation3 + $0x10] sm:$0xe]  ;;  %v4609_v4 = vld [vmem:[#allocation3 + $0x4c] sm:$0x1] }
 0x228   : > { %v2430_v11 = vsel %vm4033_vm10, %v2425_v30, %v2429_v62  ;;  %v2842_v15 = vrot.slane %v2840_v17, 5  ;;  %v2852_v28 = vrot.slane %v2851_v19, 4  ;;  %v2856_v45 = vrot.slane %v2854_v10, 5  ;;  %v2953_v17 = vld [vmem:[#allocation3 + $0x18] sm:$0xe] }
 0x229   : > { %v2438_v38 = vor.u32 %v2437_v33, %v2434_v36  ;;  %v2441_v46 = vshll.u32 %v4569_v37, 16  ;;  %v2615_v39 = vunpack.c.l.b16 %v2596_v7  ;;  %v2448_v52 = vrot.slane %v2446_v5, 4  ;;  %v4613_v36 = vld [vmem:[#allocation3 + $0x44] sm:$0x1] }
 0x22a   : > { %v2451_v56 = vrot.slane %v2449_v41, 5  ;;  %v2491_v60 = vunpack.c.l.b16 %v2416_v57  ;;  %v2492_v61 = vunpack.c.l.b16 %v2430_v11  ;;  %v2843_v55 = vsel %vm4033_vm10, %v2838_v31, %v2842_v15  ;;  %v2954_v57 = vld [vmem:[#allocation3 + $0x20] sm:$0xe] }
 0x22b   : > { %v2621_v54 = vpack.c.b16 %v2616_v35, %v2615_v39  ;;  %v2857_v37 = vsel %vm4033_vm10, %v2852_v28, %v2856_v45  ;;  %v2439_v2 = vrot.slane %v2438_v38, 4  ;;  %v3405_v24 = vrot.slane %v2559_v6, 9  ;;  %v2955_v39 = vld [vmem:[#allocation3 + $0x28] sm:$0xe] }
 0x22c   : > { %v2603_v9 = vrot.slane %v4593_v43, 5  ;;  %v2452_v8 = vor.u32 %v2451_v56, %v2448_v52  ;;  %v3406_v20 = vrot.slane %v2560_v50, 9  ;;  %v2859_v3 = vshrl.u32 %v2770_v59, 16 }
 0x22d   : > { %3428 = vmatmul.msk.bf16.gmra.mxu3 %vm2045_vm3, %v3418_v16  ;;  %3432 = vmatmul.msk.bf16.gmra.mxu0 %vm2045_vm3, %v2897_v40  ;;  %v4595_v16 = vld [vmem:[#allocation3 + $0x44] sm:$0x1]  ;;  %v2443_v44 = vrot.slane %v2441_v46, 5  ;;  %v2862_v32 = vshll.u32 %v2770_v59, 16  ;;  %v2873_v14 = vshrl.u32 %v2772_v63, 16  ;;  %v2876_v25 = vshll.u32 %v2772_v63, 16 }
 0x22e   : > { %v2607_v27 = vrot.slane %v4595_v16, 5  ;;  %v2498_v18 = vpack.c.b16 %v2492_v61, %v2491_v60  ;;  %v3422_v13 = vor.u32 %v3475_v51, %v3421_v42  ;;  %v2455_v26 = vshll.u32 %v4562_v48, 16  ;;  %v2371_v46 = vld [vmem:[#allocation3 + $0x38] sm:$0xf]  ;;  %v2373_v61 = vld [vmem:[#allocation3 + $0x40] sm:$0xf] }
 0x22f   : > { %v2892_v29 = vunpack.c.l.b16 %v2843_v55  ;;  %v2893_v34 = vunpack.c.l.b16 %v2857_v37  ;;  %v2444_v30 = vsel %vm4033_vm10, %v2439_v2, %v2443_v44  ;;  %v2604_v0 = vsel %vm4085_vm13, %v3405_v24, %v2603_v9  ;;  %v2956_v55 = vld [vmem:[#allocation3 + $0x30] sm:$0xe] }
 0x230   : > { %v2453_v19 = vrot.slane %v2452_v8, 4  ;;  %v2608_v10 = vsel %vm4085_vm13, %v3406_v20, %v2607_v27  ;;  %v2861_v33 = vrot.slane %v2859_v3, 4  ;;  %v2882_v48 = vshll.u32 %v4609_v4, 16 }
 0x231   : > { %v2864_v40 = vrot.slane %v2862_v32, 5  ;;  %v2875_v62 = vrot.slane %v2873_v14, 4  ;;  %v2878_v5 = vrot.slane %v2876_v25, 5  ;;  %v3435_v41 = vrot.slane %v2952_v22, 9  ;;  %v2957_v25 = vld [vmem:[#allocation3 + $0x38] sm:$0xe] }
 0x232   : > { %v2457_v7 = vrot.slane %v2455_v26, 5  ;;  %v2617_v11 = vunpack.c.l.b16 %v2604_v0  ;;  %v2978_v35 = vrot.slane %v4524_v21, 5  ;;  %v3436_v31 = vrot.slane %v2953_v17, 9 }
 0x233   : > { %v2898_v15 = vpack.c.b16 %v2893_v34, %v2892_v29  ;;  %v2493_v28 = vunpack.c.l.b16 %v2444_v30  ;;  %v2618_v45 = vunpack.c.l.b16 %v2608_v10  ;;  %v2868_v38 = vshll.u32 %v4613_v36, 16 }
 0x234   : > { %v2458_v52 = vsel %vm4033_vm10, %v2453_v19, %v2457_v7  ;;  %v2979_v56 = vsel %vm4085_vm13, %v3435_v41, %v2978_v35  ;;  %v2982_v6 = vrot.slane %v4512_v47, 5  ;;  %v3437_v50 = vrot.slane %v2954_v57, 9  ;;  %v3476_v57 = vld [vmem:[#allocation3 + $0x44] sm:$0xf0] }
 0x235   : > { %3409 = vmatmul.msk.bf16.gmra.mxu2 %vm2045_vm3, %v2621_v54  ;;  %v2865_v59 = vor.u32 %v2864_v40, %v2861_v33  ;;  %v2879_v60 = vor.u32 %v2878_v5, %v2875_v62  ;;  %v2884_v21 = vrot.slane %v2882_v48, 5  ;;  %v2986_v54 = vrot.slane %v4543_v58, 5 }
 0x236   : > { %v2460_v63 = vshrl.u32 %v2371_v46, 16  ;;  %v2463_v51 = vshll.u32 %v2371_v46, 16  ;;  %v2983_v37 = vsel %vm4085_vm13, %v3436_v31, %v2982_v6  ;;  %v3438_v2 = vrot.slane %v2955_v39, 9  ;;  %v2959_v46 = vld [vmem:[#allocation3 + $0x48] sm:$0xe] }
 0x237   : > { %3396 = vmatmul.msk.bf16.gmra.mxu1 %vm2045_vm3, %v2498_v18  ;;  %v3010_v24 = vunpack.c.l.b16 %v2979_v56  ;;  %v3011_v47 = vunpack.c.l.b16 %v2983_v37  ;;  %v2987_v9 = vsel %vm4085_vm13, %v3437_v50, %v2986_v54  ;;  %v2990_v8 = vrot.slane %v4545_v23, 5 }
 0x238   : > { %v2474_v20 = vshrl.u32 %v2373_v61, 16  ;;  %v2477_v58 = vshll.u32 %v2373_v61, 16  ;;  %v3439_v27 = vrot.slane %v2956_v55, 9  ;;  %v2994_v3 = vrot.slane %v4574_v12, 5 }
 0x239   : > { %v2866_v42 = vrot.slane %v2865_v59, 4  ;;  %v2880_v44 = vrot.slane %v2879_v60, 4  ;;  %v3018_v32 = vpack.c.b16 %v3011_v47, %v3010_v24  ;;  %v2991_v14 = vsel %vm4085_vm13, %v3438_v2, %v2990_v8 }
 0x23a   : > { %v2622_v18 = vpack.c.b16 %v2618_v45, %v2617_v11  ;;  %v3013_v26 = vunpack.c.l.b16 %v2991_v14  ;;  %v3440_v22 = vrot.slane %v2957_v25, 9  ;;  %v2494_v29 = vunpack.c.l.b16 %v2458_v52 }
 0x23b   : > { %v2870_v34 = vrot.slane %v2868_v38, 5  ;;  %v2995_v23 = vsel %vm4085_vm13, %v3439_v27, %v2994_v3  ;;  %v2998_v30 = vrot.slane %v4576_v53, 5  ;;  %v2462_v0 = vrot.slane %v2460_v63, 4  ;;  %v3425_v53 = vld [vmem:[#allocation3 + $0x40] sm:$0xf] }
 0x23c   : > { %v2476_v12 = vrot.slane %v2474_v20, 4  ;;  %v2479_v17 = vrot.slane %v2477_v58, 5  ;;  %v2885_v33 = vsel %vm4033_vm10, %v2880_v44, %v2884_v21  ;;  %v2465_v48 = vrot.slane %v2463_v51, 5  ;;  %v2958_v38 = vld [vmem:[#allocation3 + $0x40] sm:$0xe] }
 0x23d   : > { %3429 = vmatmul.msk.bf16.gmra.mxu3 %vm2045_vm3, %v3422_v13  ;;  %3433 = vmatmul.msk.bf16.gmra.mxu0 %vm2045_vm3, %v2898_v15  ;;  %v3012_v13 = vunpack.c.l.b16 %v2987_v9  ;;  %v2871_v10 = vsel %vm4033_vm10, %v2866_v42, %v2870_v34  ;;  %v2999_v40 = vsel %vm4085_vm13, %v3440_v22, %v2998_v30  ;;  %v3014_v62 = vunpack.c.l.b16 %v2995_v23 }
 0x23e   : > { %v3015_v5 = vunpack.c.l.b16 %v2999_v40  ;;  %v2499_v41 = vpack.c.b16 %v2494_v29, %v2493_v28  ;;  %v2894_v7 = vunpack.c.l.b16 %v2871_v10  ;;  %v2895_v11 = vunpack.c.l.b16 %v2885_v33 }
 0x23f   : > { %v3019_v19 = vpack.c.b16 %v3013_v26, %v3012_v13  ;;  %v2480_v35 = vor.u32 %v2479_v17, %v2476_v12  ;;  %v2466_v15 = vor.u32 %v2465_v48, %v2462_v0  ;;  %v2483_v45 = vshll.u32 %v4595_v16, 16 }
 0x240   : > { %v3020_v31 = vpack.c.b16 %v3015_v5, %v3014_v62  ;;  %v3441_v39 = vrot.slane %v2958_v38, 9  ;;  %v3002_v52 = vrot.slane %v4613_v36, 5  ;;  %v3442_v56 = vrot.slane %v2959_v46, 9 }
 0x241   : > { %v3006_v6 = vrot.slane %v4609_v4, 5  ;;  %v3426_v28 = vor.u32 %v3476_v57, %v3425_v53  ;;  %v2469_v50 = vshll.u32 %v4593_v43, 16  ;;  %v2899_v59 = vpack.c.b16 %v2895_v11, %v2894_v7 }
 0x242   : > { %v2481_v60 = vrot.slane %v2480_v35, 4  ;;  %v3003_v21 = vsel %vm4085_vm13, %v3441_v39, %v3002_v52  ;;  %v2467_v36 = vrot.slane %v2466_v15, 4  ;;  %v2485_v55 = vrot.slane %v2483_v45, 5 }
 0x243   : > { %v3007_v61 = vsel %vm4085_vm13, %v3442_v56, %v3006_v6  ;;  %v3016_v16 = vunpack.c.l.b16 %v3003_v21  ;;  %v2471_v63 = vrot.slane %v2469_v50, 5 }
 0x244   : > { %v3017_v54 = vunpack.c.l.b16 %v3007_v61  ;;  %v2486_v43 = vsel %vm4033_vm10, %v2481_v60, %v2485_v55 }
 0x245   : > { %3410 = vmatmul.msk.bf16.gmra.mxu2 %vm2045_vm3, %v2622_v18  ;;  %v2472_v51 = vsel %vm4033_vm10, %v2467_v36, %v2471_v63  ;;  %v2496_v37 = vunpack.c.l.b16 %v2486_v43 }
 0x246   : > { %v3021_v4 = vpack.c.b16 %v3017_v54, %v3016_v16  ;;  %v2495_v2 = vunpack.c.l.b16 %v2472_v51 }
 0x247   : > { %3397 = vmatmul.msk.bf16.gmra.mxu1 %vm2045_vm3, %v2499_v41 }
 0x248   : > { %v2500_v49 = vpack.c.b16 %v2496_v37, %v2495_v2  ;;  %v4706_v37 = vld [vmem:[%s4793_s4] ss:$0 sm:$0xff] }
 0x24d   : > { %3430 = vmatmul.msk.bf16.gmra.mxu3 %vm2045_vm3, %v3426_v28  ;;  %3434 = vmatmul.msk.bf16.gmra.mxu0 %vm2045_vm3, %v2899_v59 }
 0x257   : > { %3398 = vmatmul.msk.bf16.gmra.mxu1 %vm2045_vm3, %v2500_v49 }
 0x258   : > { %v2135_v8 = vpop.f32.mrf.mxu2 }
 0x25a   : > { %v2331_v27 = vpop.f32.mrf.mxu0 }
 0x25e   : > { %v2249_v58 = vpop.f32.mrf.mxu3 }
 0x260   : > { %v2137_v1 = vpop.f32.mrf.mxu2 }
 0x262   : > { %v2333_v14 = vpop.f32.mrf.mxu0 }
 0x264   : > { %v2071_v24 = vpop.f32.mrf.mxu1 }
 0x265   : > { %v2136_v15 = vadd.f32 %v2135_v8, %v2071_v24 }
 0x266   : > { %v2251_v42 = vpop.f32.mrf.mxu3 }
 0x267   : > { %3443 = vmatmul.msk.bf16.vlgmr.msra.gmra.mxu1 %vm2045_vm3, %v3018_v32  ;;  %v2269_v38 = vadd.f32 %v2249_v58, %v2136_v15 }
 0x268   : > { %v2140_v25 = vpop.f32.mrf.mxu2 }
 0x269   : > { %v2351_v56 = vadd.f32 %v2331_v27, %v2269_v38 }
 0x26a   : > { %v2336_v13 = vpop.f32.mrf.mxu0 }
 0x26c   : > { %v2073_v47 = vpop.f32.mrf.mxu1 }
 0x26d   : > { %v2138_v52 = vadd.f32 %v2137_v1, %v2073_v47 }
 0x26f   : > { %v2270_v50 = vadd.f32 %v2251_v42, %v2138_v52 }
 0x270   : > { %v2254_v18 = vpop.f32.mrf.mxu3  ;;  %v2142_v26 = vpop.f32.mrf.mxu2 }
 0x271   : > { %v2352_v16 = vadd.f32 %v2333_v14, %v2270_v50 }
 0x272   : > { %v2338_v34 = vpop.f32.mrf.mxu0 }
 0x274   : > { %v2076_v9 = vpop.f32.mrf.mxu1 }
 0x275   : > { %v2141_v61 = vadd.f32 %v2140_v25, %v2076_v9 }
 0x277   : > { %3444 = vmatmul.msk.bf16.gmra.mxu1 %vm2045_vm3, %v3019_v19  ;;  %v2271_v63 = vadd.f32 %v2254_v18, %v2141_v61 }
 0x278   : > { %v2256_v29 = vpop.f32.mrf.mxu3  ;;  %v2145_v23 = vpop.f32.mrf.mxu2 }
 0x279   : > { %v2353_v47 = vadd.f32 %v2336_v13, %v2271_v63 }
 0x27a   : > { %v4675_v12 = vpop.f32.mrf.mxu0 }
 0x27c   : > { %v2078_v20 = vpop.f32.mrf.mxu1 }
 0x27d   : > { %v2143_v24 = vadd.f32 %v2142_v26, %v2078_v20 }
 0x27f   : > { %v2272_v42 = vadd.f32 %v2256_v29, %v2143_v24 }
 0x280   : > { %v4673_v0 = vpop.f32.mrf.mxu3  ;;  %v4677_v19 = vpop.f32.mrf.mxu2 }
 0x281   : > { %v2354_v26 = vadd.f32 %v2338_v34, %v2272_v42 }
 0x282   : > { %v4681_v48 = vpop.f32.mrf.mxu0 }
 0x284   : > { %v4663_v3 = vpop.f32.mrf.mxu1 }
 0x285   : > { %v2146_v13 = vadd.f32 %v2145_v23, %v4663_v3 }
 0x287   : > { %3445 = vmatmul.msk.bf16.gmra.mxu1 %vm2045_vm3, %v3020_v31 }
 0x288   : > { %v4679_v10 = vpop.f32.mrf.mxu3  ;;  %v4683_v40 = vpop.f32.mrf.mxu2 }
 0x28a   : > { %v4687_v41 = vpop.f32.mrf.mxu0 }
 0x28c   : > { %v4666_v44 = vpop.f32.mrf.mxu1 }
 0x28d   : > { %v2148_v3 = vadd.f32 %v4677_v19, %v4666_v44 }
 0x290   : > { %v4685_v62 = vpop.f32.mrf.mxu3  ;;  %v4689_v53 = vpop.f32.mrf.mxu2 }
 0x292   : > { %v4695_v11 = vpop.f32.mrf.mxu0 }
 0x294   : > { %v4668_v32 = vpop.f32.mrf.mxu1 }
 0x295   : > { %v2151_v44 = vadd.f32 %v4683_v40, %v4668_v32 }
 0x297   : > { %3446 = vmatmul.msk.bf16.gmra.mxu1 %vm2045_vm3, %v3021_v4 }
 0x298   : > { %v4693_v7 = vpop.f32.mrf.mxu3  ;;  %v2647_v35 = vpop.f32.mrf.mxu2 }
 0x29a   : > { %v2924_v46 = vpop.f32.mrf.mxu0 }
 0x29c   : > { %v4671_v22 = vpop.f32.mrf.mxu1 }
 0x29d   : > { %v2153_v32 = vadd.f32 %v4689_v53, %v4671_v22 }
 0x2a0   : > { %v2730_v45 = vpop.f32.mrf.mxu3  ;;  %v2649_v6 = vpop.f32.mrf.mxu2 }
 0x2a2   : > { %v2926_v54 = vpop.f32.mrf.mxu0 }
 0x2a4   : > { %v2525_v30 = vpop.f32.mrf.mxu1 }
 0x2a5   : > { %v2545_v28 = vadd.f32 %v2525_v30, %v2351_v56 }
 0x2a7   : > { %v2667_v60 = vadd.f32 %v2647_v35, %v2545_v28 }
 0x2a8   : > { %v2732_v59 = vpop.f32.mrf.mxu3  ;;  %v2652_v4 = vpop.f32.mrf.mxu2 }
 0x2a9   : > { %v2750_v36 = vadd.f32 %v2730_v45, %v2667_v60  ;;  %v2273_v45 = vadd.f32 %v4673_v0, %v2146_v13  ;;  %v2274_v60 = vadd.f32 %v4679_v10, %v2148_v3 }
 0x2aa   : > { %v2929_v1 = vpop.f32.mrf.mxu0 }
 0x2ab   : > { %v2944_v51 = vadd.f32 %v2924_v46, %v2750_v36  ;;  %v2355_v34 = vadd.f32 %v4675_v12, %v2273_v45  ;;  %v2356_v12 = vadd.f32 %v4681_v48, %v2274_v60 }
 0x2ac   : > { %v2527_v17 = vpop.f32.mrf.mxu1 }
 0x2ad   : > { %v2546_v55 = vadd.f32 %v2527_v17, %v2352_v16 }
 0x2af   : > { %v2668_v43 = vadd.f32 %v2649_v6, %v2546_v55 }
 0x2b0   : > { %v2735_v2 = vpop.f32.mrf.mxu3  ;;  %v2654_v25 = vpop.f32.mrf.mxu2 }
 0x2b1   : > { %v2751_v9 = vadd.f32 %v2732_v59, %v2668_v43  ;;  %v2275_v43 = vadd.f32 %v4685_v62, %v2151_v44 }
 0x2b2   : > { %v2931_v46 = vpop.f32.mrf.mxu0 }
 0x2b3   : > { %v2945_v30 = vadd.f32 %v2926_v54, %v2751_v9  ;;  %v2357_v48 = vadd.f32 %v4687_v41, %v2275_v43 }
 0x2b4   : > { %v2530_v33 = vpop.f32.mrf.mxu1 }
 0x2b5   : > { %v2547_v58 = vadd.f32 %v2530_v33, %v2353_v47 }
 0x2b7   : > { %v2669_v18 = vadd.f32 %v2652_v4, %v2547_v58 }
 0x2b8   : > { %v2737_v33 = vpop.f32.mrf.mxu3  ;;  %v2657_v6 = vpop.f32.mrf.mxu2 }
 0x2b9   : > { %v2752_v35 = vadd.f32 %v2735_v2, %v2669_v18 }
 0x2ba   : > { %v2934_v36 = vpop.f32.mrf.mxu0 }
 0x2bb   : > { %v2946_v56 = vadd.f32 %v2929_v1, %v2752_v35 }
 0x2bc   : > { %v2532_v5 = vpop.f32.mrf.mxu1 }
 0x2bd   : > { %v2548_v15 = vadd.f32 %v2532_v5, %v2354_v26 }
 0x2bf   : > { %v2670_v52 = vadd.f32 %v2654_v25, %v2548_v15 }
 0x2c0   : > { %v2740_v59 = vpop.f32.mrf.mxu3 }
 0x2c1   : > { %v2753_v5 = vadd.f32 %v2737_v33, %v2670_v52 }
 0x2c3   : > { %v2947_v54 = vadd.f32 %v2931_v46, %v2753_v5 }
 0x2c4   : > { %v4691_v57 = vpop.f32.mrf.mxu1 }
 0x2c5   : > { %v2549_v50 = vadd.f32 %v4691_v57, %v2355_v34  ;;  %v2659_v57 = vpop.f32.mrf.mxu2 }
 0x2c7   : > { %v2671_v16 = vadd.f32 %v2657_v6, %v2549_v50 }
 0x2c8   : > { %v2742_v2 = vpop.f32.mrf.mxu3 }
 0x2c9   : > { %v2754_v4 = vadd.f32 %v2740_v59, %v2671_v16 }
 0x2cb   : > { %v2948_v24 = vadd.f32 %v2934_v36, %v2754_v4 }
 0x2cc   : > { %v4697_v31 = vpop.f32.mrf.mxu1 }
 0x2cd   : > { %v2550_v63 = vadd.f32 %v4697_v31, %v2356_v12  ;;  %v2662_v58 = vpop.f32.mrf.mxu2 }
 0x2d0   : > { %v2745_v25 = vpop.f32.mrf.mxu3 }
 0x2d4   : > { %v4699_v39 = vpop.f32.mrf.mxu1 }
 0x2d5   : > { %v2551_v9 = vadd.f32 %v4699_v39, %v2357_v48  ;;  %v2664_v13 = vpop.f32.mrf.mxu2 }
 0x2d7   : > { %v2673_v42 = vadd.f32 %v2662_v58, %v2551_v9 }
 0x2d8   : > { %v2747_v15 = vpop.f32.mrf.mxu3 }
 0x2d9   : > { %v2756_v18 = vadd.f32 %v2745_v25, %v2673_v42 }
 0x2dc   : > { %v4701_v21 = vpop.f32.mrf.mxu1 }
 0x2e4   : > { %v3046_v49 = vpop.f32.mrf.mxu1 }
 0x2e5   : > { %v3066_v8 = vadd.f32 %v3046_v49, %v2944_v51  ;;  %v2672_v49 = vadd.f32 %v2659_v57, %v2550_v63 }
 0x2e7   : > { %v3078_v27 = vadd.f32 %v4706_v37, %v3066_v8  ;;  %v2936_v8 = vpop.f32.mrf.mxu0  ;;  %v2755_v31 = vadd.f32 %v2742_v2, %v2672_v49 }
 0x2e9   : > { %v3086_v14 = vmax.f32 %v3078_v27, 0.0  ;;  %v2276_v27 = vadd.f32 %v4693_v7, %v2153_v32 }
 0x2eb   : > { %3094 = vst.msk [vmem:[%s4711_s13] sm:$0xff] %vm2045_vm3, %v3086_v14  ;;  %v2949_v14 = vadd.f32 %v2936_v8, %v2755_v31  ;;  %v2358_v41 = vadd.f32 %v4695_v11, %v2276_v27 }
 0x2ec   : > { %v3048_v20 = vpop.f32.mrf.mxu1 }
 0x2ed   : > { %v3067_v17 = vadd.f32 %v3048_v20, %v2945_v30  ;;  %v2552_v39 = vadd.f32 %v4701_v21, %v2358_v41 }
 0x2ef   : > { %v3079_v29 = vadd.f32 %v4706_v37, %v3067_v17  ;;  %v2939_v20 = vpop.f32.mrf.mxu0  ;;  %v2674_v26 = vadd.f32 %v2664_v13, %v2552_v39 }
 0x2f0   : > { %v2950_v17 = vadd.f32 %v2939_v20, %v2756_v18 }
 0x2f1   : > { %v3087_v38 = vmax.f32 %v3079_v29, 0.0  ;;  %v2757_v11 = vadd.f32 %v2747_v15, %v2674_v26 }
 0x2f3   : > { %3095 = vst.msk [vmem:[%s4711_s13 + $0x8] sm:$0xff] %vm2045_vm3, %v3087_v38 }
 0x2f4   : > { %v3051_v28 = vpop.f32.mrf.mxu1 }
 0x2f5   : > { %v3068_v23 = vadd.f32 %v3051_v28, %v2946_v56 }
 0x2f7   : > { %v3080_v0 = vadd.f32 %v4706_v37, %v3068_v23  ;;  %v2941_v45 = vpop.f32.mrf.mxu0 }
 0x2f8   : > { %v2951_v38 = vadd.f32 %v2941_v45, %v2757_v11 }
 0x2f9   : > { %v3088_v61 = vmax.f32 %v3080_v0, 0.0 }
 0x2fb   : > { %3096 = vst.msk [vmem:[%s4711_s13 + $0x10] sm:$0xff] %vm2045_vm3, %v3088_v61 }
 0x2fc   : > { %v3053_v55 = vpop.f32.mrf.mxu1 }
 0x2fd   : > { %v3069_v19 = vadd.f32 %v3053_v55, %v2947_v54 }
 0x2ff   : > { %v3081_v10 = vadd.f32 %v4706_v37, %v3069_v19 }
 0x301   : > { %v3089_v51 = vmax.f32 %v3081_v10, 0.0 }
 0x303   : > { %3097 = vst.msk [vmem:[%s4711_s13 + $0x18] sm:$0xff] %vm2045_vm3, %v3089_v51 }
 0x304   : > { %v3056_v47 = vpop.f32.mrf.mxu1 }
 0x305   : > { %v3070_v40 = vadd.f32 %v3056_v47, %v2948_v24 }
 0x307   : > { %v3082_v62 = vadd.f32 %v4706_v37, %v3070_v40 }
 0x309   : > { %v3090_v1 = vmax.f32 %v3082_v62, 0.0 }
 0x30b   : > { %3098 = vst.msk [vmem:[%s4711_s13 + $0x20] sm:$0xff] %vm2045_vm3, %v3090_v1 }
 0x30c   : > { %v3058_v22 = vpop.f32.mrf.mxu1 }
 0x30d   : > { %v3071_v53 = vadd.f32 %v3058_v22, %v2949_v14 }
 0x30f   : > { %v3083_v30 = vadd.f32 %v4706_v37, %v3071_v53 }
 0x311   : > { %v3091_v7 = vmax.f32 %v3083_v30, 0.0 }
 0x313   : > { %3099 = vst.msk [vmem:[%s4711_s13 + $0x28] sm:$0xff] %vm2045_vm3, %v3091_v7 }
 0x314   : > { %v3061_v33 = vpop.f32.mrf.mxu1 }
 0x315   : > { %v3072_v35 = vadd.f32 %v3061_v33, %v2950_v17 }
 0x317   : > { %v3084_v29 = vadd.f32 %v4706_v37, %v3072_v35 }
 0x319   : > { %v3092_v21 = vmax.f32 %v3084_v29, 0.0 }
 0x31b   : > { %3100 = vst.msk [vmem:[%s4711_s13 + $0x30] sm:$0xff] %vm2045_vm3, %v3092_v21 }
 0x31c   : > { %v3063_v46 = vpop.f32.mrf.mxu1 }
 0x31d   : > { %v3073_v52 = vadd.f32 %v3063_v46, %v2951_v38 }
 0x31f   : > { %v3085_v56 = vadd.f32 %v4706_v37, %v3073_v52 }
 0x321   : > { %v3093_v6 = vmax.f32 %v3085_v56, 0.0 }
 0x323   : > { %3101 = vst.msk [vmem:[%s4711_s13 + $0x38] sm:$0xff] %vm2045_vm3, %v3093_v6 }
 0x324   : > { %3689 = shalt.err (!%p3686_p10)
}
 0x325   : > { %s3742_s10 = smov 128   ;;  %s3743_s12 = smov 8  }
 0x326   : > { %3490 = dma.vmem_to_hbm [thread:$0]  (%p3846_p5), %s3116_s9, 1024, %s3118_s28, %s3103_s22, %s3742_s10, %s3742_s10, %s3743_s12  }
 0x327 PF: > { %s3132_s13 = sand.u32 1, %s3720_s18   ;;  %p4814_p12 = scmp.ge.s32.totalorder %s3732_s21, 2 }
 0x328   : > { %s3133_s17 = scalar_lea.sflag [#allocation6], %s3132_s13 }
 0x329   : > { %p3504_p13 = pnand %p4814_p12, %p3809_p6 }
 0x32b   : > { %p3505_p0 = pneg %p3504_p13 }
 0x32d   : > { %3715 = dma.done.wait (%p3505_p0), %s3133_s17, 1024  }
 0x32e   : > { %3717 = vsyncadd (%p3505_p0), %s3133_s17, 4294966272  ;;  %p19_p3 = scmp.ge.s32.totalorder %s3833_s16, 4   ;;  %s4815_s18 = smov %s3724_s19 }
 0x32f   : > { %s4816_s19 = smov %s3728_s20  ;;  %s4817_s20 = smov %s3842_s26 }
 0x330   : > { %s4818_s21 = smov %s3833_s16  ;;  %21 = sbr.rel (!%p19_p3) target bundleno = 6 (0x6), region = 114 }
 0x335   :  { %3139 = vsyncpa [#allocation5], 1 }
 0x336   :  { %3141 = vsyncpa [#allocation5 + $0x1], 1 }
 0x337   :  { %3142 = vsyncpa [#allocation8], 1 }
 0x338   :  { %3143 = vsyncpa [#allocation6], 1 }
 0x339   :  { %3145 = vsyncpa [#allocation6 + $0x1], 1 }

</bundles_post_ra>
